<compile_context>
chip_gen: v7x
topology: tpu7x:2x2x1
jax: 0.10.0
libtpu: 0.0.40
codegen_flags: <defaults>
</compile_context>

<pallas_src>
import jax
import jax.numpy as jnp
from jax.experimental import pallas as pl
from jax.experimental.pallas import tpu as pltpu


KSZ = 7            # conv kernel size
PAD = KSZ // 2     # conv padding (3)
LANES = 128        # one lane block per conv input channel


def _sigmoid(x):
    # exp on the EUP + approximate EUP reciprocal: frees the VALU slots.
    return pl.reciprocal(1.0 + jnp.exp(-x), approx=True)


def avam_kernel(img_ref, aud_ref, bavg_ref, bmax_ref, bfin_ref,
                biasavg_ref, biasmax_ref, biasfin_ref, mask_ref,
                out_ref, pad_ref):
    """One grid step == one batch element.

    img_ref/aud_ref/out_ref : VMEM (1, C, H, W)
    bavg/bmax/bfin_ref      : VMEM (7, 2*128, 128) banded conv weight matrices
    bias*_ref, mask_ref     : VMEM (1, 128)
    pad_ref                 : VMEM scratch (HP, 4*128), HP = roundup(H + 6, 8)
    """
    H, W = img_ref.shape[2], img_ref.shape[3]

    img = img_ref[0].astype(jnp.float32)          # (C, H, W)
    aud = aud_ref[0].astype(jnp.float32)

    # Channel reductions (torch.max(x, 1)[0] / torch.mean(x, 1)) — pure VPU.
    img_max = jnp.max(img, axis=0)
    aud_max = jnp.max(aud, axis=0)
    img_avg = jnp.mean(img, axis=0)
    aud_avg = jnp.mean(aud, axis=0)

    # Zero the padded staging buffer ONCE per step; only interiors are written
    # below, so the halo (rows 0:PAD, PAD+H:HP and lanes >= W of each block)
    # stays zero for both conv stages.
    pad_ref[...] = jnp.zeros_like(pad_ref)

    # Channel c occupies lanes [c*128, c*128 + W); spatial column == lane
    # offset within the block (horizontal padding lives in the band matrix).
    pad_ref[PAD:PAD + H, 0 * LANES:0 * LANES + W] = img_avg
    pad_ref[PAD:PAD + H, 1 * LANES:1 * LANES + W] = aud_avg
    pad_ref[PAD:PAD + H, 2 * LANES:2 * LANES + W] = img_max
    pad_ref[PAD:PAD + H, 3 * LANES:3 * LANES + W] = aud_max

    # ---- stage 1: avg-path and max-path 7x7 convs on the MXU ----------------
    acc_avg = jnp.zeros((H, LANES), jnp.float32)
    acc_max = jnp.zeros((H, LANES), jnp.float32)
    for ky in range(KSZ):
        acc_avg = acc_avg + jnp.dot(pad_ref[ky:ky + H, 0:2 * LANES],
                                    bavg_ref[ky],
                                    preferred_element_type=jnp.float32)
        acc_max = acc_max + jnp.dot(pad_ref[ky:ky + H, 2 * LANES:4 * LANES],
                                    bmax_ref[ky],
                                    preferred_element_type=jnp.float32)

    mask = mask_ref[...]                                        # (1, 128)
    s_avg = _sigmoid(acc_avg + biasavg_ref[...]) * mask         # (H, 128)
    s_max = _sigmoid(acc_max + biasmax_ref[...]) * mask         # (H, 128)

    # F_1 -> channels 0,1 of the staging buffer (lane-block aligned stores);
    # the mask re-zeroed the lanes >= W so the horizontal halo stays zero.
    pad_ref[PAD:PAD + H, 0:LANES] = s_avg
    pad_ref[PAD:PAD + H, LANES:2 * LANES] = s_max

    # ---- stage 2: final 7x7 conv on the MXU ----------------------------------
    acc_fin = jnp.zeros((H, LANES), jnp.float32)
    for ky in range(KSZ):
        acc_fin = acc_fin + jnp.dot(pad_ref[ky:ky + H, 0:2 * LANES],
                                    bfin_ref[ky],
                                    preferred_element_type=jnp.float32)
    m = _sigmoid(acc_fin + biasfin_ref[...])                    # (H, 128); [:, :W] valid

    # ---- gating: out = image * M ---------------------------------------------
    gate = m[:, 0:W]                                            # (H, W)
    out_ref[0] = (img * gate[None, :, :]).astype(out_ref.dtype)


def _band_blocks(w_c, W):
    """Banded matrix for one conv input channel (zero horizontal padding baked in).

    Returns (KSZ, LANES, W) with block[ky, i, j] = w_c[ky, i - j + PAD] when
    0 <= i - j + PAD < KSZ, so
      (slab @ block)[y, j] = sum_kx w_c[ky, kx] * slab[y, j + kx - PAD],
    where out-of-range lanes (implicit zero padding) simply don't contribute.
    """
    i = jnp.arange(LANES)[None, :, None]
    j = jnp.arange(W)[None, None, :]
    d = i - j + PAD
    ky = jnp.arange(KSZ)[:, None, None]
    vals = w_c[ky, jnp.clip(d, 0, KSZ - 1)]
    return jnp.where((d >= 0) & (d < KSZ), vals, 0.0).astype(jnp.float32)


def _build_operands(params, W):
    """Wrapper-side precompute of banded weight matrices / bias rows / halo mask."""

    def two_channel_band(w):
        band = jnp.zeros((KSZ, 2 * LANES, LANES), jnp.float32)
        band = band.at[:, 0:LANES, 0:W].set(_band_blocks(w[0, 0], W))
        band = band.at[:, LANES:2 * LANES, 0:W].set(_band_blocks(w[0, 1], W))
        return band

    band_avg = two_channel_band(params["Wavg"])
    band_max = two_channel_band(params["Wmax"])
    band_fin = two_channel_band(params["Wfin"])

    bias_avg = jnp.full((1, LANES), params["bavg"][0], jnp.float32)
    bias_max = jnp.full((1, LANES), params["bmax"][0], jnp.float32)
    bias_fin = jnp.full((1, LANES), params["bfin"][0], jnp.float32)
    mask = (jnp.arange(LANES) < W).astype(jnp.float32).reshape(1, LANES)
    return band_avg, band_max, band_fin, bias_avg, bias_max, bias_fin, mask


@jax.jit
def avam_forward(image, audio, params):
    B, C, H, W = image.shape
    if W + 2 * PAD > LANES:
        raise NotImplementedError("W must satisfy W + 6 <= 128 (see TODO above)")
    HP = ((H + 2 * PAD + 7) // 8) * 8      # sublane-aligned padded height

    band_avg, band_max, band_fin, bias_avg, bias_max, bias_fin, mask = \
        _build_operands(params, W)

    io_spec = pl.BlockSpec((1, C, H, W), lambda b: (b, 0, 0, 0))
    band_spec = pl.BlockSpec((KSZ, 2 * LANES, LANES), lambda b: (0, 0, 0))
    row_spec = pl.BlockSpec((1, LANES), lambda b: (0, 0))

    return pl.pallas_call(
        avam_kernel,
        out_shape=jax.ShapeDtypeStruct(image.shape, image.dtype),
        grid=(B,),
        in_specs=[
            io_spec,            # image
            io_spec,            # audio
            band_spec,          # avg-path banded weights
            band_spec,          # max-path banded weights
            band_spec,          # final-conv banded weights
            row_spec,           # bias avg
            row_spec,           # bias max
            row_spec,           # bias final
            row_spec,           # valid-column mask
        ],
        out_specs=io_spec,
        scratch_shapes=[pltpu.VMEM((HP, 4 * LANES), jnp.float32)],
        compiler_params=pltpu.CompilerParams(
            dimension_semantics=("parallel",),     # v7x: shard batch over both TCs
            vmem_limit_bytes=32 * 1024 * 1024,
        ),
    )(image, audio, band_avg, band_max, band_fin,
      bias_avg, bias_max, bias_fin, mask)


def init_params(key):
    """Deterministic init mimicking PyTorch Conv2d default (uniform +/- 1/sqrt(fan_in))."""
    fan_in = 2 * KSZ * KSZ
    bound = 1.0 / jnp.sqrt(fan_in)
    ks = jax.random.split(key, 6)

    def conv_params(kw, kb):
        w = jax.random.uniform(kw, (1, 2, KSZ, KSZ), jnp.float32, -bound, bound)
        b = jax.random.uniform(kb, (1,), jnp.float32, -bound, bound)
        return w, b

    Wavg, bavg = conv_params(ks[0], ks[1])
    Wmax, bmax = conv_params(ks[2], ks[3])
    Wfin, bfin = conv_params(ks[4], ks[5])
    return {"Wavg": Wavg, "bavg": bavg,
            "Wmax": Wmax, "bmax": bmax,
            "Wfin": Wfin, "bfin": bfin}


def ref_forward(image, audio, p):
    """Pure-JAX reference matching the PyTorch forward exactly."""
    def conv(x, w, b):
        y = jax.lax.conv_general_dilated(
            x, w, window_strides=(1, 1), padding=[(PAD, PAD), (PAD, PAD)],
            dimension_numbers=("NCHW", "OIHW", "NCHW"))
        return y + b.reshape(1, 1, 1, 1)

    f_max = jnp.concatenate([jnp.max(image, axis=1, keepdims=True),
                             jnp.max(audio, axis=1, keepdims=True)], axis=1)
    f_avg = jnp.concatenate([jnp.mean(image, axis=1, keepdims=True),
                             jnp.mean(audio, axis=1, keepdims=True)], axis=1)
    f1 = jnp.concatenate([jax.nn.sigmoid(conv(f_avg, p["Wavg"], p["bavg"])),
                          jax.nn.sigmoid(conv(f_max, p["Wmax"], p["bmax"]))], axis=1)
    M = jax.nn.sigmoid(conv(f1, p["Wfin"], p["bfin"]))
    return image * M


if __name__ == "__main__":
    B, C, H, W = 2, 4, 16, 16
    key = jax.random.PRNGKey(0)
    k_img, k_aud, k_par = jax.random.split(key, 3)

    image = jax.random.normal(k_img, (B, C, H, W), jnp.float32)
    audio = jax.random.normal(k_aud, (B, C, H, W), jnp.float32)
    params = init_params(k_par)

    out = jax.block_until_ready(avam_forward(image, audio, params))
    ref = jax.block_until_ready(ref_forward(image, audio, params))

    assert out.shape == (B, C, H, W)
    # tolerance leaves headroom for the approximate EUP reciprocal used in the
    # in-kernel sigmoids; structural/alignment bugs would produce O(0.1-1) errors.
    err = float(jnp.max(jnp.abs(out - ref)))
    assert jnp.allclose(out, ref, rtol=1e-2, atol=1e-2), err

    print("KERNEL_OK")
</pallas_src>

<mosaic_0001>
module attributes {stable_mosaic.version = 11 : i64} {
  func.func @avam_kernel(%arg0: i32, %arg1: memref<1x4x16x16xf32, #tpu.memory_space<vmem>>, %arg2: memref<1x4x16x16xf32, #tpu.memory_space<vmem>>, %arg3: memref<7x256x128xf32, #tpu.memory_space<vmem>>, %arg4: memref<7x256x128xf32, #tpu.memory_space<vmem>>, %arg5: memref<7x256x128xf32, #tpu.memory_space<vmem>>, %arg6: memref<1x128xf32, #tpu.memory_space<vmem>>, %arg7: memref<1x128xf32, #tpu.memory_space<vmem>>, %arg8: memref<1x128xf32, #tpu.memory_space<vmem>>, %arg9: memref<1x128xf32, #tpu.memory_space<vmem>>, %arg10: memref<1x4x16x16xf32, #tpu.memory_space<vmem>>, %arg11: memref<24x512xf32, #tpu.memory_space<vmem>>) attributes {dimension_semantics = [#tpu.dimension_semantics<parallel>], iteration_bounds = array<i64: 2>, scalar_prefetch = 0 : i64, scratch_operands = 1 : i64, tpu.core_type = #tpu.core_type<tc>, window_params = [{transform_indices = @transform_0, window_bounds = array<i64: 1, 4, 16, 16>}, {transform_indices = @transform_1, window_bounds = array<i64: 1, 4, 16, 16>}, {pipeline_mode = #tpu.pipeline_mode<synchronous>, transform_indices = @transform_2, window_bounds = array<i64: 7, 256, 128>}, {pipeline_mode = #tpu.pipeline_mode<synchronous>, transform_indices = @transform_3, window_bounds = array<i64: 7, 256, 128>}, {pipeline_mode = #tpu.pipeline_mode<synchronous>, transform_indices = @transform_4, window_bounds = array<i64: 7, 256, 128>}, {pipeline_mode = #tpu.pipeline_mode<synchronous>, transform_indices = @transform_5, window_bounds = array<i64: 1, 128>}, {pipeline_mode = #tpu.pipeline_mode<synchronous>, transform_indices = @transform_6, window_bounds = array<i64: 1, 128>}, {pipeline_mode = #tpu.pipeline_mode<synchronous>, transform_indices = @transform_7, window_bounds = array<i64: 1, 128>}, {pipeline_mode = #tpu.pipeline_mode<synchronous>, transform_indices = @transform_8, window_bounds = array<i64: 1, 128>}, {transform_indices = @transform_9, window_bounds = array<i64: 1, 4, 16, 16>}]} {
    %c0 = arith.constant 0 : index
    %c0_0 = arith.constant 0 : index
    %c0_1 = arith.constant 0 : index
    %c0_2 = arith.constant 0 : index
    %0 = vector.load %arg1[%c0, %c0_0, %c0_1, %c0_2] : memref<1x4x16x16xf32, #tpu.memory_space<vmem>>, vector<1x4x16x16xf32>
    %1 = vector.shape_cast %0 : vector<1x4x16x16xf32> to vector<4x16x16xf32>
    %c0_3 = arith.constant 0 : index
    %c0_4 = arith.constant 0 : index
    %c0_5 = arith.constant 0 : index
    %c0_6 = arith.constant 0 : index
    %2 = vector.load %arg2[%c0_3, %c0_4, %c0_5, %c0_6] : memref<1x4x16x16xf32, #tpu.memory_space<vmem>>, vector<1x4x16x16xf32>
    %3 = vector.shape_cast %2 : vector<1x4x16x16xf32> to vector<4x16x16xf32>
    %cst = arith.constant dense<0xFF800000> : vector<16x16xf32>
    %4 = vector.multi_reduction <maximumf>, %1, %cst [0] : vector<4x16x16xf32> to vector<16x16xf32>
    %cst_7 = arith.constant dense<0xFF800000> : vector<16x16xf32>
    %5 = vector.multi_reduction <maximumf>, %3, %cst_7 [0] : vector<4x16x16xf32> to vector<16x16xf32>
    %cst_8 = arith.constant dense<0.000000e+00> : vector<16x16xf32>
    %6 = vector.multi_reduction <add>, %1, %cst_8 [0] : vector<4x16x16xf32> to vector<16x16xf32>
    %cst_9 = arith.constant 4.000000e+00 : f32
    %7 = vector.broadcast %cst_9 : f32 to vector<16x16xf32>
    %8 = arith.divf %6, %7 : vector<16x16xf32>
    %cst_10 = arith.constant dense<0.000000e+00> : vector<16x16xf32>
    %9 = vector.multi_reduction <add>, %3, %cst_10 [0] : vector<4x16x16xf32> to vector<16x16xf32>
    %cst_11 = arith.constant 4.000000e+00 : f32
    %10 = vector.broadcast %cst_11 : f32 to vector<16x16xf32>
    %11 = arith.divf %9, %10 : vector<16x16xf32>
    %cst_12 = arith.constant 0.000000e+00 : f32
    %12 = vector.broadcast %cst_12 : f32 to vector<24x512xf32>
    %c0_13 = arith.constant 0 : index
    %c0_14 = arith.constant 0 : index
    %13 = vector.load %arg11[%c0_13, %c0_14] : memref<24x512xf32, #tpu.memory_space<vmem>>, vector<24x512xf32>
    tpu.vector_store %arg11[%c0_13, %c0_14], %12 {strides = array<i32>} : memref<24x512xf32, #tpu.memory_space<vmem>>, vector<24x512xf32>,
    %c3 = arith.constant 3 : index
    %c0_15 = arith.constant 0 : index
    %14 = vector.load %arg11[%c3, %c0_15] : memref<24x512xf32, #tpu.memory_space<vmem>>, vector<16x16xf32>
    tpu.vector_store %arg11[%c3, %c0_15], %8 {strides = array<i32>} : memref<24x512xf32, #tpu.memory_space<vmem>>, vector<16x16xf32>,
    %c3_16 = arith.constant 3 : index
    %c128 = arith.constant 128 : index
    %15 = vector.load %arg11[%c3_16, %c128] : memref<24x512xf32, #tpu.memory_space<vmem>>, vector<16x16xf32>
    tpu.vector_store %arg11[%c3_16, %c128], %11 {strides = array<i32>} : memref<24x512xf32, #tpu.memory_space<vmem>>, vector<16x16xf32>,
    %c3_17 = arith.constant 3 : index
    %c256 = arith.constant 256 : index
    %16 = vector.load %arg11[%c3_17, %c256] : memref<24x512xf32, #tpu.memory_space<vmem>>, vector<16x16xf32>
    tpu.vector_store %arg11[%c3_17, %c256], %4 {strides = array<i32>} : memref<24x512xf32, #tpu.memory_space<vmem>>, vector<16x16xf32>,
    %c3_18 = arith.constant 3 : index
    %c384 = arith.constant 384 : index
    %17 = vector.load %arg11[%c3_18, %c384] : memref<24x512xf32, #tpu.memory_space<vmem>>, vector<16x16xf32>
    tpu.vector_store %arg11[%c3_18, %c384], %5 {strides = array<i32>} : memref<24x512xf32, #tpu.memory_space<vmem>>, vector<16x16xf32>,
    %cst_19 = arith.constant 0.000000e+00 : f32
    %18 = vector.broadcast %cst_19 : f32 to vector<16x128xf32>
    %cst_20 = arith.constant 0.000000e+00 : f32
    %19 = vector.broadcast %cst_20 : f32 to vector<16x128xf32>
    %c0_21 = arith.constant 0 : index
    %c0_22 = arith.constant 0 : index
    %20 = vector.load %arg11[%c0_21, %c0_22] : memref<24x512xf32, #tpu.memory_space<vmem>>, vector<16x256xf32>
    %c0_23 = arith.constant 0 : index
    %c0_24 = arith.constant 0 : index
    %c0_25 = arith.constant 0 : index
    %21 = vector.load %arg3[%c0_23, %c0_24, %c0_25] : memref<7x256x128xf32, #tpu.memory_space<vmem>>, vector<1x256x128xf32>
    %22 = vector.shape_cast %21 : vector<1x256x128xf32> to vector<256x128xf32>
    %cst_26 = arith.constant dense<0.000000e+00> : vector<16x128xf32>
    %23 = tpu.matmul %20, %22, %cst_26 {dimension_numbers = #tpu.dot_dimension_numbers<[1], [0], [0], [1], [0, 0, 1, 1], [], []>} : vector<16x256xf32>, vector<256x128xf32>, vector<16x128xf32> -> vector<16x128xf32>
    %24 = arith.addf %18, %23 : vector<16x128xf32>
    %c0_27 = arith.constant 0 : index
    %c256_28 = arith.constant 256 : index
    %25 = vector.load %arg11[%c0_27, %c256_28] : memref<24x512xf32, #tpu.memory_space<vmem>>, vector<16x256xf32>
    %c0_29 = arith.constant 0 : index
    %c0_30 = arith.constant 0 : index
    %c0_31 = arith.constant 0 : index
    %26 = vector.load %arg4[%c0_29, %c0_30, %c0_31] : memref<7x256x128xf32, #tpu.memory_space<vmem>>, vector<1x256x128xf32>
    %27 = vector.shape_cast %26 : vector<1x256x128xf32> to vector<256x128xf32>
    %cst_32 = arith.constant dense<0.000000e+00> : vector<16x128xf32>
    %28 = tpu.matmul %25, %27, %cst_32 {dimension_numbers = #tpu.dot_dimension_numbers<[1], [0], [0], [1], [0, 0, 1, 1], [], []>} : vector<16x256xf32>, vector<256x128xf32>, vector<16x128xf32> -> vector<16x128xf32>
    %29 = arith.addf %19, %28 : vector<16x128xf32>
    %c1 = arith.constant 1 : index
    %c0_33 = arith.constant 0 : index
    %30 = vector.load %arg11[%c1, %c0_33] : memref<24x512xf32, #tpu.memory_space<vmem>>, vector<16x256xf32>
    %c1_34 = arith.constant 1 : index
    %c0_35 = arith.constant 0 : index
    %c0_36 = arith.constant 0 : index
    %31 = vector.load %arg3[%c1_34, %c0_35, %c0_36] : memref<7x256x128xf32, #tpu.memory_space<vmem>>, vector<1x256x128xf32>
    %32 = vector.shape_cast %31 : vector<1x256x128xf32> to vector<256x128xf32>
    %cst_37 = arith.constant dense<0.000000e+00> : vector<16x128xf32>
    %33 = tpu.matmul %30, %32, %cst_37 {dimension_numbers = #tpu.dot_dimension_numbers<[1], [0], [0], [1], [0, 0, 1, 1], [], []>} : vector<16x256xf32>, vector<256x128xf32>, vector<16x128xf32> -> vector<16x128xf32>
    %34 = arith.addf %24, %33 : vector<16x128xf32>
    %c1_38 = arith.constant 1 : index
    %c256_39 = arith.constant 256 : index
    %35 = vector.load %arg11[%c1_38, %c256_39] : memref<24x512xf32, #tpu.memory_space<vmem>>, vector<16x256xf32>
    %c1_40 = arith.constant 1 : index
    %c0_41 = arith.constant 0 : index
    %c0_42 = arith.constant 0 : index
    %36 = vector.load %arg4[%c1_40, %c0_41, %c0_42] : memref<7x256x128xf32, #tpu.memory_space<vmem>>, vector<1x256x128xf32>
    %37 = vector.shape_cast %36 : vector<1x256x128xf32> to vector<256x128xf32>
    %cst_43 = arith.constant dense<0.000000e+00> : vector<16x128xf32>
    %38 = tpu.matmul %35, %37, %cst_43 {dimension_numbers = #tpu.dot_dimension_numbers<[1], [0], [0], [1], [0, 0, 1, 1], [], []>} : vector<16x256xf32>, vector<256x128xf32>, vector<16x128xf32> -> vector<16x128xf32>
    %39 = arith.addf %29, %38 : vector<16x128xf32>
    %c2 = arith.constant 2 : index
    %c0_44 = arith.constant 0 : index
    %40 = vector.load %arg11[%c2, %c0_44] : memref<24x512xf32, #tpu.memory_space<vmem>>, vector<16x256xf32>
    %c2_45 = arith.constant 2 : index
    %c0_46 = arith.constant 0 : index
    %c0_47 = arith.constant 0 : index
    %41 = vector.load %arg3[%c2_45, %c0_46, %c0_47] : memref<7x256x128xf32, #tpu.memory_space<vmem>>, vector<1x256x128xf32>
    %42 = vector.shape_cast %41 : vector<1x256x128xf32> to vector<256x128xf32>
    %cst_48 = arith.constant dense<0.000000e+00> : vector<16x128xf32>
    %43 = tpu.matmul %40, %42, %cst_48 {dimension_numbers = #tpu.dot_dimension_numbers<[1], [0], [0], [1], [0, 0, 1, 1], [], []>} : vector<16x256xf32>, vector<256x128xf32>, vector<16x128xf32> -> vector<16x128xf32>
    %44 = arith.addf %34, %43 : vector<16x128xf32>
    %c2_49 = arith.constant 2 : index
    %c256_50 = arith.constant 256 : index
    %45 = vector.load %arg11[%c2_49, %c256_50] : memref<24x512xf32, #tpu.memory_space<vmem>>, vector<16x256xf32>
    %c2_51 = arith.constant 2 : index
    %c0_52 = arith.constant 0 : index
    %c0_53 = arith.constant 0 : index
    %46 = vector.load %arg4[%c2_51, %c0_52, %c0_53] : memref<7x256x128xf32, #tpu.memory_space<vmem>>, vector<1x256x128xf32>
    %47 = vector.shape_cast %46 : vector<1x256x128xf32> to vector<256x128xf32>
    %cst_54 = arith.constant dense<0.000000e+00> : vector<16x128xf32>
    %48 = tpu.matmul %45, %47, %cst_54 {dimension_numbers = #tpu.dot_dimension_numbers<[1], [0], [0], [1], [0, 0, 1, 1], [], []>} : vector<16x256xf32>, vector<256x128xf32>, vector<16x128xf32> -> vector<16x128xf32>
    %49 = arith.addf %39, %48 : vector<16x128xf32>
    %c3_55 = arith.constant 3 : index
    %c0_56 = arith.constant 0 : index
    %50 = vector.load %arg11[%c3_55, %c0_56] : memref<24x512xf32, #tpu.memory_space<vmem>>, vector<16x256xf32>
    %c3_57 = arith.constant 3 : index
    %c0_58 = arith.constant 0 : index
    %c0_59 = arith.constant 0 : index
    %51 = vector.load %arg3[%c3_57, %c0_58, %c0_59] : memref<7x256x128xf32, #tpu.memory_space<vmem>>, vector<1x256x128xf32>
    %52 = vector.shape_cast %51 : vector<1x256x128xf32> to vector<256x128xf32>
    %cst_60 = arith.constant dense<0.000000e+00> : vector<16x128xf32>
    %53 = tpu.matmul %50, %52, %cst_60 {dimension_numbers = #tpu.dot_dimension_numbers<[1], [0], [0], [1], [0, 0, 1, 1], [], []>} : vector<16x256xf32>, vector<256x128xf32>, vector<16x128xf32> -> vector<16x128xf32>
    %54 = arith.addf %44, %53 : vector<16x128xf32>
    %c3_61 = arith.constant 3 : index
    %c256_62 = arith.constant 256 : index
    %55 = vector.load %arg11[%c3_61, %c256_62] : memref<24x512xf32, #tpu.memory_space<vmem>>, vector<16x256xf32>
    %c3_63 = arith.constant 3 : index
    %c0_64 = arith.constant 0 : index
    %c0_65 = arith.constant 0 : index
    %56 = vector.load %arg4[%c3_63, %c0_64, %c0_65] : memref<7x256x128xf32, #tpu.memory_space<vmem>>, vector<1x256x128xf32>
    %57 = vector.shape_cast %56 : vector<1x256x128xf32> to vector<256x128xf32>
    %cst_66 = arith.constant dense<0.000000e+00> : vector<16x128xf32>
    %58 = tpu.matmul %55, %57, %cst_66 {dimension_numbers = #tpu.dot_dimension_numbers<[1], [0], [0], [1], [0, 0, 1, 1], [], []>} : vector<16x256xf32>, vector<256x128xf32>, vector<16x128xf32> -> vector<16x128xf32>
    %59 = arith.addf %49, %58 : vector<16x128xf32>
    %c4 = arith.constant 4 : index
    %c0_67 = arith.constant 0 : index
    %60 = vector.load %arg11[%c4, %c0_67] : memref<24x512xf32, #tpu.memory_space<vmem>>, vector<16x256xf32>
    %c4_68 = arith.constant 4 : index
    %c0_69 = arith.constant 0 : index
    %c0_70 = arith.constant 0 : index
    %61 = vector.load %arg3[%c4_68, %c0_69, %c0_70] : memref<7x256x128xf32, #tpu.memory_space<vmem>>, vector<1x256x128xf32>
    %62 = vector.shape_cast %61 : vector<1x256x128xf32> to vector<256x128xf32>
    %cst_71 = arith.constant dense<0.000000e+00> : vector<16x128xf32>
    %63 = tpu.matmul %60, %62, %cst_71 {dimension_numbers = #tpu.dot_dimension_numbers<[1], [0], [0], [1], [0, 0, 1, 1], [], []>} : vector<16x256xf32>, vector<256x128xf32>, vector<16x128xf32> -> vector<16x128xf32>
    %64 = arith.addf %54, %63 : vector<16x128xf32>
    %c4_72 = arith.constant 4 : index
    %c256_73 = arith.constant 256 : index
    %65 = vector.load %arg11[%c4_72, %c256_73] : memref<24x512xf32, #tpu.memory_space<vmem>>, vector<16x256xf32>
    %c4_74 = arith.constant 4 : index
    %c0_75 = arith.constant 0 : index
    %c0_76 = arith.constant 0 : index
    %66 = vector.load %arg4[%c4_74, %c0_75, %c0_76] : memref<7x256x128xf32, #tpu.memory_space<vmem>>, vector<1x256x128xf32>
    %67 = vector.shape_cast %66 : vector<1x256x128xf32> to vector<256x128xf32>
    %cst_77 = arith.constant dense<0.000000e+00> : vector<16x128xf32>
    %68 = tpu.matmul %65, %67, %cst_77 {dimension_numbers = #tpu.dot_dimension_numbers<[1], [0], [0], [1], [0, 0, 1, 1], [], []>} : vector<16x256xf32>, vector<256x128xf32>, vector<16x128xf32> -> vector<16x128xf32>
    %69 = arith.addf %59, %68 : vector<16x128xf32>
    %c5 = arith.constant 5 : index
    %c0_78 = arith.constant 0 : index
    %70 = vector.load %arg11[%c5, %c0_78] : memref<24x512xf32, #tpu.memory_space<vmem>>, vector<16x256xf32>
    %c5_79 = arith.constant 5 : index
    %c0_80 = arith.constant 0 : index
    %c0_81 = arith.constant 0 : index
    %71 = vector.load %arg3[%c5_79, %c0_80, %c0_81] : memref<7x256x128xf32, #tpu.memory_space<vmem>>, vector<1x256x128xf32>
    %72 = vector.shape_cast %71 : vector<1x256x128xf32> to vector<256x128xf32>
    %cst_82 = arith.constant dense<0.000000e+00> : vector<16x128xf32>
    %73 = tpu.matmul %70, %72, %cst_82 {dimension_numbers = #tpu.dot_dimension_numbers<[1], [0], [0], [1], [0, 0, 1, 1], [], []>} : vector<16x256xf32>, vector<256x128xf32>, vector<16x128xf32> -> vector<16x128xf32>
    %74 = arith.addf %64, %73 : vector<16x128xf32>
    %c5_83 = arith.constant 5 : index
    %c256_84 = arith.constant 256 : index
    %75 = vector.load %arg11[%c5_83, %c256_84] : memref<24x512xf32, #tpu.memory_space<vmem>>, vector<16x256xf32>
    %c5_85 = arith.constant 5 : index
    %c0_86 = arith.constant 0 : index
    %c0_87 = arith.constant 0 : index
    %76 = vector.load %arg4[%c5_85, %c0_86, %c0_87] : memref<7x256x128xf32, #tpu.memory_space<vmem>>, vector<1x256x128xf32>
    %77 = vector.shape_cast %76 : vector<1x256x128xf32> to vector<256x128xf32>
    %cst_88 = arith.constant dense<0.000000e+00> : vector<16x128xf32>
    %78 = tpu.matmul %75, %77, %cst_88 {dimension_numbers = #tpu.dot_dimension_numbers<[1], [0], [0], [1], [0, 0, 1, 1], [], []>} : vector<16x256xf32>, vector<256x128xf32>, vector<16x128xf32> -> vector<16x128xf32>
    %79 = arith.addf %69, %78 : vector<16x128xf32>
    %c6 = arith.constant 6 : index
    %c0_89 = arith.constant 0 : index
    %80 = vector.load %arg11[%c6, %c0_89] : memref<24x512xf32, #tpu.memory_space<vmem>>, vector<16x256xf32>
    %c6_90 = arith.constant 6 : index
    %c0_91 = arith.constant 0 : index
    %c0_92 = arith.constant 0 : index
    %81 = vector.load %arg3[%c6_90, %c0_91, %c0_92] : memref<7x256x128xf32, #tpu.memory_space<vmem>>, vector<1x256x128xf32>
    %82 = vector.shape_cast %81 : vector<1x256x128xf32> to vector<256x128xf32>
    %cst_93 = arith.constant dense<0.000000e+00> : vector<16x128xf32>
    %83 = tpu.matmul %80, %82, %cst_93 {dimension_numbers = #tpu.dot_dimension_numbers<[1], [0], [0], [1], [0, 0, 1, 1], [], []>} : vector<16x256xf32>, vector<256x128xf32>, vector<16x128xf32> -> vector<16x128xf32>
    %84 = arith.addf %74, %83 : vector<16x128xf32>
    %c6_94 = arith.constant 6 : index
    %c256_95 = arith.constant 256 : index
    %85 = vector.load %arg11[%c6_94, %c256_95] : memref<24x512xf32, #tpu.memory_space<vmem>>, vector<16x256xf32>
    %c6_96 = arith.constant 6 : index
    %c0_97 = arith.constant 0 : index
    %c0_98 = arith.constant 0 : index
    %86 = vector.load %arg4[%c6_96, %c0_97, %c0_98] : memref<7x256x128xf32, #tpu.memory_space<vmem>>, vector<1x256x128xf32>
    %87 = vector.shape_cast %86 : vector<1x256x128xf32> to vector<256x128xf32>
    %cst_99 = arith.constant dense<0.000000e+00> : vector<16x128xf32>
    %88 = tpu.matmul %85, %87, %cst_99 {dimension_numbers = #tpu.dot_dimension_numbers<[1], [0], [0], [1], [0, 0, 1, 1], [], []>} : vector<16x256xf32>, vector<256x128xf32>, vector<16x128xf32> -> vector<16x128xf32>
    %89 = arith.addf %79, %88 : vector<16x128xf32>
    %c0_100 = arith.constant 0 : index
    %c0_101 = arith.constant 0 : index
    %90 = vector.load %arg9[%c0_100, %c0_101] : memref<1x128xf32, #tpu.memory_space<vmem>>, vector<1x128xf32>
    %c0_102 = arith.constant 0 : index
    %c0_103 = arith.constant 0 : index
    %91 = vector.load %arg6[%c0_102, %c0_103] : memref<1x128xf32, #tpu.memory_space<vmem>>, vector<1x128xf32>
    %92 = vector.broadcast %91 : vector<1x128xf32> to vector<16x128xf32>
    %93 = arith.addf %84, %92 : vector<16x128xf32>
    %cst_104 = arith.constant 0.000000e+00 : f32
    %94 = vector.broadcast %cst_104 : f32 to vector<16x128xf32>
    %95 = arith.subf %94, %93 : vector<16x128xf32>
    %96 = math.exp %95 : vector<16x128xf32>
    %cst_105 = arith.constant 1.000000e+00 : f32
    %97 = vector.broadcast %cst_105 : f32 to vector<16x128xf32>
    %98 = arith.addf %97, %96 : vector<16x128xf32>
    %99 = tpu.reciprocal %98 {approx = true} : vector<16x128xf32> -> vector<16x128xf32>
    %100 = vector.broadcast %90 : vector<1x128xf32> to vector<16x128xf32>
    %101 = arith.mulf %99, %100 : vector<16x128xf32>
    %c0_106 = arith.constant 0 : index
    %c0_107 = arith.constant 0 : index
    %102 = vector.load %arg7[%c0_106, %c0_107] : memref<1x128xf32, #tpu.memory_space<vmem>>, vector<1x128xf32>
    %103 = vector.broadcast %102 : vector<1x128xf32> to vector<16x128xf32>
    %104 = arith.addf %89, %103 : vector<16x128xf32>
    %cst_108 = arith.constant 0.000000e+00 : f32
    %105 = vector.broadcast %cst_108 : f32 to vector<16x128xf32>
    %106 = arith.subf %105, %104 : vector<16x128xf32>
    %107 = math.exp %106 : vector<16x128xf32>
    %cst_109 = arith.constant 1.000000e+00 : f32
    %108 = vector.broadcast %cst_109 : f32 to vector<16x128xf32>
    %109 = arith.addf %108, %107 : vector<16x128xf32>
    %110 = tpu.reciprocal %109 {approx = true} : vector<16x128xf32> -> vector<16x128xf32>
    %111 = vector.broadcast %90 : vector<1x128xf32> to vector<16x128xf32>
    %112 = arith.mulf %110, %111 : vector<16x128xf32>
    %c3_110 = arith.constant 3 : index
    %c0_111 = arith.constant 0 : index
    %113 = vector.load %arg11[%c3_110, %c0_111] : memref<24x512xf32, #tpu.memory_space<vmem>>, vector<16x128xf32>
    tpu.vector_store %arg11[%c3_110, %c0_111], %101 {strides = array<i32>} : memref<24x512xf32, #tpu.memory_space<vmem>>, vector<16x128xf32>,
    %c3_112 = arith.constant 3 : index
    %c128_113 = arith.constant 128 : index
    %114 = vector.load %arg11[%c3_112, %c128_113] : memref<24x512xf32, #tpu.memory_space<vmem>>, vector<16x128xf32>
    tpu.vector_store %arg11[%c3_112, %c128_113], %112 {strides = array<i32>} : memref<24x512xf32, #tpu.memory_space<vmem>>, vector<16x128xf32>,
    %cst_114 = arith.constant 0.000000e+00 : f32
    %115 = vector.broadcast %cst_114 : f32 to vector<16x128xf32>
    %c0_115 = arith.constant 0 : index
    %c0_116 = arith.constant 0 : index
    %116 = vector.load %arg11[%c0_115, %c0_116] : memref<24x512xf32, #tpu.memory_space<vmem>>, vector<16x256xf32>
    %c0_117 = arith.constant 0 : index
    %c0_118 = arith.constant 0 : index
    %c0_119 = arith.constant 0 : index
    %117 = vector.load %arg5[%c0_117, %c0_118, %c0_119] : memref<7x256x128xf32, #tpu.memory_space<vmem>>, vector<1x256x128xf32>
    %118 = vector.shape_cast %117 : vector<1x256x128xf32> to vector<256x128xf32>
    %cst_120 = arith.constant dense<0.000000e+00> : vector<16x128xf32>
    %119 = tpu.matmul %116, %118, %cst_120 {dimension_numbers = #tpu.dot_dimension_numbers<[1], [0], [0], [1], [0, 0, 1, 1], [], []>} : vector<16x256xf32>, vector<256x128xf32>, vector<16x128xf32> -> vector<16x128xf32>
    %120 = arith.addf %115, %119 : vector<16x128xf32>
    %c1_121 = arith.constant 1 : index
    %c0_122 = arith.constant 0 : index
    %121 = vector.load %arg11[%c1_121, %c0_122] : memref<24x512xf32, #tpu.memory_space<vmem>>, vector<16x256xf32>
    %c1_123 = arith.constant 1 : index
    %c0_124 = arith.constant 0 : index
    %c0_125 = arith.constant 0 : index
    %122 = vector.load %arg5[%c1_123, %c0_124, %c0_125] : memref<7x256x128xf32, #tpu.memory_space<vmem>>, vector<1x256x128xf32>
    %123 = vector.shape_cast %122 : vector<1x256x128xf32> to vector<256x128xf32>
    %cst_126 = arith.constant dense<0.000000e+00> : vector<16x128xf32>
    %124 = tpu.matmul %121, %123, %cst_126 {dimension_numbers = #tpu.dot_dimension_numbers<[1], [0], [0], [1], [0, 0, 1, 1], [], []>} : vector<16x256xf32>, vector<256x128xf32>, vector<16x128xf32> -> vector<16x128xf32>
    %125 = arith.addf %120, %124 : vector<16x128xf32>
    %c2_127 = arith.constant 2 : index
    %c0_128 = arith.constant 0 : index
    %126 = vector.load %arg11[%c2_127, %c0_128] : memref<24x512xf32, #tpu.memory_space<vmem>>, vector<16x256xf32>
    %c2_129 = arith.constant 2 : index
    %c0_130 = arith.constant 0 : index
    %c0_131 = arith.constant 0 : index
    %127 = vector.load %arg5[%c2_129, %c0_130, %c0_131] : memref<7x256x128xf32, #tpu.memory_space<vmem>>, vector<1x256x128xf32>
    %128 = vector.shape_cast %127 : vector<1x256x128xf32> to vector<256x128xf32>
    %cst_132 = arith.constant dense<0.000000e+00> : vector<16x128xf32>
    %129 = tpu.matmul %126, %128, %cst_132 {dimension_numbers = #tpu.dot_dimension_numbers<[1], [0], [0], [1], [0, 0, 1, 1], [], []>} : vector<16x256xf32>, vector<256x128xf32>, vector<16x128xf32> -> vector<16x128xf32>
    %130 = arith.addf %125, %129 : vector<16x128xf32>
    %c3_133 = arith.constant 3 : index
    %c0_134 = arith.constant 0 : index
    %131 = vector.load %arg11[%c3_133, %c0_134] : memref<24x512xf32, #tpu.memory_space<vmem>>, vector<16x256xf32>
    %c3_135 = arith.constant 3 : index
    %c0_136 = arith.constant 0 : index
    %c0_137 = arith.constant 0 : index
    %132 = vector.load %arg5[%c3_135, %c0_136, %c0_137] : memref<7x256x128xf32, #tpu.memory_space<vmem>>, vector<1x256x128xf32>
    %133 = vector.shape_cast %132 : vector<1x256x128xf32> to vector<256x128xf32>
    %cst_138 = arith.constant dense<0.000000e+00> : vector<16x128xf32>
    %134 = tpu.matmul %131, %133, %cst_138 {dimension_numbers = #tpu.dot_dimension_numbers<[1], [0], [0], [1], [0, 0, 1, 1], [], []>} : vector<16x256xf32>, vector<256x128xf32>, vector<16x128xf32> -> vector<16x128xf32>
    %135 = arith.addf %130, %134 : vector<16x128xf32>
    %c4_139 = arith.constant 4 : index
    %c0_140 = arith.constant 0 : index
    %136 = vector.load %arg11[%c4_139, %c0_140] : memref<24x512xf32, #tpu.memory_space<vmem>>, vector<16x256xf32>
    %c4_141 = arith.constant 4 : index
    %c0_142 = arith.constant 0 : index
    %c0_143 = arith.constant 0 : index
    %137 = vector.load %arg5[%c4_141, %c0_142, %c0_143] : memref<7x256x128xf32, #tpu.memory_space<vmem>>, vector<1x256x128xf32>
    %138 = vector.shape_cast %137 : vector<1x256x128xf32> to vector<256x128xf32>
    %cst_144 = arith.constant dense<0.000000e+00> : vector<16x128xf32>
    %139 = tpu.matmul %136, %138, %cst_144 {dimension_numbers = #tpu.dot_dimension_numbers<[1], [0], [0], [1], [0, 0, 1, 1], [], []>} : vector<16x256xf32>, vector<256x128xf32>, vector<16x128xf32> -> vector<16x128xf32>
    %140 = arith.addf %135, %139 : vector<16x128xf32>
    %c5_145 = arith.constant 5 : index
    %c0_146 = arith.constant 0 : index
    %141 = vector.load %arg11[%c5_145, %c0_146] : memref<24x512xf32, #tpu.memory_space<vmem>>, vector<16x256xf32>
    %c5_147 = arith.constant 5 : index
    %c0_148 = arith.constant 0 : index
    %c0_149 = arith.constant 0 : index
    %142 = vector.load %arg5[%c5_147, %c0_148, %c0_149] : memref<7x256x128xf32, #tpu.memory_space<vmem>>, vector<1x256x128xf32>
    %143 = vector.shape_cast %142 : vector<1x256x128xf32> to vector<256x128xf32>
    %cst_150 = arith.constant dense<0.000000e+00> : vector<16x128xf32>
    %144 = tpu.matmul %141, %143, %cst_150 {dimension_numbers = #tpu.dot_dimension_numbers<[1], [0], [0], [1], [0, 0, 1, 1], [], []>} : vector<16x256xf32>, vector<256x128xf32>, vector<16x128xf32> -> vector<16x128xf32>
    %145 = arith.addf %140, %144 : vector<16x128xf32>
    %c6_151 = arith.constant 6 : index
    %c0_152 = arith.constant 0 : index
    %146 = vector.load %arg11[%c6_151, %c0_152] : memref<24x512xf32, #tpu.memory_space<vmem>>, vector<16x256xf32>
    %c6_153 = arith.constant 6 : index
    %c0_154 = arith.constant 0 : index
    %c0_155 = arith.constant 0 : index
    %147 = vector.load %arg5[%c6_153, %c0_154, %c0_155] : memref<7x256x128xf32, #tpu.memory_space<vmem>>, vector<1x256x128xf32>
    %148 = vector.shape_cast %147 : vector<1x256x128xf32> to vector<256x128xf32>
    %cst_156 = arith.constant dense<0.000000e+00> : vector<16x128xf32>
    %149 = tpu.matmul %146, %148, %cst_156 {dimension_numbers = #tpu.dot_dimension_numbers<[1], [0], [0], [1], [0, 0, 1, 1], [], []>} : vector<16x256xf32>, vector<256x128xf32>, vector<16x128xf32> -> vector<16x128xf32>
    %150 = arith.addf %145, %149 : vector<16x128xf32>
    %c0_157 = arith.constant 0 : index
    %c0_158 = arith.constant 0 : index
    %151 = vector.load %arg8[%c0_157, %c0_158] : memref<1x128xf32, #tpu.memory_space<vmem>>, vector<1x128xf32>
    %152 = vector.broadcast %151 : vector<1x128xf32> to vector<16x128xf32>
    %153 = arith.addf %150, %152 : vector<16x128xf32>
    %cst_159 = arith.constant 0.000000e+00 : f32
    %154 = vector.broadcast %cst_159 : f32 to vector<16x128xf32>
    %155 = arith.subf %154, %153 : vector<16x128xf32>
    %156 = math.exp %155 : vector<16x128xf32>
    %cst_160 = arith.constant 1.000000e+00 : f32
    %157 = vector.broadcast %cst_160 : f32 to vector<16x128xf32>
    %158 = arith.addf %157, %156 : vector<16x128xf32>
    %159 = tpu.reciprocal %158 {approx = true} : vector<16x128xf32> -> vector<16x128xf32>
    %160 = vector.extract_strided_slice %159 {offsets = [0, 0], sizes = [16, 16], strides = [1, 1]} : vector<16x128xf32> to vector<16x16xf32>
    %161 = vector.shape_cast %160 : vector<16x16xf32> to vector<1x16x16xf32>
    %162 = vector.broadcast %161 : vector<1x16x16xf32> to vector<4x16x16xf32>
    %163 = arith.mulf %1, %162 : vector<4x16x16xf32>
    %c0_161 = arith.constant 0 : index
    %c0_162 = arith.constant 0 : index
    %c0_163 = arith.constant 0 : index
    %c0_164 = arith.constant 0 : index
    %164 = vector.load %arg10[%c0_161, %c0_162, %c0_163, %c0_164] : memref<1x4x16x16xf32, #tpu.memory_space<vmem>>, vector<1x4x16x16xf32>
    %165 = vector.shape_cast %164 : vector<1x4x16x16xf32> to vector<4x16x16xf32>
    %166 = vector.shape_cast %163 : vector<4x16x16xf32> to vector<1x4x16x16xf32>
    tpu.vector_store %arg10[%c0_161, %c0_162, %c0_163, %c0_164], %166 {strides = array<i32>} : memref<1x4x16x16xf32, #tpu.memory_space<vmem>>, vector<1x4x16x16xf32>,
    return
  }
  func.func @transform_0(%arg0: i32) -> (i32, i32, i32, i32) {
    %c0_i32 = arith.constant 0 : i32
    %c0_i32_0 = arith.constant 0 : i32
    %c0_i32_1 = arith.constant 0 : i32
    %c0_i32_2 = arith.constant 0 : i32
    return %arg0, %c0_i32, %c0_i32_0, %c0_i32_1 : i32, i32, i32, i32
  }
  func.func @transform_1(%arg0: i32) -> (i32, i32, i32, i32) {
    %c0_i32 = arith.constant 0 : i32
    %c0_i32_0 = arith.constant 0 : i32
    %c0_i32_1 = arith.constant 0 : i32
    %c0_i32_2 = arith.constant 0 : i32
    return %arg0, %c0_i32, %c0_i32_0, %c0_i32_1 : i32, i32, i32, i32
  }
  func.func @transform_2(%arg0: i32) -> (i32, i32, i32) {
    %c0_i32 = arith.constant 0 : i32
    %c0_i32_0 = arith.constant 0 : i32
    %c0_i32_1 = arith.constant 0 : i32
    %c0_i32_2 = arith.constant 0 : i32
    return %c0_i32, %c0_i32_0, %c0_i32_1 : i32, i32, i32
  }
  func.func @transform_3(%arg0: i32) -> (i32, i32, i32) {
    %c0_i32 = arith.constant 0 : i32
    %c0_i32_0 = arith.constant 0 : i32
    %c0_i32_1 = arith.constant 0 : i32
    %c0_i32_2 = arith.constant 0 : i32
    return %c0_i32, %c0_i32_0, %c0_i32_1 : i32, i32, i32
  }
  func.func @transform_4(%arg0: i32) -> (i32, i32, i32) {
    %c0_i32 = arith.constant 0 : i32
    %c0_i32_0 = arith.constant 0 : i32
    %c0_i32_1 = arith.constant 0 : i32
    %c0_i32_2 = arith.constant 0 : i32
    return %c0_i32, %c0_i32_0, %c0_i32_1 : i32, i32, i32
  }
  func.func @transform_5(%arg0: i32) -> (i32, i32) {
    %c0_i32 = arith.constant 0 : i32
    %c0_i32_0 = arith.constant 0 : i32
    %c0_i32_1 = arith.constant 0 : i32
    return %c0_i32, %c0_i32_0 : i32, i32
  }
  func.func @transform_6(%arg0: i32) -> (i32, i32) {
    %c0_i32 = arith.constant 0 : i32
    %c0_i32_0 = arith.constant 0 : i32
    %c0_i32_1 = arith.constant 0 : i32
    return %c0_i32, %c0_i32_0 : i32, i32
  }
  func.func @transform_7(%arg0: i32) -> (i32, i32) {
    %c0_i32 = arith.constant 0 : i32
    %c0_i32_0 = arith.constant 0 : i32
    %c0_i32_1 = arith.constant 0 : i32
    return %c0_i32, %c0_i32_0 : i32, i32
  }
  func.func @transform_8(%arg0: i32) -> (i32, i32) {
    %c0_i32 = arith.constant 0 : i32
    %c0_i32_0 = arith.constant 0 : i32
    %c0_i32_1 = arith.constant 0 : i32
    return %c0_i32, %c0_i32_0 : i32, i32
  }
  func.func @transform_9(%arg0: i32) -> (i32, i32, i32, i32) {
    %c0_i32 = arith.constant 0 : i32
    %c0_i32_0 = arith.constant 0 : i32
    %c0_i32_1 = arith.constant 0 : i32
    %c0_i32_2 = arith.constant 0 : i32
    return %arg0, %c0_i32, %c0_i32_0, %c0_i32_1 : i32, i32, i32, i32
  }
}

</mosaic_0001>

<bundles_post_ra>
// kernel: avam_forward.1
= control target key start
LH: loop header
LB: loop body
LE: loop exit
PB: predicated region body
PF: predicated region fallthrough
CT: control target
= control target key end

     0   :  { %14 = vsyncpa [#allocation4], 0  ;;  %s8232_s0 = inlined_call_operand.vmem [shape: f32[2,4,16,16], index: 0, kind: input, shape index: {}]   ;;  %s8233_s1 = inlined_call_operand.vmem [shape: f32[2,4,16,16], index: 1, kind: input, shape index: {}]   ;;  %s8234_s2 = inlined_call_operand.vmem [shape: f32[7,256,128], index: 2, kind: input, shape index: {}]   ;;  %s8235_s3 = inlined_call_operand.vmem [shape: f32[7,256,128], index: 3, kind: input, shape index: {}]   ;;  %s8236_s4 = inlined_call_operand.vmem [shape: f32[7,256,128], index: 4, kind: input, shape index: {}]   ;;  %s8237_s5 = inlined_call_operand.vmem [shape: f32[1,128], index: 5, kind: input, shape index: {}]   ;;  %s8238_s6 = inlined_call_operand.vmem [shape: f32[1,128], index: 6, kind: input, shape index: {}]   ;;  %s8239_s7 = inlined_call_operand.vmem [shape: f32[1,128], index: 7, kind: input, shape index: {}]   ;;  %s8240_s8 = inlined_call_operand.vmem [shape: f32[1,128], index: 8, kind: input, shape index: {}]   ;;  %s8241_s9 = inlined_call_operand.hbm [shape: f32[2,4,16,16], index: 9, kind: output, shape index: {}]  }
   0x1   :  { %16 = vsyncpa [#allocation4 + $0x1], 0  ;;  %s5677_s30 = smov 0   ;;  %s5679_s10 = smov 0  }
   0x2   :  { %s5681_s11 = smov 0   ;;  %s5683_s12 = smov 0  }
   0x3 LB: > { %s5698_s13 = sadd.s32 4294967295, %s5621_s12   ;;  %s3398_s14 = sadd.s32 4294967294, %s5621_s12   ;;  %s5621_s12 = sphi %s5683_s12, %s8249_s12   ;;  %s5617_s11 = sphi %s5681_s11, %s8248_s11   ;;  %s5613_s10 = sphi %s5679_s10, %s8247_s10   ;;  %s5609_s30 = sphi %s5677_s30, %s8246_s30  }
   0x4   : > { %s5702_s15 = sadd.s32 1, %s5621_s12   ;;  %s228_s16 = sadd.s32 1, %s5617_s11 }
   0x5   : > { %s225_s17 = ssub.s32 %s5621_s12, %s5702_s15  ;;  %p238_p0 = scmp.ne.s32.totalorder %s5617_s11, %s5613_s10 }
   0x6   : > { %p226_p1 = scmp.eq.s32.totalorder %s225_s17, 0  ;;  %p239_p2 = scmp.eq.s32.totalorder %s5698_s13, 1 }
   0x7   : > { %p244_p3 = scmp.ne.s32.totalorder %s5613_s10, %s5609_s30  ;;  %p245_p4 = scmp.eq.s32.totalorder %s3398_s14, 1 }
   0x8   : > { %s5713_s18 = scalar_select %p226_p1, %s5617_s11, %s228_s16  }
   0x9   : > { %p5715_p5 = por %p239_p2, %p238_p0  ;;  %p5719_p6 = por %p245_p4, %p244_p3 }
   0xa   : > { %8242 = sst [smem:[#allocation6_spill]] %s5713_s18  ;;  %p3401_p7 = scmp.ge.s32.totalorder %s5621_s12, 1 }
   0xb   : > { %p300_p8 = scmp.lt.s32.totalorder %s5621_s12, 3 }
   0xd   : > { %p301_p9 = pnand %p3401_p7, %p300_p8 }
   0xe   : > { %v3423_v0 = vld [vmem:[%s8234_s2 + $0x180] sm:$0xff] (!%p301_p9)  ;;  %v3424_v1 = vld [vmem:[%s8234_s2 + $0x188] sm:$0xff] (!%p301_p9)  ;;  %v5623_v7 = vmov (!%p301_p9), 0.0   ;;  %v3425_v12 = vld [vmem:[%s8234_s2 + $0x190] sm:$0xff] (!%p301_p9)  ;;  %p341_p10 = scmp.lt.s32.totalorder (!%p301_p9), %s5698_s13, 1  ;;  %vm367_vm0 = vcmask (!%p301_p9), 130048  }
   0xf   : > { %304 = sbr.rel (%p301_p9) target bundleno = 887 (0x377), region = 56  ;;  %v508_v2 = vld [vmem:[%s8234_s2 + $0x80] sm:$0xff] (!%p301_p9)  ;;  %v4793_v3 = vpack.c.bf16 (!%p301_p9), %v3424_v1, %v3423_v0  ;;  %v509_v4 = vld [vmem:[%s8234_s2 + $0x88] sm:$0xff] (!%p301_p9)  ;;  %430 = vst [vmem:[#allocation2 + $0x8] sm:$0xff] (!%p301_p9), %v5623_v7  ;;  %434 = vst [vmem:[#allocation2 + $0x28] sm:$0xff] (!%p301_p9), %v5623_v7  ;;  %vm450_vm1 = vcmask (!%p301_p9), 130051  }
  0x10   : > { %v3407_v5 = vld [vmem:[%s8234_s2 + $0x100] sm:$0xff] (!%p301_p9)  ;;  %v3408_v6 = vld [vmem:[%s8234_s2 + $0x108] sm:$0xff] (!%p301_p9)  ;;  %429 = vst [vmem:[#allocation2] sm:$0xff] (!%p301_p9), %v5623_v7  ;;  %431 = vst [vmem:[#allocation2 + $0x10] sm:$0xff] (!%p301_p9), %v5623_v7  ;;  %v4825_v8 = vpack.c.bf16 (!%p301_p9), %v509_v4, %v508_v2  ;;  %vm443_vm2 = vcmask (!%p301_p9), 1042432   ;;  %vm453_vm3 = vcmask (!%p301_p9), 124928  }
  0x11   : > { %432 = vst [vmem:[#allocation2 + $0x18] sm:$0xff] (!%p301_p9), %v5623_v7  ;;  %433 = vst [vmem:[#allocation2 + $0x20] sm:$0xff] (!%p301_p9), %v5623_v7  ;;  %v4795_v9 = vpack.c.bf16 (!%p301_p9), %v3408_v6, %v3407_v5  ;;  %v492_v10 = vld [vmem:[%s8234_s2] sm:$0xff] (!%p301_p9)  ;;  %v493_v11 = vld [vmem:[%s8234_s2 + $0x8] sm:$0xff] (!%p301_p9)  ;;  %4794 = vmatprep.subr.bf16.mxu0 (!%p301_p9), %v4793_v3  ;;  %vm603_vm4 = vcmask (!%p301_p9), 1046528   ;;  %vm1018_vm5 = vcmask (!%p301_p9), 1045504  }
  0x12   : > { %435 = vst [vmem:[#allocation2 + $0x30] sm:$0xff] (!%p301_p9), %v5623_v7  ;;  %436 = vst [vmem:[#allocation2 + $0x38] sm:$0xff] (!%p301_p9), %v5623_v7  ;;  %v4827_v13 = vpack.c.bf16 (!%p301_p9), %v493_v11, %v492_v10  ;;  %v3426_v14 = vld [vmem:[%s8234_s2 + $0x198] sm:$0xff] (!%p301_p9)  ;;  %v510_v15 = vld [vmem:[%s8234_s2 + $0x90] sm:$0xff] (!%p301_p9)  ;;  %4826 = vmatprep.subr.bf16.mxu1 (!%p301_p9), %v4825_v8  ;;  %vm1283_vm6 = vcmask (!%p301_p9), 1044480   ;;  %vm1548_vm7 = vcmask (!%p301_p9), 1043456  }
  0x13   : > { %437 = vst [vmem:[#allocation2 + $0x40] sm:$0xff] (!%p301_p9), %v5623_v7  ;;  %438 = vst [vmem:[#allocation2 + $0x48] sm:$0xff] (!%p301_p9), %v5623_v7  ;;  %v511_v16 = vld [vmem:[%s8234_s2 + $0x98] sm:$0xff] (!%p301_p9)  ;;  %4796 = vmatpush3.bf16.msra.mxu0 (!%p301_p9), %v4795_v9  ;;  %v4797_v17 = vpack.c.bf16 (!%p301_p9), %v3426_v14, %v3425_v12  ;;  %v3409_v19 = vld [vmem:[%s8234_s2 + $0x110] sm:$0xff] (!%p301_p9)  ;;  %vm2077_vm8 = vcmask (!%p301_p9), 1041408   ;;  %s3994_s22 = sshll.u32 (!%p301_p9), %s5698_s13, 10 }
  0x14   : > { %439 = vst [vmem:[#allocation2 + $0x50] sm:$0xff] (!%p301_p9), %v5623_v7  ;;  %440 = vst [vmem:[#allocation2 + $0x58] sm:$0xff] (!%p301_p9), %v5623_v7  ;;  %v4829_v18 = vpack.c.bf16 (!%p301_p9), %v511_v16, %v510_v15  ;;  %v3410_v20 = vld [vmem:[%s8234_s2 + $0x118] sm:$0xff] (!%p301_p9)  ;;  %v494_v21 = vld [vmem:[%s8234_s2 + $0x10] sm:$0xff] (!%p301_p9)  ;;  %4828 = vmatpush3.bf16.msra.mxu1 (!%p301_p9), %v4827_v13  ;;  %s5624_s26 = smov (!%p301_p9), [#allocation3]  }
  0x15   : > { %v4799_v22 = vpack.c.bf16 (!%p301_p9), %v3410_v20, %v3409_v19  ;;  %v495_v23 = vld [vmem:[%s8234_s2 + $0x18] sm:$0xff] (!%p301_p9)  ;;  %v3427_v24 = vld [vmem:[%s8234_s2 + $0x1a0] sm:$0xff] (!%p301_p9)  ;;  %v3428_v25 = vld [vmem:[%s8234_s2 + $0x1a8] sm:$0xff] (!%p301_p9)  ;;  %4798 = vmatprep.subr.bf16.mxu0 (!%p301_p9), %v4797_v17  ;;  %s5563_s29 = sshll.u32 (!%p301_p9), %s5624_s26, 4  ;;  %s5564_s29 = int_to_ptr.vmem [resolvable:$false] %s5563_s29 }
  0x16   : > { %4830 = vmatprep.subr.bf16.mxu1 %v4829_v18  ;;  %v4831_v26 = vpack.c.bf16 %v495_v23, %v494_v21  ;;  %v4801_v27 = vpack.c.bf16 %v3428_v25, %v3427_v24  ;;  %v512_v28 = vld [vmem:[%s8234_s2 + $0xa0] sm:$0xff]  ;;  %v513_v29 = vld [vmem:[%s8234_s2 + $0xa8] sm:$0xff]  ;;  %v3429_v36 = vld [vmem:[%s8234_s2 + $0x1b0] sm:$0xff]  ;;  %s5837_s21 = scalar_select %p341_p10, %s5698_s13, 1 }
  0x17   : > { %v3411_v30 = vld [vmem:[%s8234_s2 + $0x120] sm:$0xff]  ;;  %v4833_v31 = vpack.c.bf16 %v513_v29, %v512_v28  ;;  %v3412_v32 = vld [vmem:[%s8234_s2 + $0x128] sm:$0xff]  ;;  %4800 = vmatpush3.bf16.msra.mxu0 %v4799_v22  ;;  %v3430_v37 = vld [vmem:[%s8234_s2 + $0x1b8] sm:$0xff] }
  0x18   : > { %v496_v33 = vld [vmem:[%s8234_s2 + $0x20] sm:$0xff]  ;;  %v497_v34 = vld [vmem:[%s8234_s2 + $0x28] sm:$0xff]  ;;  %v4803_v35 = vpack.c.bf16 %v3412_v32, %v3411_v30  ;;  %v514_v38 = vld [vmem:[%s8234_s2 + $0xb0] sm:$0xff]  ;;  %4832 = vmatpush3.bf16.msra.mxu1 %v4831_v26  ;;  %4802 = vmatprep.subr.bf16.mxu0 %v4801_v27  ;;  %v4805_v40 = vpack.c.bf16 %v3430_v37, %v3429_v36  ;;  %s3992_s27 = sshll.u32 %s5837_s21, 6 }
  0x19   : > { %v4835_v39 = vpack.c.bf16 %v497_v34, %v496_v33  ;;  %v515_v41 = vld [vmem:[%s8234_s2 + $0xb8] sm:$0xff]  ;;  %v3413_v42 = vld [vmem:[%s8234_s2 + $0x130] sm:$0xff]  ;;  %4834 = vmatprep.subr.bf16.mxu1 %v4833_v31  ;;  %v3431_v47 = vld [vmem:[%s8234_s2 + $0x1c0] sm:$0xff]  ;;  %s5898_s28 = scalar_lea.vmem %s8233_s1, %s3992_s27  ;;  %s5940_s23 = scalar_lea.vmem %s8232_s0, %s3992_s27 }
  0x1a   : > { %v3414_v43 = vld [vmem:[%s8234_s2 + $0x138] sm:$0xff]  ;;  %v4837_v44 = vpack.c.bf16 %v515_v41, %v514_v38  ;;  %v498_v45 = vld [vmem:[%s8234_s2 + $0x30] sm:$0xff]  ;;  %v3432_v48 = vld [vmem:[%s8234_s2 + $0x1c8] sm:$0xff]  ;;  %s8177_s27 = scalar_lea.hbm %s8241_s9, %s3994_s22 }
  0x1b   : > { %v499_v46 = vld [vmem:[%s8234_s2 + $0x38] sm:$0xff]  ;;  %v516_v49 = vld [vmem:[%s8234_s2 + $0xc0] sm:$0xff]  ;;  %v517_v50 = vld [vmem:[%s8234_s2 + $0xc8] sm:$0xff]  ;;  %4804 = vmatpush3.bf16.msra.mxu0 %v4803_v35  ;;  %v4807_v51 = vpack.c.bf16 %v3414_v43, %v3413_v42  ;;  %v4809_v53 = vpack.c.bf16 %v3432_v48, %v3431_v47 }
  0x1c   : > { %4836 = vmatpush3.bf16.msra.mxu1 %v4835_v39  ;;  %4806 = vmatprep.subr.bf16.mxu0 %v4805_v40  ;;  %v4839_v52 = vpack.c.bf16 %v499_v46, %v498_v45  ;;  %v3415_v54 = vld [vmem:[%s8234_s2 + $0x140] sm:$0xff]  ;;  %v3416_v55 = vld [vmem:[%s8234_s2 + $0x148] sm:$0xff]  ;;  %v4841_v57 = vpack.c.bf16 %v517_v50, %v516_v49  ;;  %v3433_v59 = vld [vmem:[%s8234_s2 + $0x1d0] sm:$0xff] }
  0x1d   : > { %v500_v56 = vld [vmem:[%s8234_s2 + $0x40] sm:$0xff]  ;;  %4838 = vmatprep.subr.bf16.mxu1 %v4837_v44  ;;  %v501_v58 = vld [vmem:[%s8234_s2 + $0x48] sm:$0xff]  ;;  %v3434_v60 = vld [vmem:[%s8234_s2 + $0x1d8] sm:$0xff]  ;;  %v4811_v63 = vpack.c.bf16 %v3416_v55, %v3415_v54 }
  0x1e   : > { %v518_v61 = vld [vmem:[%s8234_s2 + $0xd0] sm:$0xff]  ;;  %v519_v62 = vld [vmem:[%s8234_s2 + $0xd8] sm:$0xff]  ;;  %v4843_v3 = vpack.c.bf16 %v501_v58, %v500_v56  ;;  %v4813_v4 = vpack.c.bf16 %v3434_v60, %v3433_v59  ;;  %v3435_v6 = vld [vmem:[%s8234_s2 + $0x1e0] sm:$0xff] }
  0x1f   : > { %4808 = vmatpush3.bf16.msra.mxu0 %v4807_v51  ;;  %v3417_v0 = vld [vmem:[%s8234_s2 + $0x150] sm:$0xff]  ;;  %v3418_v1 = vld [vmem:[%s8234_s2 + $0x158] sm:$0xff]  ;;  %v3436_v7 = vld [vmem:[%s8234_s2 + $0x1e8] sm:$0xff]  ;;  %v4845_v8 = vpack.c.bf16 %v519_v62, %v518_v61 }
  0x20   : > { %v502_v2 = vld [vmem:[%s8234_s2 + $0x50] sm:$0xff]  ;;  %4840 = vmatpush3.bf16.msra.mxu1 %v4839_v52  ;;  %4810 = vmatprep.subr.bf16.mxu0 %v4809_v53  ;;  %v503_v5 = vld [vmem:[%s8234_s2 + $0x58] sm:$0xff]  ;;  %v520_v9 = vld [vmem:[%s8234_s2 + $0xe0] sm:$0xff]  ;;  %v4815_v15 = vpack.c.bf16 %v3418_v1, %v3417_v0  ;;  %v4817_v20 = vpack.c.bf16 %v3436_v7, %v3435_v6 }
  0x21   : > { %4842 = vmatprep.subr.bf16.mxu1 %v4841_v57  ;;  %v521_v10 = vld [vmem:[%s8234_s2 + $0xe8] sm:$0xff]  ;;  %v5891_v11 = vld [vmem:[%s8234_s2 + $0x160] sm:$0xff]  ;;  %v5918_v16 = vld [vmem:[%s8234_s2 + $0x1f0] sm:$0xff]  ;;  %v4847_v19 = vpack.c.bf16 %v503_v5, %v502_v2 }
  0x22   : > { %v5903_v12 = vld [vmem:[%s8234_s2 + $0x168] sm:$0xff]  ;;  %v5908_v13 = vld [vmem:[%s8234_s2 + $0x60] sm:$0xff]  ;;  %v5923_v17 = vld [vmem:[%s8234_s2 + $0x1f8] sm:$0xff]  ;;  %v4849_v24 = vpack.c.bf16 %v521_v10, %v520_v9 }
  0x23   : > { %v5913_v14 = vld [vmem:[%s8234_s2 + $0x68] sm:$0xff]  ;;  %4812 = vmatpush3.bf16.msra.mxu0 %v4811_v63  ;;  %v5928_v18 = vld [vmem:[%s8234_s2 + $0xf0] sm:$0xff]  ;;  %v5933_v21 = vld [vmem:[%s8234_s2 + $0xf8] sm:$0xff]  ;;  %v4819_v25 = vpack.c.bf16 %v5903_v12, %v5891_v11  ;;  %v4821_v42 = vpack.c.bf16 %v5923_v17, %v5918_v16 }
  0x24   : > { %4844 = vmatpush3.bf16.msra.mxu1 %v4843_v3  ;;  %4814 = vmatprep.subr.bf16.mxu0 %v4813_v4  ;;  %v5943_v22 = vld [vmem:[%s5898_s28] sm:$0xff]  ;;  %v5946_v23 = vld [vmem:[%s5898_s28 + $0x8] sm:$0xff]  ;;  %v5953_v26 = vld [vmem:[%s8234_s2 + $0x170] sm:$0xff]  ;;  %v4851_v35 = vpack.c.bf16 %v5913_v14, %v5908_v13  ;;  %v4853_v43 = vpack.c.bf16 %v5933_v21, %v5928_v18 }
  0x25   : > { %4846 = vmatprep.subr.bf16.mxu1 %v4845_v8  ;;  %v5958_v27 = vld [vmem:[%s8234_s2 + $0x178] sm:$0xff]  ;;  %v5963_v28 = vld [vmem:[%s8234_s2 + $0x70] sm:$0xff]  ;;  %v5977_v32 = vld [vmem:[%s5898_s28 + $0x20] sm:$0xff]  ;;  %v413_v33 = vsel %vm367_vm0, %v5943_v22, 0.0  ;;  %v420_v34 = vsel %vm367_vm0, %v5946_v23, 0.0 }
  0x26   : > { %v5968_v29 = vld [vmem:[%s8234_s2 + $0x78] sm:$0xff]  ;;  %v5971_v30 = vld [vmem:[%s5898_s28 + $0x10] sm:$0xff]  ;;  %v5986_v36 = vld [vmem:[%s5898_s28 + $0x28] sm:$0xff]  ;;  %v416_v40 = vsel %vm367_vm0, %v5977_v32, 0.0  ;;  %v4823_v63 = vpack.c.bf16 %v5958_v27, %v5953_v26  ;;  %v382_v27 = vsel %vm367_vm0, %v5943_v22, -inf }
  0x27   : > { %v5974_v31 = vld [vmem:[%s5898_s28 + $0x18] sm:$0xff]  ;;  %v365_v37 = vld [vmem:[%s5898_s28 + $0x30] sm:$0xff]  ;;  %v414_v39 = vsel %vm367_vm0, %v5971_v30, 0.0  ;;  %4816 = vmatpush3.bf16.msra.mxu0 %v4815_v15  ;;  %v6004_v46 = vld [vmem:[%s5940_s23] sm:$0xff]  ;;  %v423_v50 = vsel %vm367_vm0, %v5986_v36, 0.0  ;;  %v4855_v0 = vpack.c.bf16 %v5968_v29, %v5963_v28  ;;  %v383_v28 = vsel %vm367_vm0, %v5971_v30, -inf }
  0x28   : > { %v5990_v38 = vld [vmem:[%s5898_s28 + $0x38] sm:$0xff]  ;;  %v421_v41 = vsel %vm367_vm0, %v5974_v31, 0.0  ;;  %v415_v44 = vadd.f32 %v414_v39, %v413_v33  ;;  %v418_v45 = vsel %vm367_vm0, %v365_v37, 0.0  ;;  %v6007_v47 = vld [vmem:[%s5940_s23 + $0x8] sm:$0xff]  ;;  %v6010_v48 = vld [vmem:[%s5940_s23 + $0x10] sm:$0xff]  ;;  %4848 = vmatpush3.bf16.msra.mxu1 %v4847_v19  ;;  %4818 = vmatprep.subr.bf16.mxu0 %v4817_v20  ;;  %v396_v55 = vsel %vm367_vm0, %v6004_v46, 0.0 }
  0x29   : > { %v422_v49 = vadd.f32 %v421_v41, %v420_v34  ;;  %v425_v51 = vsel %vm367_vm0, %v5990_v38, 0.0  ;;  %v6017_v52 = vld [vmem:[%s5940_s23 + $0x18] sm:$0xff]  ;;  %v6020_v53 = vld [vmem:[%s5940_s23 + $0x20] sm:$0xff]  ;;  %v6023_v54 = vld [vmem:[%s5940_s23 + $0x28] sm:$0xff]  ;;  %4850 = vmatprep.subr.bf16.mxu1 %v4849_v24  ;;  %v397_v59 = vsel %vm367_vm0, %v6010_v48, 0.0  ;;  %v403_v61 = vsel %vm367_vm0, %v6007_v47, 0.0 }
  0x2a   : > { %v417_v56 = vadd.f32 %v416_v40, %v415_v44  ;;  %v6028_v57 = vld [vmem:[%s5940_s23 + $0x30] sm:$0xff]  ;;  %v6031_v58 = vld [vmem:[%s5940_s23 + $0x38] sm:$0xff]  ;;  %v399_v60 = vsel %vm367_vm0, %v6020_v53, 0.0  ;;  %v3455_v62 = vld [vmem:[%s8235_s3 + $0x180] sm:$0xff]  ;;  %v398_v2 = vadd.f32 %v397_v59, %v396_v55  ;;  %v404_v8 = vsel %vm367_vm0, %v6017_v52, 0.0  ;;  %s338_s28 = sand.u32 1, %s5613_s10  }
  0x2b   : > { %v424_v1 = vadd.f32 %v423_v50, %v422_v49  ;;  %v3456_v3 = vld [vmem:[%s8235_s3 + $0x188] sm:$0xff]  ;;  %v544_v4 = vld [vmem:[%s8235_s3 + $0x80] sm:$0xff]  ;;  %4820 = vmatpush3.bf16.msra.mxu0 %v4819_v25  ;;  %v401_v7 = vsel %vm367_vm0, %v6028_v57, 0.0  ;;  %v406_v9 = vsel %vm367_vm0, %v6023_v54, 0.0  ;;  %v405_v12 = vadd.f32 %v404_v8, %v403_v61  ;;  %s3402_s16 = sshll.u32 %s338_s28, 6  ;;  %s8191_s13 = scalar_lea.sflag [#allocation4], %s338_s28 }
  0x2c   : > { %v545_v5 = vld [vmem:[%s8235_s3 + $0x88] sm:$0xff]  ;;  %v419_v6 = vadd.f32 %v418_v45, %v417_v56  ;;  %4852 = vmatpush3.bf16.msra.mxu1 %v4851_v35  ;;  %4822 = vmatprep.subr.bf16.mxu0 %v4821_v42  ;;  %v400_v11 = vadd.f32 %v399_v60, %v398_v2  ;;  %v408_v14 = vsel %vm367_vm0, %v6031_v58, 0.0  ;;  %v4857_v15 = vpack.c.bf16 %v3456_v3, %v3455_v62  ;;  %v547_v45 = vld [vmem:[%s8235_s3 + $0x98] sm:$0xff]  ;;  %v6107_v60 = vld [vmem:[%s8235_s3 + $0x100] sm:$0xff]  ;;  %s340_s17 = scalar_lea.vmem [#allocation3], %s3402_s16 }
  0x2d   : > { %v426_v10 = vadd.f32 %v425_v51, %v424_v1  ;;  %4854 = vmatprep.subr.bf16.mxu1 %v4853_v43  ;;  %v4889_v16 = vpack.c.bf16 %v545_v5, %v544_v4  ;;  %v407_v19 = vadd.f32 %v406_v9, %v405_v12  ;;  %v386_v21 = vsel %vm367_vm0, %v365_v37, -inf  ;;  %v6112_v61 = vld [vmem:[%s8235_s3 + $0x108] sm:$0xff]  ;;  %v548_v3 = vld [vmem:[%s8235_s3 + $0xa0] sm:$0xff]  ;;  %v3457_v12 = vld [vmem:[%s8235_s3 + $0x190] sm:$0xff]  ;;  %s3324_s24 = sshll.u32 %s340_s17, 4  ;;  %s8179_s24 = int_to_ptr.vmem [resolvable:$true] %s3324_s24 }
  0x2e   : > { %v427_v13 = vmul.f32 0.25, %v419_v6  ;;  %v402_v18 = vadd.f32 %v401_v7, %v400_v11  ;;  %v384_v35 = vsel %vm367_vm0, %v5977_v32, -inf  ;;  %v387_v37 = vmax.f32 %v383_v28, %v386_v21  ;;  %v528_v32 = vld [vmem:[%s8235_s3] sm:$0xff]  ;;  %v549_v4 = vld [vmem:[%s8235_s3 + $0xa8] sm:$0xff]  ;;  %s5559_s25 = scalar_lea.vmem %s8179_s24, 1024  ;;  %p5566_p0 = scmp.lt.s32.totalorder %s8179_s24, %s5564_s29 }
  0x2f   : > { %v428_v17 = vmul.f32 0.25, %v426_v10  ;;  %4824 = vmatpush3.bf16.msra.mxu0 %v4823_v63  ;;  %v409_v25 = vadd.f32 %v408_v14, %v407_v19  ;;  %v393_v39 = vsel %vm367_vm0, %v5990_v38, -inf  ;;  %v385_v22 = vmax.f32 %v382_v27, %v384_v35  ;;  %v529_v38 = vld [vmem:[%s8235_s3 + $0x8] sm:$0xff]  ;;  %p5560_p11 = scmp.ne.s32.totalorder %s8179_s24, %s5559_s25 }
  0x30   : > { %v457_v20 = vrot.slane %v427_v13, 5  ;;  %4856 = vmatpush3.bf16.msra.mxu1 %v4855_v0  ;;  %v411_v26 = vmul.f32 0.25, %v402_v18  ;;  %4858 = vmatprep.subr.bf16.mxu0 %v4857_v15  ;;  %v389_v30 = vsel %vm367_vm0, %v5946_v23, -inf  ;;  %v390_v41 = vsel %vm367_vm0, %v5974_v31, -inf  ;;  %v533_v18 = vld [vmem:[%s8235_s3 + $0x28] sm:$0xff] }
  0x31   : > { %v458_v24 = vrot.slane %v428_v17, 5  ;;  %4890 = vmatprep.subr.bf16.mxu1 %v4889_v16  ;;  %v412_v33 = vmul.f32 0.25, %v409_v25  ;;  %v391_v42 = vsel %vm367_vm0, %v5986_v36, -inf  ;;  %v388_v44 = vmax.f32 %v385_v22, %v387_v37  ;;  %v546_v36 = vld [vmem:[%s8235_s3 + $0x90] sm:$0xff]  ;;  %v3442_v22 = vld [vmem:[%s8235_s3 + $0x118] sm:$0xff]  ;;  %p5561_p12 = pnand %p5560_p11, %p5715_p5 }
  0x32   : > { %463 = vst.msk [vmem:[#allocation2 + $0x8] sm:$0xf8] %vm450_vm1, %v457_v20  ;;  %v444_v34 = vrot.slane %v411_v26, 5  ;;  %v392_v23 = vmax.f32 %v389_v30, %v391_v42  ;;  %v372_v31 = vsel %vm367_vm0, %v6028_v57, -inf  ;;  %v394_v49 = vmax.f32 %v390_v41, %v393_v39  ;;  %v3459_v41 = vld [vmem:[%s8235_s3 + $0x1a0] sm:$0xff]  ;;  %v3460_v42 = vld [vmem:[%s8235_s3 + $0x1a8] sm:$0xff] }
  0x33   : > { %v459_v29 = vsel %vm443_vm2, %v457_v20, %v458_v24  ;;  %465 = vst.msk [vmem:[#allocation2 + $0x48] sm:$0x7] %vm453_vm3, %v458_v24  ;;  %v445_v40 = vrot.slane %v412_v33, 5  ;;  %v368_v50 = vsel %vm367_vm0, %v6004_v46, -inf  ;;  %v479_v56 = vrot.slane %v388_v44, 5  ;;  %v530_v46 = vld [vmem:[%s8235_s3 + $0x10] sm:$0xff]  ;;  %p5562_p13 = pneg %p5561_p12 }
  0x34   : > { %464 = vst.msk [vmem:[#allocation2 + $0x28] sm:$0xff] %vm367_vm0, %v459_v29  ;;  %v369_v57 = vsel %vm367_vm0, %v6010_v48, -inf  ;;  %v4891_v62 = vpack.c.bf16 %v529_v38, %v528_v32  ;;  %v531_v48 = vld [vmem:[%s8235_s3 + $0x18] sm:$0xff]  ;;  %v395_v63 = vmax.f32 %v392_v23, %v394_v49  ;;  %v370_v0 = vsel %vm367_vm0, %v6020_v53, -inf  ;;  %v534_v23 = vld [vmem:[%s8235_s3 + $0x30] sm:$0xff] }
  0x35   : > { %451 = vst.msk [vmem:[#allocation2] sm:$0xf8] %vm450_vm1, %v444_v34  ;;  %v446_v43 = vsel %vm443_vm2, %v444_v34, %v445_v40  ;;  %v4893_v2 = vpack.c.bf16 %v547_v45, %v546_v36  ;;  %485 = vst.msk [vmem:[#allocation2 + $0x18] sm:$0xf8] %vm450_vm1, %v479_v56  ;;  %v371_v5 = vmax.f32 %v368_v50, %v370_v0  ;;  %v375_v10 = vsel %vm367_vm0, %v6007_v47, -inf  ;;  %v3458_v47 = vld [vmem:[%s8235_s3 + $0x198] sm:$0xff] }
  0x36   : > { %454 = vst.msk [vmem:[#allocation2 + $0x40] sm:$0x7] %vm453_vm3, %v445_v40  ;;  %v373_v6 = vmax.f32 %v369_v57, %v372_v31  ;;  %v480_v9 = vrot.slane %v395_v63, 5  ;;  %v379_v11 = vsel %vm367_vm0, %v6031_v58, -inf  ;;  %v4895_v13 = vpack.c.bf16 %v531_v48, %v530_v46  ;;  %v532_v58 = vld [vmem:[%s8235_s3 + $0x20] sm:$0xff]  ;;  %v551_v33 = vld [vmem:[%s8235_s3 + $0xb8] sm:$0xff] }
  0x37   : > { %452 = vst.msk [vmem:[#allocation2 + $0x20] sm:$0xff] %vm367_vm0, %v446_v43  ;;  %v376_v15 = vsel %vm367_vm0, %v6017_v52, -inf  ;;  %v377_v19 = vsel %vm367_vm0, %v6023_v54, -inf  ;;  %v4859_v21 = vpack.c.bf16 %v6112_v61, %v6107_v60  ;;  %v4897_v24 = vpack.c.bf16 %v549_v4, %v548_v3  ;;  %v550_v54 = vld [vmem:[%s8235_s3 + $0xb0] sm:$0xff]  ;;  %v535_v31 = vld [vmem:[%s8235_s3 + $0x38] sm:$0xff]  ;;  %v552_v50 = vld [vmem:[%s8235_s3 + $0xc0] sm:$0xff] }
  0x38   : > { %v6139_v14 = vmax.f32 %v371_v5, %v373_v6  ;;  %v481_v52 = vsel %vm443_vm2, %v479_v56, %v480_v9  ;;  %487 = vst.msk [vmem:[#allocation2 + $0x58] sm:$0x7] %vm453_vm3, %v480_v9  ;;  %v378_v27 = vmax.f32 %v375_v10, %v377_v19  ;;  %v380_v37 = vmax.f32 %v376_v15, %v379_v11  ;;  %v3441_v40 = vld [vmem:[%s8235_s3 + $0x110] sm:$0xff]  ;;  %v3443_v57 = vld [vmem:[%s8235_s3 + $0x120] sm:$0xff]  ;;  %v3462_v46 = vld [vmem:[%s8235_s3 + $0x1b8] sm:$0xff] }
  0x39   : > { %v561_v51 = vld [vmem:[#allocation2 + $0x8] sm:$0xfe]  ;;  %486 = vst.msk [vmem:[#allocation2 + $0x38] sm:$0xff] %vm367_vm0, %v481_v52  ;;  %v4861_v39 = vpack.c.bf16 %v3458_v47, %v3457_v12  ;;  %v4899_v43 = vpack.c.bf16 %v533_v18, %v532_v58  ;;  %v4901_v44 = vpack.c.bf16 %v551_v33, %v550_v54  ;;  %v4863_v49 = vpack.c.bf16 %v3442_v22, %v3441_v40  ;;  %v3445_v9 = vld [vmem:[%s8235_s3 + $0x130] sm:$0xff]  ;;  %v3446_v10 = vld [vmem:[%s8235_s3 + $0x138] sm:$0xff] }
  0x3a   : > { %v489_v55 = vld [vmem:[#allocation2 + $0x8] sm:$0xff]  ;;  %v607_v59 = vrot.slane %v561_v51, 1  ;;  %v468_v28 = vrot.slane %v6139_v14, 5  ;;  %v381_v45 = vmax.f32 %v378_v27, %v380_v37  ;;  %v4865_v56 = vpack.c.bf16 %v3460_v42, %v3459_v41  ;;  %v3463_v12 = vld [vmem:[%s8235_s3 + $0x1c0] sm:$0xff]  ;;  %v558_v33 = vld [vmem:[%s8235_s3 + $0xf0] sm:$0xff] }
  0x3b   : > { %757 = vmatprep.mubr.f32.mxu1 %v489_v55  ;;  %v6122_v1 = vld [vmem:[#allocation2 + $0x28] sm:$0xff]  ;;  %v4903_v48 = vpack.c.bf16 %v535_v31, %v534_v23  ;;  %v4871_v47 = vpack.c.bf16 %v3446_v10, %v3445_v9  ;;  %v556_v58 = vld [vmem:[%s8235_s3 + $0xe0] sm:$0xff]  ;;  %v3449_v37 = vld [vmem:[%s8235_s3 + $0x150] sm:$0xff] }
  0x3c   : > { %v608_v7 = vrot.slane %v6122_v1, 1  ;;  %v560_v8 = vld [vmem:[#allocation2] sm:$0xfe]  ;;  %v563_v25 = vld [vmem:[#allocation2 + $0x48] sm:$0x1]  ;;  %v525_v36 = vld [vmem:[#allocation2 + $0x18] sm:$0xff] }
  0x3d   : > { %v488_v53 = vld [vmem:[#allocation2] sm:$0xff]  ;;  %v604_v17 = vrot.slane %v560_v8, 1  ;;  %v612_v34 = vrot.slane %v563_v25, 1  ;;  %474 = vst.msk [vmem:[#allocation2 + $0x10] sm:$0xf8] %vm450_vm1, %v468_v28  ;;  %v553_v51 = vld [vmem:[%s8235_s3 + $0xc8] sm:$0xff] }
  0x3e   : > { %758 = vmatmul.mubr.f32.vlgmr.msra.gmra.mrb[0].mxu1 %v488_v53  ;;  %v609_v16 = vsel %vm603_vm4, %v607_v59, %v608_v7  ;;  %v6158_v20 = vld [vmem:[#allocation2 + $0x20] sm:$0xff]  ;;  %v769_v38 = vld [vmem:[#allocation2 + $0x18] sm:$0xfe]  ;;  %v3444_v59 = vld [vmem:[%s8235_s3 + $0x128] sm:$0xff]  ;;  %v469_v61 = vrot.slane %v381_v45, 5  ;;  %v4905_v0 = vpack.c.bf16 %v553_v51, %v552_v50 }
  0x3f   : > { %4892 = vmatpush3.bf16.msra.mxu1 %v4891_v62  ;;  %762 = vmatprep.mubr.f32.mxu1 %v6122_v1  ;;  %v562_v26 = vld [vmem:[#allocation2 + $0x40] sm:$0x1]  ;;  %v605_v29 = vrot.slane %v6158_v20, 1  ;;  %v613_v32 = vsel %vm603_vm4, %v608_v7, %v612_v34  ;;  %v816_v60 = vrot.slane %v769_v38, 1  ;;  %v3461_v62 = vld [vmem:[%s8235_s3 + $0x1b0] sm:$0xff]  ;;  %v537_v3 = vld [vmem:[%s8235_s3 + $0x48] sm:$0xff]  ;;  %v4867_v6 = vpack.c.bf16 %v3444_v59, %v3443_v57 }
  0x40   : > { %682 = vmatprep.mubr.f32.mxu0 %v609_v16  ;;  %4894 = vmatprep.subr.bf16.mxu1 %v4893_v2  ;;  %v610_v35 = vrot.slane %v562_v26, 1  ;;  %v6212_v63 = vld [vmem:[#allocation2 + $0x38] sm:$0xff]  ;;  %v536_v2 = vld [vmem:[%s8235_s3 + $0x40] sm:$0xff]  ;;  %v470_v5 = vsel %vm443_vm2, %v468_v28, %v469_v61  ;;  %476 = vst.msk [vmem:[#allocation2 + $0x50] sm:$0x7] %vm453_vm3, %v469_v61  ;;  %v554_v7 = vld [vmem:[%s8235_s3 + $0xd0] sm:$0xff]  ;;  %v4869_v53 = vpack.c.bf16 %v3462_v46, %v3461_v62 }
  0x41   : > { %v606_v30 = vsel %vm603_vm4, %v604_v17, %v605_v29  ;;  %v817_v4 = vrot.slane %v6212_v63, 1  ;;  %v555_v8 = vld [vmem:[%s8235_s3 + $0xd8] sm:$0xff]  ;;  %475 = vst.msk [vmem:[#allocation2 + $0x30] sm:$0xff] %vm367_vm0, %v470_v5  ;;  %v4907_v14 = vpack.c.bf16 %v537_v3, %v536_v2  ;;  %v538_v16 = vld [vmem:[%s8235_s3 + $0x50] sm:$0xff]  ;;  %v557_v18 = vld [vmem:[%s8235_s3 + $0xe8] sm:$0xff] }
  0x42   : > { %763 = vmatmul.mubr.f32.gmra.mrb[2].mxu1 %v6158_v20  ;;  %683 = vmatmul.mubr.f32.vlgmr.msra.gmra.mrb[0].mxu0 %v606_v30  ;;  %v611_v55 = vsel %vm603_vm4, %v605_v29, %v610_v35  ;;  %v4909_v15 = vpack.c.bf16 %v555_v8, %v554_v7  ;;  %v539_v17 = vld [vmem:[%s8235_s3 + $0x58] sm:$0xff]  ;;  %v3447_v19 = vld [vmem:[%s8235_s3 + $0x140] sm:$0xff]  ;;  %v4913_v27 = vpack.c.bf16 %v557_v18, %v556_v58  ;;  %v541_v29 = vld [vmem:[%s8235_s3 + $0x68] sm:$0xff] }
  0x43   : > { %4896 = vmatpush3.bf16.msra.mxu1 %v4895_v13  ;;  %4860 = vmatpush3.bf16.msra.mxu0 %v4859_v21  ;;  %v818_v11 = vsel %vm603_vm4, %v816_v60, %v817_v4  ;;  %v3464_v13 = vld [vmem:[%s8235_s3 + $0x1c8] sm:$0xff]  ;;  %v3466_v25 = vld [vmem:[%s8235_s3 + $0x1d8] sm:$0xff]  ;;  %v4911_v26 = vpack.c.bf16 %v539_v17, %v538_v16  ;;  %v540_v28 = vld [vmem:[%s8235_s3 + $0x60] sm:$0xff] }
  0x44   : > { %4898 = vmatprep.subr.bf16.mxu1 %v4897_v24  ;;  %687 = vmatprep.mubr.f32.mxu0 %v613_v32  ;;  %v4873_v52 = vpack.c.bf16 %v3464_v13, %v3463_v12  ;;  %v3448_v21 = vld [vmem:[%s8235_s3 + $0x148] sm:$0xff]  ;;  %v3465_v24 = vld [vmem:[%s8235_s3 + $0x1d0] sm:$0xff]  ;;  %v559_v34 = vld [vmem:[%s8235_s3 + $0xf8] sm:$0xff]  ;;  %v4915_v30 = vpack.c.bf16 %v541_v29, %v540_v28 }
  0x45   : > { %4862 = vmatprep.subr.bf16.mxu0 %v4861_v39  ;;  %966 = vmatprep.mubr.f32.mxu1 %v525_v36  ;;  %v4875_v54 = vpack.c.bf16 %v3448_v21, %v3447_v19  ;;  %v4877_v35 = vpack.c.bf16 %v3466_v25, %v3465_v24  ;;  %v3450_v39 = vld [vmem:[%s8235_s3 + $0x158] sm:$0xff]  ;;  %v3467_v40 = vld [vmem:[%s8235_s3 + $0x1e0] sm:$0xff]  ;;  %v3468_v22 = vld [vmem:[%s8235_s3 + $0x1e8] sm:$0xff]  ;;  %v4917_v41 = vpack.c.bf16 %v559_v34, %v558_v33 }
  0x46   : > { %688 = vmatmul.mubr.f32.gmra.mrb[2].mxu0 %v611_v55  ;;  %v542_v42 = vld [vmem:[%s8235_s3 + $0x70] sm:$0xff]  ;;  %v4879_v32 = vpack.c.bf16 %v3450_v39, %v3449_v37  ;;  %v3519_v38 = vld [vmem:[%s8235_s3 + $0x280] sm:$0xff]  ;;  %v4881_v23 = vpack.c.bf16 %v3468_v22, %v3467_v40  ;;  %v3452_v36 = vld [vmem:[%s8235_s3 + $0x168] sm:$0xff] }
  0x47   : > { %4900 = vmatpush3.bf16.msra.mxu1 %v4899_v43  ;;  %4864 = vmatpush3.bf16.msra.mxu0 %v4863_v49  ;;  %v543_v43 = vld [vmem:[%s8235_s3 + $0x78] sm:$0xff]  ;;  %v3451_v31 = vld [vmem:[%s8235_s3 + $0x160] sm:$0xff]  ;;  %v3469_v45 = vld [vmem:[%s8235_s3 + $0x1f0] sm:$0xff] }
  0x48   : > { %4902 = vmatprep.subr.bf16.mxu1 %v4901_v44  ;;  %4866 = vmatprep.subr.bf16.mxu0 %v4865_v56  ;;  %v3520_v44 = vld [vmem:[%s8235_s3 + $0x288] sm:$0xff]  ;;  %v3470_v49 = vld [vmem:[%s8235_s3 + $0x1f8] sm:$0xff]  ;;  %v4919_v50 = vpack.c.bf16 %v543_v43, %v542_v42  ;;  %v3453_v51 = vld [vmem:[%s8235_s3 + $0x170] sm:$0xff]  ;;  %v4883_v59 = vpack.c.bf16 %v3452_v36, %v3451_v31  ;;  %v1023_v43 = vrot.slane %v6122_v1, 2 }
  0x49   : > { %891 = vmatprep.mubr.f32.mxu0 %v818_v11  ;;  %v4953_v55 = vpack.c.bf16 %v3520_v44, %v3519_v38  ;;  %v3503_v56 = vld [vmem:[%s8235_s3 + $0x200] sm:$0xff]  ;;  %v3504_v57 = vld [vmem:[%s8235_s3 + $0x208] sm:$0xff]  ;;  %v3454_v60 = vld [vmem:[%s8235_s3 + $0x178] sm:$0xff]  ;;  %v4885_v46 = vpack.c.bf16 %v3470_v49, %v3469_v45  ;;  %v1155_v11 = vrot.slane %v6212_v63, 2 }
  0x4a   : > { %v3521_v61 = vld [vmem:[%s8235_s3 + $0x290] sm:$0xff]  ;;  %v3522_v62 = vld [vmem:[%s8235_s3 + $0x298] sm:$0xff]  ;;  %v3487_v2 = vld [vmem:[%s8234_s2 + $0x280] sm:$0xff]  ;;  %v4887_v12 = vpack.c.bf16 %v3454_v60, %v3453_v51 }
  0x4b   : > { %4904 = vmatpush3.bf16.msra.mxu1 %v4903_v48  ;;  %4868 = vmatpush3.bf16.msra.mxu0 %v4867_v6  ;;  %v768_v48 = vld [vmem:[#allocation2 + $0x10] sm:$0xfe]  ;;  %v3488_v5 = vld [vmem:[%s8234_s2 + $0x288] sm:$0xff]  ;;  %v4955_v6 = vpack.c.bf16 %v3504_v57, %v3503_v56  ;;  %v773_v7 = vld [vmem:[#allocation2 + $0x58] sm:$0x1]  ;;  %v4957_v8 = vpack.c.bf16 %v3522_v62, %v3521_v61 }
  0x4c   : > { %4906 = vmatprep.subr.bf16.mxu1 %v4905_v0  ;;  %4870 = vmatprep.subr.bf16.mxu0 %v4869_v53  ;;  %v6335_v0 = vld [vmem:[#allocation2 + $0x30] sm:$0xff]  ;;  %v3506_v9 = vld [vmem:[%s8235_s3 + $0x218] sm:$0xff]  ;;  %v813_v13 = vrot.slane %v768_v48, 1  ;;  %v3524_v16 = vld [vmem:[%s8235_s3 + $0x2a8] sm:$0xff] }
  0x4d   : > { %v524_v3 = vld [vmem:[#allocation2 + $0x10] sm:$0xff]  ;;  %v1111_v10 = vld [vmem:[#allocation2 + $0x18] sm:$0xfc]  ;;  %v3471_v58 = vld [vmem:[%s8234_s2 + $0x200] sm:$0xff] }
  0x4e   : > { %v3505_v53 = vld [vmem:[%s8235_s3 + $0x210] sm:$0xff]  ;;  %v1154_v17 = vrot.slane %v1111_v10, 2  ;;  %v3472_v18 = vld [vmem:[%s8234_s2 + $0x208] sm:$0xff]  ;;  %v3490_v24 = vld [vmem:[%s8234_s2 + $0x298] sm:$0xff] }
  0x4f   : > { %4908 = vmatpush3.bf16.msra.mxu1 %v4907_v14  ;;  %4872 = vmatpush3.bf16.msra.mxu0 %v4871_v47  ;;  %v814_v14 = vrot.slane %v6335_v0, 1  ;;  %v4921_v47 = vpack.c.bf16 %v3488_v5, %v3487_v2  ;;  %v772_v19 = vld [vmem:[#allocation2 + $0x50] sm:$0x1]  ;;  %v4959_v25 = vpack.c.bf16 %v3506_v9, %v3505_v53  ;;  %v3507_v28 = vld [vmem:[%s8235_s3 + $0x220] sm:$0xff]  ;;  %v3508_v29 = vld [vmem:[%s8235_s3 + $0x228] sm:$0xff]  ;;  %v4923_v34 = vpack.c.bf16 %v3472_v18, %v3471_v58 }
  0x50   : > { %4910 = vmatprep.subr.bf16.mxu1 %v4909_v15  ;;  %4874 = vmatprep.subr.bf16.mxu0 %v4873_v52  ;;  %v3523_v15 = vld [vmem:[%s8235_s3 + $0x2a0] sm:$0xff]  ;;  %v821_v52 = vrot.slane %v773_v7, 1  ;;  %v3489_v21 = vld [vmem:[%s8234_s2 + $0x290] sm:$0xff]  ;;  %v3526_v37 = vld [vmem:[%s8235_s3 + $0x2b8] sm:$0xff]  ;;  %v819_v39 = vrot.slane %v772_v19, 1  ;;  %v4963_v44 = vpack.c.bf16 %v3508_v29, %v3507_v28 }
  0x51   : > { %v815_v33 = vsel %vm603_vm4, %v813_v13, %v814_v14  ;;  %v4925_v40 = vpack.c.bf16 %v3490_v24, %v3489_v21  ;;  %v3473_v22 = vld [vmem:[%s8234_s2 + $0x210] sm:$0xff]  ;;  %v3492_v38 = vld [vmem:[%s8234_s2 + $0x2a8] sm:$0xff]  ;;  %v3510_v31 = vld [vmem:[%s8235_s3 + $0x238] sm:$0xff] }
  0x52   : > { %v3527_v45 = vld [vmem:[%s8235_s3 + $0x2c0] sm:$0xff]  ;;  %v3528_v49 = vld [vmem:[%s8235_s3 + $0x2c8] sm:$0xff]  ;;  %v3494_v60 = vld [vmem:[%s8234_s2 + $0x2b8] sm:$0xff] }
  0x53   : > { %4912 = vmatpush3.bf16.msra.mxu1 %v4911_v26  ;;  %4876 = vmatpush3.bf16.msra.mxu0 %v4875_v54  ;;  %v978_v26 = vld [vmem:[#allocation2 + $0x8] sm:$0xfc]  ;;  %v1156_v54 = vsel %vm1018_vm5, %v1154_v17, %v1155_v11  ;;  %v4969_v62 = vpack.c.bf16 %v3528_v49, %v3527_v45  ;;  %v3530_v5 = vld [vmem:[%s8235_s3 + $0x2d8] sm:$0xff]  ;;  %v3477_v7 = vld [vmem:[%s8234_s2 + $0x230] sm:$0xff] }
  0x54   : > { %4914 = vmatprep.subr.bf16.mxu1 %v4913_v27  ;;  %4878 = vmatprep.subr.bf16.mxu0 %v4877_v35  ;;  %v4961_v27 = vpack.c.bf16 %v3524_v16, %v3523_v15  ;;  %v3525_v35 = vld [vmem:[%s8235_s3 + $0x2b0] sm:$0xff]  ;;  %v1022_v42 = vrot.slane %v978_v26, 2  ;;  %v3476_v56 = vld [vmem:[%s8234_s2 + $0x228] sm:$0xff]  ;;  %v3495_v53 = vld [vmem:[%s8234_s2 + $0x2c0] sm:$0xff] }
  0x55   : > { %v3512_v48 = vld [vmem:[%s8235_s3 + $0x248] sm:$0xff]  ;;  %v3513_v13 = vld [vmem:[%s8235_s3 + $0x250] sm:$0xff]  ;;  %v3531_v16 = vld [vmem:[%s8235_s3 + $0x2e0] sm:$0xff] }
  0x56   : > { %v1024_v57 = vsel %vm1018_vm5, %v1022_v42, %v1023_v43  ;;  %v3496_v9 = vld [vmem:[%s8234_s2 + $0x2c8] sm:$0xff]  ;;  %v3479_v58 = vld [vmem:[%s8234_s2 + $0x240] sm:$0xff]  ;;  %v3498_v19 = vld [vmem:[%s8234_s2 + $0x2d8] sm:$0xff] }
  0x57   : > { %4916 = vmatpush3.bf16.msra.mxu1 %v4915_v30  ;;  %4880 = vmatpush3.bf16.msra.mxu0 %v4879_v32  ;;  %v3474_v30 = vld [vmem:[%s8234_s2 + $0x218] sm:$0xff]  ;;  %v3491_v32 = vld [vmem:[%s8234_s2 + $0x2a0] sm:$0xff]  ;;  %v3532_v17 = vld [vmem:[%s8235_s3 + $0x2e8] sm:$0xff] }
  0x58   : > { %4918 = vmatprep.subr.bf16.mxu1 %v4917_v41  ;;  %4882 = vmatprep.subr.bf16.mxu0 %v4881_v23  ;;  %v822_v41 = vsel %vm603_vm4, %v817_v4, %v821_v52  ;;  %v4965_v23 = vpack.c.bf16 %v3526_v37, %v3525_v35  ;;  %v3509_v4 = vld [vmem:[%s8235_s3 + $0x230] sm:$0xff]  ;;  %v4927_v36 = vpack.c.bf16 %v3474_v30, %v3473_v22  ;;  %v3480_v18 = vld [vmem:[%s8234_s2 + $0x248] sm:$0xff]  ;;  %v3534_v29 = vld [vmem:[%s8235_s3 + $0x2f8] sm:$0xff] }
  0x59   : > { %v4929_v51 = vpack.c.bf16 %v3492_v38, %v3491_v32  ;;  %v4967_v61 = vpack.c.bf16 %v3510_v31, %v3509_v4  ;;  %v3497_v52 = vld [vmem:[%s8234_s2 + $0x2d0] sm:$0xff]  ;;  %v4977_v24 = vpack.c.bf16 %v3532_v17, %v3531_v16  ;;  %v3516_v26 = vld [vmem:[%s8235_s3 + $0x268] sm:$0xff]  ;;  %v3499_v35 = vld [vmem:[%s8234_s2 + $0x2e0] sm:$0xff] }
  0x5a   : > { %v3533_v28 = vld [vmem:[%s8235_s3 + $0x2f0] sm:$0xff]  ;;  %v3500_v37 = vld [vmem:[%s8234_s2 + $0x2e8] sm:$0xff]  ;;  %v3518_v30 = vld [vmem:[%s8235_s3 + $0x278] sm:$0xff] }
  0x5b   : > { %4920 = vmatpush3.bf16.msra.mxu1 %v4919_v50  ;;  %4884 = vmatpush3.bf16.msra.mxu0 %v4883_v59  ;;  %v820_v50 = vsel %vm603_vm4, %v814_v14, %v819_v39  ;;  %v3493_v59 = vld [vmem:[%s8234_s2 + $0x2b0] sm:$0xff]  ;;  %v3514_v14 = vld [vmem:[%s8235_s3 + $0x258] sm:$0xff]  ;;  %v3583_v32 = vld [vmem:[%s8235_s3 + $0x380] sm:$0xff] }
  0x5c   : > { %4954 = vmatprep.subr.bf16.mxu1 %v4953_v55  ;;  %4886 = vmatprep.subr.bf16.mxu0 %v4885_v46  ;;  %v3475_v55 = vld [vmem:[%s8234_s2 + $0x220] sm:$0xff]  ;;  %v4975_v21 = vpack.c.bf16 %v3514_v14, %v3513_v13  ;;  %v3517_v22 = vld [vmem:[%s8235_s3 + $0x270] sm:$0xff]  ;;  %v3584_v38 = vld [vmem:[%s8235_s3 + $0x388] sm:$0xff] }
  0x5d   : > { %v3511_v46 = vld [vmem:[%s8235_s3 + $0x240] sm:$0xff]  ;;  %v4931_v2 = vpack.c.bf16 %v3476_v56, %v3475_v55  ;;  %v3484_v31 = vld [vmem:[%s8234_s2 + $0x268] sm:$0xff]  ;;  %v3502_v45 = vld [vmem:[%s8234_s2 + $0x2f8] sm:$0xff]  ;;  %v4983_v49 = vpack.c.bf16 %v3518_v30, %v3517_v22  ;;  %v5017_v55 = vpack.c.bf16 %v3584_v38, %v3583_v32 }
  0x5e   : > { %967 = vmatmul.mubr.f32.vlgmr.msra.gmra.mrb[4].mxu1 %v524_v3  ;;  %v3529_v3 = vld [vmem:[%s8235_s3 + $0x2d0] sm:$0xff]  ;;  %v4971_v10 = vpack.c.bf16 %v3512_v48, %v3511_v46  ;;  %v3483_v4 = vld [vmem:[%s8234_s2 + $0x260] sm:$0xff]  ;;  %v3586_v46 = vld [vmem:[%s8235_s3 + $0x398] sm:$0xff] }
  0x5f   : > { %4956 = vmatpush3.bf16.msra.mxu1 %v4955_v6  ;;  %971 = vmatprep.mubr.f32.mxu1 %v6212_v63  ;;  %v4933_v6 = vpack.c.bf16 %v3494_v60, %v3493_v59  ;;  %v3567_v56 = vld [vmem:[%s8235_s3 + $0x300] sm:$0xff]  ;;  %v1112_v60 = vld [vmem:[#allocation2 + $0x50] sm:$0x3]  ;;  %v1376_v48 = vld [vmem:[#allocation2 + $0x18] sm:$0xf8] }
  0x60   : > { %4958 = vmatprep.subr.bf16.mxu1 %v4957_v8  ;;  %4888 = vmatpush3.bf16.msra.mxu0 %v4887_v12  ;;  %v3478_v8 = vld [vmem:[%s8234_s2 + $0x238] sm:$0xff]  ;;  %v4973_v12 = vpack.c.bf16 %v3530_v5, %v3529_v3  ;;  %v3485_v3 = vld [vmem:[%s8234_s2 + $0x270] sm:$0xff]  ;;  %v1419_v17 = vrot.slane %v1376_v48, 3 }
  0x61   : > { %4922 = vmatprep.subr.bf16.mxu0 %v4921_v47  ;;  %v4935_v15 = vpack.c.bf16 %v3478_v8, %v3477_v7  ;;  %v4937_v47 = vpack.c.bf16 %v3496_v9, %v3495_v53  ;;  %v3486_v5 = vld [vmem:[%s8234_s2 + $0x278] sm:$0xff]  ;;  %v3551_v8 = vld [vmem:[%s8234_s2 + $0x380] sm:$0xff]  ;;  %v3552_v53 = vld [vmem:[%s8234_s2 + $0x388] sm:$0xff] }
  0x62   : > { %972 = vmatmul.mubr.f32.gmra.mrb[6].mxu1 %v6335_v0  ;;  %v3570_v16 = vld [vmem:[%s8235_s3 + $0x318] sm:$0xff] }
  0x63   : > { %4960 = vmatpush3.bf16.msra.mxu1 %v4959_v25  ;;  %1229 = vmatprep.mubr.f32.mxu1 %v1156_v54  ;;  %v3515_v25 = vld [vmem:[%s8235_s3 + $0x260] sm:$0xff]  ;;  %v4941_v54 = vpack.c.bf16 %v3498_v19, %v3497_v52  ;;  %v1020_v52 = vrot.slane %v6158_v20, 2  ;;  %v3588_v19 = vld [vmem:[%s8235_s3 + $0x3a8] sm:$0xff]  ;;  %v3590_v32 = vld [vmem:[%s8235_s3 + $0x3b8] sm:$0xff] }
  0x64   : > { %892 = vmatmul.mubr.f32.vlgmr.msra.gmra.mrb[4].mxu0 %v815_v33  ;;  %4962 = vmatprep.subr.bf16.mxu1 %v4961_v27  ;;  %v4939_v27 = vpack.c.bf16 %v3480_v18, %v3479_v58  ;;  %v3481_v33 = vld [vmem:[%s8234_s2 + $0x250] sm:$0xff]  ;;  %v4979_v39 = vpack.c.bf16 %v3516_v26, %v3515_v25  ;;  %v4951_v58 = vpack.c.bf16 %v3486_v5, %v3485_v3  ;;  %v3536_v25 = vld [vmem:[%s8234_s2 + $0x308] sm:$0xff]  ;;  %v3558_v3 = vld [vmem:[%s8234_s2 + $0x3b8] sm:$0xff] }
  0x65   : > { %4924 = vmatpush3.bf16.msra.mxu0 %v4923_v34  ;;  %896 = vmatprep.mubr.f32.mxu0 %v822_v41  ;;  %v3482_v34 = vld [vmem:[%s8234_s2 + $0x258] sm:$0xff]  ;;  %v1110_v41 = vld [vmem:[#allocation2 + $0x10] sm:$0xfc] }
  0x66   : > { %4926 = vmatprep.subr.bf16.mxu0 %v4925_v40  ;;  %v4981_v40 = vpack.c.bf16 %v3534_v29, %v3533_v28  ;;  %v4943_v42 = vpack.c.bf16 %v3482_v34, %v3481_v33  ;;  %v3553_v29 = vld [vmem:[%s8234_s2 + $0x390] sm:$0xff]  ;;  %v1243_v34 = vld [vmem:[#allocation2 + $0x8] sm:$0xf8] }
  0x67   : > { %4964 = vmatpush3.bf16.msra.mxu1 %v4963_v44  ;;  %v1113_v44 = vld [vmem:[#allocation2 + $0x58] sm:$0x3] }
  0x68   : > { %4966 = vmatprep.subr.bf16.mxu1 %v4965_v23  ;;  %897 = vmatmul.mubr.f32.gmra.mrb[6].mxu0 %v820_v50  ;;  %v4945_v23 = vpack.c.bf16 %v3500_v37, %v3499_v35  ;;  %v1151_v50 = vrot.slane %v1110_v41, 2  ;;  %v1159_v59 = vrot.slane %v1113_v44, 2  ;;  %v3571_v37 = vld [vmem:[%s8235_s3 + $0x320] sm:$0xff] }
  0x69   : > { %4928 = vmatpush3.bf16.msra.mxu0 %v4927_v36  ;;  %1097 = vmatprep.mubr.f32.mxu0 %v1024_v57  ;;  %v3501_v36 = vld [vmem:[%s8234_s2 + $0x2f0] sm:$0xff]  ;;  %v3568_v57 = vld [vmem:[%s8235_s3 + $0x308] sm:$0xff] }
  0x6a   : > { %4930 = vmatprep.subr.bf16.mxu0 %v4929_v51  ;;  %v1152_v51 = vrot.slane %v6335_v0, 2  ;;  %v5019_v9 = vpack.c.bf16 %v3568_v57, %v3567_v56  ;;  %v1160_v13 = vsel %vm1018_vm5, %v1155_v11, %v1159_v59  ;;  %v3587_v11 = vld [vmem:[%s8235_s3 + $0x3a0] sm:$0xff] }
  0x6b   : > { %4968 = vmatpush3.bf16.msra.mxu1 %v4967_v61  ;;  %v4947_v61 = vpack.c.bf16 %v3484_v31, %v3483_v4  ;;  %v5025_v35 = vpack.c.bf16 %v3588_v19, %v3587_v11  ;;  %v3538_v4 = vld [vmem:[%s8234_s2 + $0x318] sm:$0xff]  ;;  %v1287_v31 = vrot.slane %v1243_v34, 3  ;;  %v3591_v59 = vld [vmem:[%s8235_s3 + $0x3c0] sm:$0xff]  ;;  %v3580_v34 = vld [vmem:[%s8235_s3 + $0x368] sm:$0xff] }
  0x6c   : > { %4970 = vmatprep.subr.bf16.mxu1 %v4969_v62  ;;  %v3585_v62 = vld [vmem:[%s8235_s3 + $0x390] sm:$0xff]  ;;  %v1153_v7 = vsel %vm1018_vm5, %v1151_v50, %v1152_v51  ;;  %v3595_v19 = vld [vmem:[%s8235_s3 + $0x3e0] sm:$0xff] }
  0x6d   : > { %4932 = vmatpush3.bf16.msra.mxu0 %v4931_v2  ;;  %v4949_v2 = vpack.c.bf16 %v3502_v45, %v3501_v36  ;;  %v5021_v14 = vpack.c.bf16 %v3586_v46, %v3585_v62  ;;  %v1288_v36 = vrot.slane %v6122_v1, 3  ;;  %v3555_v45 = vld [vmem:[%s8234_s2 + $0x3a0] sm:$0xff]  ;;  %v3540_v46 = vld [vmem:[%s8234_s2 + $0x328] sm:$0xff] }
  0x6e   : > { %4934 = vmatprep.subr.bf16.mxu0 %v4933_v6  ;;  %v977_v6 = vld [vmem:[#allocation2] sm:$0xfc] }
  0x6f   : > { %4972 = vmatpush3.bf16.msra.mxu1 %v4971_v10  ;;  %v980_v10 = vld [vmem:[#allocation2 + $0x48] sm:$0x3]  ;;  %v1019_v18 = vrot.slane %v977_v6, 2  ;;  %v3539_v62 = vld [vmem:[%s8234_s2 + $0x320] sm:$0xff]  ;;  %v1289_v48 = vsel %vm1283_vm6, %v1287_v31, %v1288_v36 }
  0x70   : > { %4974 = vmatprep.subr.bf16.mxu1 %v4973_v12  ;;  %v1157_v12 = vrot.slane %v1112_v60, 2  ;;  %v1027_v26 = vrot.slane %v980_v10, 2  ;;  %v3592_v60 = vld [vmem:[%s8235_s3 + $0x3c8] sm:$0xff]  ;;  %v3594_v10 = vld [vmem:[%s8235_s3 + $0x3d8] sm:$0xff]  ;;  %v3619_v1 = vld [vmem:[%s8234_s2 + $0x4a0] sm:$0xff] }
  0x71   : > { %4936 = vmatpush3.bf16.msra.mxu0 %v4935_v15  ;;  %v3569_v15 = vld [vmem:[%s8235_s3 + $0x310] sm:$0xff]  ;;  %v1021_v22 = vsel %vm1018_vm5, %v1019_v18, %v1020_v52  ;;  %v5033_v6 = vpack.c.bf16 %v3592_v60, %v3591_v59 }
  0x72   : > { %4938 = vmatprep.subr.bf16.mxu0 %v4937_v47  ;;  %v1420_v47 = vrot.slane %v6212_v63, 3  ;;  %v1158_v28 = vsel %vm1018_vm5, %v1152_v51, %v1157_v12  ;;  %v5023_v33 = vpack.c.bf16 %v3570_v16, %v3569_v15  ;;  %v1028_v38 = vsel %vm1018_vm5, %v1023_v43, %v1027_v26  ;;  %v3556_v43 = vld [vmem:[%s8234_s2 + $0x3a8] sm:$0xff]  ;;  %v3573_v51 = vld [vmem:[%s8235_s3 + $0x330] sm:$0xff]  ;;  %v3559_v15 = vld [vmem:[%s8234_s2 + $0x3c0] sm:$0xff] }
  0x73   : > { %4976 = vmatpush3.bf16.msra.mxu1 %v4975_v21  ;;  %v4985_v21 = vpack.c.bf16 %v3552_v53, %v3551_v8  ;;  %v3576_v8 = vld [vmem:[%s8235_s3 + $0x348] sm:$0xff]  ;;  %v4995_v53 = vpack.c.bf16 %v3540_v46, %v3539_v62  ;;  %v3577_v18 = vld [vmem:[%s8235_s3 + $0x350] sm:$0xff]  ;;  %v3631_v46 = vld [vmem:[%s8235_s3 + $0x400] sm:$0xff] }
  0x74   : > { %4978 = vmatprep.subr.bf16.mxu1 %v4977_v24  ;;  %v3535_v24 = vld [vmem:[%s8234_s2 + $0x300] sm:$0xff]  ;;  %v3560_v16 = vld [vmem:[%s8234_s2 + $0x3c8] sm:$0xff] }
  0x75   : > { %4940 = vmatpush3.bf16.msra.mxu0 %v4939_v27  ;;  %v979_v27 = vld [vmem:[#allocation2 + $0x40] sm:$0x3]  ;;  %v4987_v30 = vpack.c.bf16 %v3536_v25, %v3535_v24  ;;  %v5001_v24 = vpack.c.bf16 %v3560_v16, %v3559_v15  ;;  %v3544_v26 = vld [vmem:[%s8234_s2 + $0x348] sm:$0xff] }
  0x76   : > { %4942 = vmatprep.subr.bf16.mxu0 %v4941_v54  ;;  %v3554_v54 = vld [vmem:[%s8234_s2 + $0x398] sm:$0xff]  ;;  %v1025_v41 = vrot.slane %v979_v27, 2  ;;  %v3543_v25 = vld [vmem:[%s8234_s2 + $0x340] sm:$0xff]  ;;  %v3561_v27 = vld [vmem:[%s8234_s2 + $0x3d0] sm:$0xff] }
  0x77   : > { %4980 = vmatpush3.bf16.msra.mxu1 %v4979_v39  ;;  %v3572_v39 = vld [vmem:[%s8235_s3 + $0x328] sm:$0xff]  ;;  %v4989_v44 = vpack.c.bf16 %v3554_v54, %v3553_v29 }
  0x78   : > { %4982 = vmatprep.subr.bf16.mxu1 %v4981_v40  ;;  %v1421_v40 = vsel %vm1283_vm6, %v1419_v17, %v1420_v47  ;;  %v1026_v56 = vsel %vm1018_vm5, %v1020_v52, %v1025_v41  ;;  %v3578_v52 = vld [vmem:[%s8235_s3 + $0x358] sm:$0xff]  ;;  %v3563_v41 = vld [vmem:[%s8234_s2 + $0x3e0] sm:$0xff]  ;;  %v3616_v15 = vld [vmem:[%s8234_s2 + $0x488] sm:$0xff] }
  0x79   : > { %4944 = vmatpush3.bf16.msra.mxu0 %v4943_v42  ;;  %v3589_v42 = vld [vmem:[%s8235_s3 + $0x3b0] sm:$0xff]  ;;  %v5039_v29 = vpack.c.bf16 %v3578_v52, %v3577_v18 }
  0x7a   : > { %4946 = vmatprep.subr.bf16.mxu0 %v4945_v23  ;;  %v3537_v23 = vld [vmem:[%s8234_s2 + $0x310] sm:$0xff]  ;;  %v5029_v50 = vpack.c.bf16 %v3590_v32, %v3589_v42  ;;  %v3564_v42 = vld [vmem:[%s8234_s2 + $0x3e8] sm:$0xff] }
  0x7b   : > { %4984 = vmatpush3.bf16.msra.mxu1 %v4983_v49  ;;  %v5027_v49 = vpack.c.bf16 %v3572_v39, %v3571_v37  ;;  %v4991_v57 = vpack.c.bf16 %v3538_v4, %v3537_v23  ;;  %v3597_v37 = vld [vmem:[%s8235_s3 + $0x3f0] sm:$0xff]  ;;  %v3598_v39 = vld [vmem:[%s8235_s3 + $0x3f8] sm:$0xff] }
  0x7c   : > { %5018 = vmatprep.subr.bf16.mxu1 %v5017_v55  ;;  %v3574_v55 = vld [vmem:[%s8235_s3 + $0x338] sm:$0xff]  ;;  %v1375_v4 = vld [vmem:[#allocation2 + $0x10] sm:$0xf8] }
  0x7d   : > { %4948 = vmatpush3.bf16.msra.mxu0 %v4947_v61  ;;  %v4993_v61 = vpack.c.bf16 %v3556_v43, %v3555_v45  ;;  %v5031_v5 = vpack.c.bf16 %v3574_v55, %v3573_v51  ;;  %v3582_v23 = vld [vmem:[%s8235_s3 + $0x378] sm:$0xff]  ;;  %v3647_v45 = vld [vmem:[%s8235_s3 + $0x480] sm:$0xff]  ;;  %v3648_v43 = vld [vmem:[%s8235_s3 + $0x488] sm:$0xff]  ;;  %v1416_v60 = vrot.slane %v1375_v4, 3 }
  0x7e   : > { %4950 = vmatprep.subr.bf16.mxu0 %v4949_v2  ;;  %1230 = vmatmul.mubr.f32.vlgmr.msra.gmra.mrb[8].mxu1 %v1153_v7  ;;  %v3557_v2 = vld [vmem:[%s8234_s2 + $0x3b0] sm:$0xff]  ;;  %v3575_v7 = vld [vmem:[%s8235_s3 + $0x340] sm:$0xff]  ;;  %v3548_v55 = vld [vmem:[%s8234_s2 + $0x368] sm:$0xff]  ;;  %v5081_v62 = vpack.c.bf16 %v3648_v43, %v3647_v45 }
  0x7f   : > { %5020 = vmatpush3.bf16.msra.mxu1 %v5019_v9  ;;  %1234 = vmatprep.mubr.f32.mxu1 %v1160_v13  ;;  %v3593_v9 = vld [vmem:[%s8235_s3 + $0x3d0] sm:$0xff]  ;;  %v4997_v12 = vpack.c.bf16 %v3558_v3, %v3557_v2  ;;  %v5035_v17 = vpack.c.bf16 %v3576_v8, %v3575_v7  ;;  %v3547_v51 = vld [vmem:[%s8234_s2 + $0x360] sm:$0xff]  ;;  %v3650_v7 = vld [vmem:[%s8235_s3 + $0x498] sm:$0xff] }
  0x80   : > { %5022 = vmatprep.subr.bf16.mxu1 %v5021_v14  ;;  %v3541_v13 = vld [vmem:[%s8234_s2 + $0x330] sm:$0xff]  ;;  %v3542_v14 = vld [vmem:[%s8234_s2 + $0x338] sm:$0xff] }
  0x81   : > { %4952 = vmatpush3.bf16.msra.mxu0 %v4951_v58  ;;  %v5037_v58 = vpack.c.bf16 %v3594_v10, %v3593_v9  ;;  %v4999_v11 = vpack.c.bf16 %v3542_v14, %v3541_v13  ;;  %v1377_v3 = vld [vmem:[#allocation2 + $0x50] sm:$0x7]  ;;  %v1641_v8 = vld [vmem:[#allocation2 + $0x18] sm:$0xf0]  ;;  %v3615_v14 = vld [vmem:[%s8234_s2 + $0x480] sm:$0xff] }
  0x82   : > { %4986 = vmatprep.subr.bf16.mxu0 %v4985_v21  ;;  %1235 = vmatmul.mubr.f32.gmra.mrb[10].mxu1 %v1158_v28  ;;  %v3596_v21 = vld [vmem:[%s8235_s3 + $0x3e8] sm:$0xff]  ;;  %v3562_v28 = vld [vmem:[%s8234_s2 + $0x3d8] sm:$0xff]  ;;  %v3549_v9 = vld [vmem:[%s8234_s2 + $0x370] sm:$0xff] }
  0x83   : > { %5024 = vmatpush3.bf16.msra.mxu1 %v5023_v33  ;;  %1494 = vmatprep.mubr.f32.mxu1 %v1421_v40  ;;  %v5041_v54 = vpack.c.bf16 %v3596_v21, %v3595_v19  ;;  %v3579_v33 = vld [vmem:[%s8235_s3 + $0x360] sm:$0xff]  ;;  %v5005_v40 = vpack.c.bf16 %v3562_v28, %v3561_v27  ;;  %v3550_v10 = vld [vmem:[%s8234_s2 + $0x378] sm:$0xff]  ;;  %v1684_v21 = vrot.slane %v1641_v8, 4  ;;  %v1285_v27 = vrot.slane %v6158_v20, 3  ;;  %v3652_v28 = vld [vmem:[%s8235_s3 + $0x4a8] sm:$0xff] }
  0x84   : > { %1098 = vmatmul.mubr.f32.vlgmr.msra.gmra.mrb[8].mxu0 %v1021_v22  ;;  %5026 = vmatprep.subr.bf16.mxu1 %v5025_v35  ;;  %v5003_v35 = vpack.c.bf16 %v3544_v26, %v3543_v25  ;;  %v3545_v22 = vld [vmem:[%s8234_s2 + $0x350] sm:$0xff]  ;;  %v5043_v32 = vpack.c.bf16 %v3580_v34, %v3579_v33  ;;  %v3634_v19 = vld [vmem:[%s8235_s3 + $0x418] sm:$0xff]  ;;  %v5015_v25 = vpack.c.bf16 %v3550_v10, %v3549_v9  ;;  %v3600_v20 = vld [vmem:[%s8234_s2 + $0x408] sm:$0xff] }
  0x85   : > { %4988 = vmatpush3.bf16.msra.mxu0 %v4987_v30  ;;  %1102 = vmatprep.mubr.f32.mxu0 %v1028_v38  ;;  %v3546_v30 = vld [vmem:[%s8234_s2 + $0x358] sm:$0xff]  ;;  %v5045_v38 = vpack.c.bf16 %v3598_v39, %v3597_v37  ;;  %v1244_v34 = vld [vmem:[#allocation2 + $0x40] sm:$0x7]  ;;  %v3617_v37 = vld [vmem:[%s8234_s2 + $0x490] sm:$0xff] }
  0x86   : > { %4990 = vmatprep.subr.bf16.mxu0 %v4989_v44  ;;  %v3581_v44 = vld [vmem:[%s8235_s3 + $0x370] sm:$0xff]  ;;  %v5007_v31 = vpack.c.bf16 %v3546_v30, %v3545_v22  ;;  %v3618_v39 = vld [vmem:[%s8234_s2 + $0x498] sm:$0xff]  ;;  %v1508_v22 = vld [vmem:[#allocation2 + $0x8] sm:$0xf0] }
  0x87   : > { %5028 = vmatpush3.bf16.msra.mxu1 %v5027_v49  ;;  %v1378_v49 = vld [vmem:[#allocation2 + $0x58] sm:$0x7]  ;;  %v5047_v59 = vpack.c.bf16 %v3582_v23, %v3581_v44  ;;  %v1290_v23 = vrot.slane %v1244_v34, 3  ;;  %v3653_v4 = vld [vmem:[%s8235_s3 + $0x4b0] sm:$0xff]  ;;  %v5053_v43 = vpack.c.bf16 %v3618_v39, %v3617_v37  ;;  %v3643_v39 = vld [vmem:[%s8235_s3 + $0x460] sm:$0xff] }
  0x88   : > { %1103 = vmatmul.mubr.f32.gmra.mrb[10].mxu0 %v1026_v56  ;;  %5030 = vmatprep.subr.bf16.mxu1 %v5029_v50  ;;  %v5009_v50 = vpack.c.bf16 %v3564_v42, %v3563_v41  ;;  %v3565_v56 = vld [vmem:[%s8234_s2 + $0x3f0] sm:$0xff]  ;;  %v1424_v2 = vrot.slane %v1378_v49, 3  ;;  %v3635_v41 = vld [vmem:[%s8235_s3 + $0x420] sm:$0xff]  ;;  %v3636_v42 = vld [vmem:[%s8235_s3 + $0x428] sm:$0xff] }
  0x89   : > { %4992 = vmatpush3.bf16.msra.mxu0 %v4991_v57  ;;  %1362 = vmatprep.mubr.f32.mxu0 %v1289_v48  ;;  %v3566_v57 = vld [vmem:[%s8234_s2 + $0x3f8] sm:$0xff]  ;;  %v3632_v48 = vld [vmem:[%s8235_s3 + $0x408] sm:$0xff]  ;;  %v3601_v49 = vld [vmem:[%s8234_s2 + $0x410] sm:$0xff] }
  0x8a   : > { %4994 = vmatprep.subr.bf16.mxu0 %v4993_v61  ;;  %v1417_v61 = vrot.slane %v6335_v0, 3  ;;  %v5083_v16 = vpack.c.bf16 %v3632_v48, %v3631_v46  ;;  %v1425_v18 = vsel %vm1283_vm6, %v1420_v47, %v1424_v2  ;;  %v3651_v47 = vld [vmem:[%s8235_s3 + $0x4a0] sm:$0xff]  ;;  %v3656_v2 = vld [vmem:[%s8235_s3 + $0x4c8] sm:$0xff]  ;;  %v3621_v8 = vld [vmem:[%s8234_s2 + $0x4b0] sm:$0xff] }
  0x8b   : > { %5032 = vmatpush3.bf16.msra.mxu1 %v5031_v5  ;;  %v5011_v5 = vpack.c.bf16 %v3548_v55, %v3547_v51  ;;  %v5089_v30 = vpack.c.bf16 %v3652_v28, %v3651_v47  ;;  %v1552_v51 = vrot.slane %v1508_v22, 4  ;;  %v6820_v55 = vld [vmem:[#allocation2 + $0x28] sm:$0xff]  ;;  %v3655_v48 = vld [vmem:[%s8235_s3 + $0x4c0] sm:$0xff]  ;;  %v3626_v34 = vld [vmem:[%s8234_s2 + $0x4d8] sm:$0xff] }
  0x8c   : > { %5034 = vmatprep.subr.bf16.mxu1 %v5033_v6  ;;  %v3649_v6 = vld [vmem:[%s8235_s3 + $0x490] sm:$0xff]  ;;  %v1418_v13 = vsel %vm1283_vm6, %v1416_v60, %v1417_v61  ;;  %v5097_v10 = vpack.c.bf16 %v3656_v2, %v3655_v48  ;;  %v3659_v47 = vld [vmem:[%s8235_s3 + $0x4e0] sm:$0xff]  ;;  %v3660_v28 = vld [vmem:[%s8235_s3 + $0x4e8] sm:$0xff]  ;;  %v1682_v2 = vrot.slane %v6335_v0, 4 }
  0x8d   : > { %4996 = vmatpush3.bf16.msra.mxu0 %v4995_v53  ;;  %v5013_v53 = vpack.c.bf16 %v3566_v57, %v3565_v56  ;;  %v5085_v52 = vpack.c.bf16 %v3650_v7, %v3649_v6  ;;  %v1553_v56 = vrot.slane %v6820_v55, 4  ;;  %v5091_v57 = vpack.c.bf16 %v3636_v42, %v3635_v41  ;;  %v3637_v60 = vld [vmem:[%s8235_s3 + $0x430] sm:$0xff]  ;;  %v3604_v6 = vld [vmem:[%s8234_s2 + $0x428] sm:$0xff]  ;;  %v3662_v41 = vld [vmem:[%s8235_s3 + $0x4f8] sm:$0xff] }
  0x8e   : > { %4998 = vmatprep.subr.bf16.mxu0 %v4997_v12  ;;  %v1242_v12 = vld [vmem:[#allocation2] sm:$0xf8]  ;;  %v5105_v37 = vpack.c.bf16 %v3660_v28, %v3659_v47  ;;  %v3714_v0 = vld [vmem:[%s8235_s3 + $0x598] sm:$0xff] }
  0x8f   : > { %5036 = vmatpush3.bf16.msra.mxu1 %v5035_v17  ;;  %v1245_v17 = vld [vmem:[#allocation2 + $0x48] sm:$0x7]  ;;  %v1284_v26 = vrot.slane %v1242_v12, 3  ;;  %v1554_v7 = vsel %vm1548_vm7, %v1552_v51, %v1553_v56  ;;  %v3639_v12 = vld [vmem:[%s8235_s3 + $0x440] sm:$0xff]  ;;  %v6988_v47 = vld [vmem:[#allocation2 + $0x38] sm:$0xff] }
  0x90   : > { %5038 = vmatprep.subr.bf16.mxu1 %v5037_v58  ;;  %v1422_v58 = vrot.slane %v1377_v3, 3  ;;  %v1292_v33 = vrot.slane %v1245_v17, 3  ;;  %v3711_v51 = vld [vmem:[%s8235_s3 + $0x580] sm:$0xff]  ;;  %v1949_v28 = vrot.slane %v6988_v47, 5 }
  0x91   : > { %5000 = vmatpush3.bf16.msra.mxu0 %v4999_v11  ;;  %v3633_v11 = vld [vmem:[%s8235_s3 + $0x410] sm:$0xff] }
  0x92   : > { %5002 = vmatprep.subr.bf16.mxu0 %v5001_v24  ;;  %v1685_v24 = vrot.slane %v6212_v63, 4  ;;  %v1293_v45 = vsel %vm1283_vm6, %v1288_v36, %v1292_v33  ;;  %v3620_v36 = vld [vmem:[%s8234_s2 + $0x4a8] sm:$0xff]  ;;  %v3625_v33 = vld [vmem:[%s8234_s2 + $0x4d0] sm:$0xff]  ;;  %v6991_v63 = vld [vmem:[#allocation2 + $0x20] sm:$0xff] }
  0x93   : > { %5040 = vmatpush3.bf16.msra.mxu1 %v5039_v29  ;;  %v5049_v29 = vpack.c.bf16 %v3616_v15, %v3615_v14  ;;  %v5057_v3 = vpack.c.bf16 %v3620_v36, %v3619_v1  ;;  %v3657_v15 = vld [vmem:[%s8235_s3 + $0x4d0] sm:$0xff]  ;;  %v5069_v42 = vpack.c.bf16 %v3626_v34, %v3625_v33  ;;  %v3712_v1 = vld [vmem:[%s8235_s3 + $0x588] sm:$0xff]  ;;  %v1643_v36 = vld [vmem:[#allocation2 + $0x58] sm:$0xf] }
  0x94   : > { %5042 = vmatprep.subr.bf16.mxu1 %v5041_v54  ;;  %v3599_v54 = vld [vmem:[%s8234_s2 + $0x400] sm:$0xff]  ;;  %v3716_v33 = vld [vmem:[%s8235_s3 + $0x5a8] sm:$0xff] }
  0x95   : > { %5004 = vmatpush3.bf16.msra.mxu0 %v5003_v35  ;;  %v1423_v35 = vsel %vm1283_vm6, %v1417_v61, %v1422_v58  ;;  %v5051_v44 = vpack.c.bf16 %v3600_v20, %v3599_v54  ;;  %v3638_v61 = vld [vmem:[%s8235_s3 + $0x438] sm:$0xff]  ;;  %v3605_v58 = vld [vmem:[%s8234_s2 + $0x430] sm:$0xff]  ;;  %v3607_v54 = vld [vmem:[%s8234_s2 + $0x440] sm:$0xff] }
  0x96   : > { %5006 = vmatprep.subr.bf16.mxu0 %v5005_v40  ;;  %v5087_v40 = vpack.c.bf16 %v3634_v19, %v3633_v11  ;;  %v5095_v9 = vpack.c.bf16 %v3638_v61, %v3637_v60  ;;  %v3624_v11 = vld [vmem:[%s8234_s2 + $0x4c8] sm:$0xff]  ;;  %v3629_v61 = vld [vmem:[%s8234_s2 + $0x4f0] sm:$0xff] }
  0x97   : > { %5044 = vmatpush3.bf16.msra.mxu1 %v5043_v32  ;;  %v1686_v32 = vsel %vm1548_vm7, %v1684_v21, %v1685_v24  ;;  %v3608_v20 = vld [vmem:[%s8234_s2 + $0x448] sm:$0xff] }
  0x98   : > { %5046 = vmatprep.subr.bf16.mxu1 %v5045_v38  ;;  %v1286_v38 = vsel %vm1283_vm6, %v1284_v26, %v1285_v27  ;;  %v3642_v26 = vld [vmem:[%s8235_s3 + $0x458] sm:$0xff]  ;;  %v5067_v22 = vpack.c.bf16 %v3608_v20, %v3607_v54  ;;  %v3612_v60 = vld [vmem:[%s8234_s2 + $0x468] sm:$0xff]  ;;  %v3715_v20 = vld [vmem:[%s8235_s3 + $0x5a0] sm:$0xff] }
  0x99   : > { %5008 = vmatpush3.bf16.msra.mxu0 %v5007_v31  ;;  %v3654_v31 = vld [vmem:[%s8235_s3 + $0x4b8] sm:$0xff] }
  0x9a   : > { %5010 = vmatprep.subr.bf16.mxu0 %v5009_v50  ;;  %v3602_v50 = vld [vmem:[%s8234_s2 + $0x418] sm:$0xff] }
  0x9b   : > { %5048 = vmatpush3.bf16.msra.mxu1 %v5047_v59  ;;  %v5093_v59 = vpack.c.bf16 %v3654_v31, %v3653_v4  ;;  %v5055_v46 = vpack.c.bf16 %v3602_v50, %v3601_v49  ;;  %v1640_v49 = vld [vmem:[#allocation2 + $0x10] sm:$0xf0] }
  0x9c   : > { %5082 = vmatprep.subr.bf16.mxu1 %v5081_v62  ;;  %v1291_v62 = vsel %vm1283_vm6, %v1285_v27, %v1290_v23  ;;  %v3628_v23 = vld [vmem:[%s8234_s2 + $0x4e8] sm:$0xff]  ;;  %v1681_v48 = vrot.slane %v1640_v49, 4  ;;  %v3717_v49 = vld [vmem:[%s8235_s3 + $0x5b0] sm:$0xff] }
  0x9d   : > { %5012 = vmatpush3.bf16.msra.mxu0 %v5011_v5  ;;  %v3603_v5 = vld [vmem:[%s8234_s2 + $0x420] sm:$0xff] }
  0x9e   : > { %5014 = vmatprep.subr.bf16.mxu0 %v5013_v53  ;;  %1495 = vmatmul.mubr.f32.vlgmr.msra.gmra.mrb[12].mxu1 %v1418_v13  ;;  %v3622_v53 = vld [vmem:[%s8234_s2 + $0x4b8] sm:$0xff]  ;;  %v3640_v13 = vld [vmem:[%s8235_s3 + $0x448] sm:$0xff]  ;;  %v5059_v14 = vpack.c.bf16 %v3604_v6, %v3603_v5  ;;  %v3695_v5 = vld [vmem:[%s8235_s3 + $0x500] sm:$0xff] }
  0x9f   : > { %5084 = vmatpush3.bf16.msra.mxu1 %v5083_v16  ;;  %1499 = vmatprep.mubr.f32.mxu1 %v1425_v18  ;;  %v3658_v16 = vld [vmem:[%s8235_s3 + $0x4d8] sm:$0xff]  ;;  %v5061_v17 = vpack.c.bf16 %v3622_v53, %v3621_v8  ;;  %v5099_v19 = vpack.c.bf16 %v3640_v13, %v3639_v12  ;;  %v3696_v6 = vld [vmem:[%s8235_s3 + $0x508] sm:$0xff]  ;;  %v1642_v8 = vld [vmem:[#allocation2 + $0x50] sm:$0xf] }
  0xa0   : > { %5086 = vmatprep.subr.bf16.mxu1 %v5085_v52  ;;  %v3606_v18 = vld [vmem:[%s8234_s2 + $0x438] sm:$0xff]  ;;  %v3623_v52 = vld [vmem:[%s8234_s2 + $0x4c0] sm:$0xff]  ;;  %v5101_v21 = vpack.c.bf16 %v3658_v16, %v3657_v15  ;;  %v3613_v13 = vld [vmem:[%s8234_s2 + $0x470] sm:$0xff]  ;;  %v1683_v16 = vsel %vm1548_vm7, %v1681_v48, %v1682_v2 }
  0xa1   : > { %5016 = vmatpush3.bf16.msra.mxu0 %v5015_v25  ;;  %v3641_v25 = vld [vmem:[%s8235_s3 + $0x450] sm:$0xff]  ;;  %v5063_v27 = vpack.c.bf16 %v3606_v18, %v3605_v58  ;;  %v1507_v15 = vld [vmem:[#allocation2] sm:$0xf0]  ;;  %v3680_v58 = vld [vmem:[%s8234_s2 + $0x588] sm:$0xff]  ;;  %v5147_v18 = vpack.c.bf16 %v3696_v6, %v3695_v5 }
  0xa2   : > { %5050 = vmatprep.subr.bf16.mxu0 %v5049_v29  ;;  %1500 = vmatmul.mubr.f32.gmra.mrb[14].mxu1 %v1423_v35  ;;  %v5065_v29 = vpack.c.bf16 %v3624_v11, %v3623_v52  ;;  %v5103_v35 = vpack.c.bf16 %v3642_v26, %v3641_v25  ;;  %v1510_v52 = vld [vmem:[#allocation2 + $0x48] sm:$0xf]  ;;  %v1687_v11 = vrot.slane %v1642_v8, 4  ;;  %v3697_v25 = vld [vmem:[%s8235_s3 + $0x510] sm:$0xff]  ;;  %v3698_v26 = vld [vmem:[%s8235_s3 + $0x518] sm:$0xff]  ;;  %v1549_v54 = vrot.slane %v1507_v15, 4 }
  0xa3   : > { %5088 = vmatpush3.bf16.msra.mxu1 %v5087_v40  ;;  %1759 = vmatprep.mubr.f32.mxu1 %v1686_v32  ;;  %v3644_v40 = vld [vmem:[%s8235_s3 + $0x468] sm:$0xff]  ;;  %v3609_v32 = vld [vmem:[%s8234_s2 + $0x450] sm:$0xff]  ;;  %v3719_v6 = vld [vmem:[%s8235_s3 + $0x5c0] sm:$0xff] }
  0xa4   : > { %1363 = vmatmul.mubr.f32.vlgmr.msra.gmra.mrb[12].mxu0 %v1286_v38  ;;  %5090 = vmatprep.subr.bf16.mxu1 %v5089_v30  ;;  %v3661_v30 = vld [vmem:[%s8235_s3 + $0x4f0] sm:$0xff]  ;;  %v3610_v38 = vld [vmem:[%s8234_s2 + $0x458] sm:$0xff]  ;;  %v5107_v4 = vpack.c.bf16 %v3644_v40, %v3643_v39  ;;  %v1557_v39 = vrot.slane %v1510_v52, 4  ;;  %v1509_v40 = vld [vmem:[#allocation2 + $0x40] sm:$0xf] }
  0xa5   : > { %5052 = vmatpush3.bf16.msra.mxu0 %v5051_v44  ;;  %1367 = vmatprep.mubr.f32.mxu0 %v1293_v45  ;;  %v3627_v44 = vld [vmem:[%s8234_s2 + $0x4e0] sm:$0xff]  ;;  %v5109_v31 = vpack.c.bf16 %v3662_v41, %v3661_v30  ;;  %v3645_v45 = vld [vmem:[%s8235_s3 + $0x470] sm:$0xff]  ;;  %v5071_v50 = vpack.c.bf16 %v3610_v38, %v3609_v32  ;;  %v3682_v41 = vld [vmem:[%s8234_s2 + $0x598] sm:$0xff]  ;;  %v5153_v38 = vpack.c.bf16 %v3716_v33, %v3715_v20 }
  0xa6   : > { %5054 = vmatprep.subr.bf16.mxu0 %v5053_v43  ;;  %v3646_v43 = vld [vmem:[%s8235_s3 + $0x478] sm:$0xff]  ;;  %v3681_v30 = vld [vmem:[%s8234_s2 + $0x590] sm:$0xff]  ;;  %v1773_v32 = vld [vmem:[#allocation2 + $0x8] sm:$0xe0] }
  0xa7   : > { %5092 = vmatpush3.bf16.msra.mxu1 %v5091_v57  ;;  %v5073_v57 = vpack.c.bf16 %v3628_v23, %v3627_v44  ;;  %v3699_v44 = vld [vmem:[%s8235_s3 + $0x520] sm:$0xff]  ;;  %v3700_v23 = vld [vmem:[%s8235_s3 + $0x528] sm:$0xff]  ;;  %v3701_v48 = vld [vmem:[%s8235_s3 + $0x530] sm:$0xff] }
  0xa8   : > { %1368 = vmatmul.mubr.f32.gmra.mrb[14].mxu0 %v1291_v62  ;;  %5094 = vmatprep.subr.bf16.mxu1 %v5093_v59  ;;  %v3611_v59 = vld [vmem:[%s8234_s2 + $0x460] sm:$0xff]  ;;  %v3630_v62 = vld [vmem:[%s8234_s2 + $0x4f8] sm:$0xff]  ;;  %v3724_v33 = vld [vmem:[%s8235_s3 + $0x5e8] sm:$0xff] }
  0xa9   : > { %5056 = vmatpush3.bf16.msra.mxu0 %v5055_v46  ;;  %1627 = vmatprep.mubr.f32.mxu0 %v1554_v7  ;;  %v5111_v46 = vpack.c.bf16 %v3646_v43, %v3645_v45  ;;  %v1689_v7 = vrot.slane %v1643_v36, 4  ;;  %v5075_v53 = vpack.c.bf16 %v3612_v60, %v3611_v59  ;;  %v5077_v12 = vpack.c.bf16 %v3630_v62, %v3629_v61  ;;  %v3665_v36 = vld [vmem:[%s8234_s2 + $0x510] sm:$0xff]  ;;  %v3683_v61 = vld [vmem:[%s8234_s2 + $0x5a0] sm:$0xff] }
  0xaa   : > { %5058 = vmatprep.subr.bf16.mxu0 %v5057_v3  ;;  %v5145_v3 = vpack.c.bf16 %v3712_v1, %v3711_v51  ;;  %v1555_v43 = vrot.slane %v1509_v40, 4  ;;  %v1558_v51 = vsel %vm1548_vm7, %v1553_v56, %v1557_v39  ;;  %v5117_v1 = vpack.c.bf16 %v3682_v41, %v3681_v30  ;;  %v3684_v56 = vld [vmem:[%s8234_s2 + $0x5a8] sm:$0xff]  ;;  %v3703_v15 = vld [vmem:[%s8235_s3 + $0x540] sm:$0xff]  ;;  %v3689_v39 = vld [vmem:[%s8234_s2 + $0x5d0] sm:$0xff] }
  0xab   : > { %5096 = vmatpush3.bf16.msra.mxu1 %v5095_v9  ;;  %v3713_v9 = vld [vmem:[%s8235_s3 + $0x590] sm:$0xff]  ;;  %v1816_v59 = vrot.slane %v1773_v32, 5  ;;  %v1817_v60 = vrot.slane %v6820_v55, 5  ;;  %v5155_v62 = vpack.c.bf16 %v3700_v23, %v3699_v44  ;;  %v5121_v8 = vpack.c.bf16 %v3684_v56, %v3683_v61  ;;  %v3723_v20 = vld [vmem:[%s8235_s3 + $0x5e0] sm:$0xff]  ;;  %v3690_v40 = vld [vmem:[%s8234_s2 + $0x5d8] sm:$0xff] }
  0xac   : > { %5098 = vmatprep.subr.bf16.mxu1 %v5097_v10  ;;  %v1905_v10 = vld [vmem:[#allocation2 + $0x18] sm:$0xe0]  ;;  %v5169_v30 = vpack.c.bf16 %v3724_v33, %v3723_v20  ;;  %v3707_v41 = vld [vmem:[%s8235_s3 + $0x560] sm:$0xff]  ;;  %v5133_v23 = vpack.c.bf16 %v3690_v40, %v3689_v39  ;;  %v3776_v61 = vld [vmem:[%s8235_s3 + $0x688] sm:$0xff]  ;;  %v1814_v39 = vrot.slane %v6991_v63, 5 }
  0xad   : > { %5060 = vmatpush3.bf16.msra.mxu0 %v5059_v14  ;;  %v3614_v14 = vld [vmem:[%s8234_s2 + $0x478] sm:$0xff]  ;;  %v3780_v40 = vld [vmem:[%s8235_s3 + $0x6a8] sm:$0xff] }
  0xae   : > { %5062 = vmatprep.subr.bf16.mxu0 %v5061_v17  ;;  %v3679_v17 = vld [vmem:[%s8234_s2 + $0x580] sm:$0xff]  ;;  %v3726_v44 = vld [vmem:[%s8235_s3 + $0x5f8] sm:$0xff] }
  0xaf   : > { %5100 = vmatpush3.bf16.msra.mxu1 %v5099_v19  ;;  %v1690_v19 = vsel %vm1548_vm7, %v1685_v24, %v1689_v7  ;;  %v1550_v24 = vrot.slane %v6991_v63, 4  ;;  %v5113_v34 = vpack.c.bf16 %v3680_v58, %v3679_v17  ;;  %v3720_v7 = vld [vmem:[%s8235_s3 + $0x5c8] sm:$0xff]  ;;  %v3721_v58 = vld [vmem:[%s8235_s3 + $0x5d0] sm:$0xff]  ;;  %v1907_v56 = vld [vmem:[#allocation2 + $0x58] sm:$0x1f] }
  0xb0   : > { %5102 = vmatprep.subr.bf16.mxu1 %v5101_v21  ;;  %v5149_v21 = vpack.c.bf16 %v3714_v0, %v3713_v9  ;;  %v3668_v9 = vld [vmem:[%s8234_s2 + $0x528] sm:$0xff]  ;;  %v1818_v0 = vsel %vm443_vm2, %v1816_v59, %v1817_v60  ;;  %v3775_v59 = vld [vmem:[%s8235_s3 + $0x680] sm:$0xff]  ;;  %v3762_v20 = vld [vmem:[%s8235_s3 + $0x618] sm:$0xff] }
  0xb1   : > { %5064 = vmatpush3.bf16.msra.mxu0 %v5063_v27  ;;  %v1948_v27 = vrot.slane %v1905_v10, 5  ;;  %v3685_v10 = vld [vmem:[%s8234_s2 + $0x5b0] sm:$0xff] }
  0xb2   : > { %5066 = vmatprep.subr.bf16.mxu0 %v5065_v29  ;;  %v5079_v29 = vpack.c.bf16 %v3614_v14, %v3613_v13  ;;  %v5161_v14 = vpack.c.bf16 %v3720_v7, %v3719_v6  ;;  %v7169_v7 = vld [vmem:[#allocation2 + $0x30] sm:$0xff] }
  0xb3   : > { %5104 = vmatpush3.bf16.msra.mxu1 %v5103_v35  ;;  %v3663_v35 = vld [vmem:[%s8234_s2 + $0x500] sm:$0xff] }
  0xb4   : > { %5106 = vmatprep.subr.bf16.mxu1 %v5105_v37  ;;  %v3664_v37 = vld [vmem:[%s8234_s2 + $0x508] sm:$0xff] }
  0xb5   : > { %5068 = vmatpush3.bf16.msra.mxu0 %v5067_v22  ;;  %v1688_v22 = vsel %vm1548_vm7, %v1682_v2, %v1687_v11  ;;  %v5115_v45 = vpack.c.bf16 %v3664_v37, %v3663_v35  ;;  %v3702_v2 = vld [vmem:[%s8235_s3 + $0x538] sm:$0xff]  ;;  %v3669_v11 = vld [vmem:[%s8234_s2 + $0x530] sm:$0xff]  ;;  %v3671_v35 = vld [vmem:[%s8234_s2 + $0x540] sm:$0xff] }
  0xb6   : > { %5070 = vmatprep.subr.bf16.mxu0 %v5069_v42  ;;  %v5151_v42 = vpack.c.bf16 %v3698_v26, %v3697_v25  ;;  %v5159_v13 = vpack.c.bf16 %v3702_v2, %v3701_v48  ;;  %v3688_v25 = vld [vmem:[%s8234_s2 + $0x5c8] sm:$0xff]  ;;  %v3693_v2 = vld [vmem:[%s8234_s2 + $0x5f0] sm:$0xff] }
  0xb7   : > { %5108 = vmatpush3.bf16.msra.mxu1 %v5107_v4  ;;  %v1950_v4 = vsel %vm443_vm2, %v1948_v27, %v1949_v28  ;;  %v3672_v37 = vld [vmem:[%s8234_s2 + $0x548] sm:$0xff] }
  0xb8   : > { %5110 = vmatprep.subr.bf16.mxu1 %v5109_v31  ;;  %v1551_v31 = vsel %vm1548_vm7, %v1549_v54, %v1550_v24  ;;  %v3706_v54 = vld [vmem:[%s8235_s3 + $0x558] sm:$0xff]  ;;  %v5131_v32 = vpack.c.bf16 %v3672_v37, %v3671_v35  ;;  %v3676_v48 = vld [vmem:[%s8234_s2 + $0x568] sm:$0xff] }
  0xb9   : > { %5072 = vmatpush3.bf16.msra.mxu0 %v5071_v50  ;;  %v3718_v50 = vld [vmem:[%s8235_s3 + $0x5b8] sm:$0xff] }
  0xba   : > { %5074 = vmatprep.subr.bf16.mxu0 %v5073_v57  ;;  %v3666_v57 = vld [vmem:[%s8234_s2 + $0x518] sm:$0xff] }
  0xbb   : > { %5112 = vmatpush3.bf16.msra.mxu1 %v5111_v46  ;;  %v5157_v46 = vpack.c.bf16 %v3718_v50, %v3717_v49  ;;  %v5119_v5 = vpack.c.bf16 %v3666_v57, %v3665_v36  ;;  %v1904_v36 = vld [vmem:[#allocation2 + $0x10] sm:$0xe0] }
  0xbc   : > { %5146 = vmatprep.subr.bf16.mxu1 %v5145_v3  ;;  %v1556_v3 = vsel %vm1548_vm7, %v1550_v24, %v1555_v43  ;;  %v3692_v43 = vld [vmem:[%s8234_s2 + $0x5e8] sm:$0xff]  ;;  %v1945_v6 = vrot.slane %v1904_v36, 5 }
  0xbd   : > { %5076 = vmatpush3.bf16.msra.mxu0 %v5075_v53  ;;  %v3667_v53 = vld [vmem:[%s8234_s2 + $0x520] sm:$0xff] }
  0xbe   : > { %5078 = vmatprep.subr.bf16.mxu0 %v5077_v12  ;;  %1760 = vmatmul.mubr.f32.vlgmr.msra.gmra.mrb[16].mxu1 %v1683_v16  ;;  %v3686_v12 = vld [vmem:[%s8234_s2 + $0x5b8] sm:$0xff]  ;;  %v3704_v16 = vld [vmem:[%s8235_s3 + $0x548] sm:$0xff]  ;;  %v5123_v17 = vpack.c.bf16 %v3668_v9, %v3667_v53  ;;  %v5209_v53 = vpack.c.bf16 %v3776_v61, %v3775_v59  ;;  %v3759_v9 = vld [vmem:[%s8235_s3 + $0x600] sm:$0xff] }
  0xbf   : > { %5148 = vmatpush3.bf16.msra.mxu1 %v5147_v18  ;;  %1764 = vmatprep.mubr.f32.mxu1 %v1690_v19  ;;  %v3722_v18 = vld [vmem:[%s8235_s3 + $0x5d8] sm:$0xff]  ;;  %v5125_v52 = vpack.c.bf16 %v3686_v12, %v3685_v10  ;;  %v5163_v26 = vpack.c.bf16 %v3704_v16, %v3703_v15  ;;  %v1953_v10 = vrot.slane %v1907_v56, 5  ;;  %v1906_v12 = vld [vmem:[#allocation2 + $0x50] sm:$0x1f] }
  0xc0   : > { %5150 = vmatprep.subr.bf16.mxu1 %v5149_v21  ;;  %v3670_v19 = vld [vmem:[%s8234_s2 + $0x538] sm:$0xff]  ;;  %v3687_v21 = vld [vmem:[%s8234_s2 + $0x5c0] sm:$0xff]  ;;  %v5165_v27 = vpack.c.bf16 %v3722_v18, %v3721_v58  ;;  %v3677_v58 = vld [vmem:[%s8234_s2 + $0x570] sm:$0xff] }
  0xc1   : > { %5080 = vmatpush3.bf16.msra.mxu0 %v5079_v29  ;;  %v3705_v29 = vld [vmem:[%s8235_s3 + $0x550] sm:$0xff]  ;;  %v5127_v24 = vpack.c.bf16 %v3670_v19, %v3669_v11  ;;  %v3778_v15 = vld [vmem:[%s8235_s3 + $0x698] sm:$0xff]  ;;  %v3743_v19 = vld [vmem:[%s8234_s2 + $0x680] sm:$0xff] }
  0xc2   : > { %5114 = vmatprep.subr.bf16.mxu0 %v5113_v34  ;;  %1765 = vmatmul.mubr.f32.gmra.mrb[18].mxu1 %v1688_v22  ;;  %v5129_v34 = vpack.c.bf16 %v3688_v25, %v3687_v21  ;;  %v5167_v22 = vpack.c.bf16 %v3706_v54, %v3705_v29  ;;  %v2170_v16 = vld [vmem:[#allocation2 + $0x18] sm:$0xc0]  ;;  %v3744_v21 = vld [vmem:[%s8234_s2 + $0x688] sm:$0xff]  ;;  %v1954_v29 = vsel %vm443_vm2, %v1949_v28, %v1953_v10  ;;  %v3779_v28 = vld [vmem:[%s8235_s3 + $0x6a0] sm:$0xff] }
  0xc3   : > { %5152 = vmatpush3.bf16.msra.mxu1 %v5151_v42  ;;  %2023 = vmatprep.mubr.f32.mxu1 %v1950_v4  ;;  %v3708_v42 = vld [vmem:[%s8235_s3 + $0x568] sm:$0xff]  ;;  %v3673_v4 = vld [vmem:[%s8234_s2 + $0x550] sm:$0xff]  ;;  %v3678_v18 = vld [vmem:[%s8234_s2 + $0x578] sm:$0xff]  ;;  %v2213_v33 = vrot.slane %v2170_v16, 6 }
  0xc4   : > { %1628 = vmatmul.mubr.f32.vlgmr.msra.gmra.mrb[16].mxu0 %v1551_v31  ;;  %5154 = vmatprep.subr.bf16.mxu1 %v5153_v38  ;;  %v3725_v38 = vld [vmem:[%s8235_s3 + $0x5f0] sm:$0xff]  ;;  %v3674_v31 = vld [vmem:[%s8234_s2 + $0x558] sm:$0xff]  ;;  %v5171_v49 = vpack.c.bf16 %v3708_v42, %v3707_v41  ;;  %v5143_v35 = vpack.c.bf16 %v3678_v18, %v3677_v58  ;;  %v3728_v41 = vld [vmem:[%s8234_s2 + $0x608] sm:$0xff] }
  0xc5   : > { %5116 = vmatpush3.bf16.msra.mxu0 %v5115_v45  ;;  %1632 = vmatprep.mubr.f32.mxu0 %v1558_v51  ;;  %v3691_v45 = vld [vmem:[%s8234_s2 + $0x5e0] sm:$0xff]  ;;  %v5173_v50 = vpack.c.bf16 %v3726_v44, %v3725_v38  ;;  %v3709_v51 = vld [vmem:[%s8235_s3 + $0x570] sm:$0xff]  ;;  %v5135_v57 = vpack.c.bf16 %v3674_v31, %v3673_v4  ;;  %v2037_v31 = vld [vmem:[#allocation2 + $0x8] sm:$0xc0] }
  0xc6   : > { %5118 = vmatprep.subr.bf16.mxu0 %v5117_v1  ;;  %v3710_v1 = vld [vmem:[%s8235_s3 + $0x578] sm:$0xff]  ;;  %v3745_v44 = vld [vmem:[%s8234_s2 + $0x690] sm:$0xff]  ;;  %v3783_v10 = vld [vmem:[%s8235_s3 + $0x6c0] sm:$0xff] }
  0xc7   : > { %5156 = vmatpush3.bf16.msra.mxu1 %v5155_v62  ;;  %v5137_v62 = vpack.c.bf16 %v3692_v43, %v3691_v45  ;;  %v5217_v45 = vpack.c.bf16 %v3780_v40, %v3779_v28  ;;  %v3763_v43 = vld [vmem:[%s8235_s3 + $0x620] sm:$0xff]  ;;  %v3782_v59 = vld [vmem:[%s8235_s3 + $0x6b8] sm:$0xff] }
  0xc8   : > { %1633 = vmatmul.mubr.f32.gmra.mrb[18].mxu0 %v1556_v3  ;;  %5158 = vmatprep.subr.bf16.mxu1 %v5157_v46  ;;  %v3675_v46 = vld [vmem:[%s8234_s2 + $0x560] sm:$0xff]  ;;  %v3694_v3 = vld [vmem:[%s8234_s2 + $0x5f8] sm:$0xff] }
  0xc9   : > { %5120 = vmatpush3.bf16.msra.mxu0 %v5119_v5  ;;  %1891 = vmatprep.mubr.f32.mxu0 %v1818_v0  ;;  %v5175_v5 = vpack.c.bf16 %v3710_v1, %v3709_v51  ;;  %v3760_v0 = vld [vmem:[%s8235_s3 + $0x608] sm:$0xff]  ;;  %v3750_v58 = vld [vmem:[%s8234_s2 + $0x6b8] sm:$0xff]  ;;  %v3787_v40 = vld [vmem:[%s8235_s3 + $0x6e0] sm:$0xff] }
  0xca   : > { %5122 = vmatprep.subr.bf16.mxu0 %v5121_v8  ;;  %v1946_v8 = vrot.slane %v7169_v7, 5  ;;  %v5211_v25 = vpack.c.bf16 %v3760_v0, %v3759_v9 }
  0xcb   : > { %5160 = vmatpush3.bf16.msra.mxu1 %v5159_v13  ;;  %v5139_v13 = vpack.c.bf16 %v3676_v48, %v3675_v46  ;;  %v3730_v46 = vld [vmem:[%s8234_s2 + $0x618] sm:$0xff]  ;;  %v2081_v48 = vrot.slane %v2037_v31, 6  ;;  %v3772_v31 = vld [vmem:[%s8235_s3 + $0x668] sm:$0xff] }
  0xcc   : > { %5162 = vmatprep.subr.bf16.mxu1 %v5161_v14  ;;  %v3777_v14 = vld [vmem:[%s8235_s3 + $0x690] sm:$0xff]  ;;  %v1947_v11 = vsel %vm443_vm2, %v1945_v6, %v1946_v8 }
  0xcd   : > { %5124 = vmatpush3.bf16.msra.mxu0 %v5123_v17  ;;  %v5141_v17 = vpack.c.bf16 %v3694_v3, %v3693_v2  ;;  %v5213_v54 = vpack.c.bf16 %v3778_v15, %v3777_v14  ;;  %v2082_v2 = vrot.slane %v6820_v55, 6  ;;  %v3747_v3 = vld [vmem:[%s8234_s2 + $0x6a0] sm:$0xff]  ;;  %v3732_v15 = vld [vmem:[%s8234_s2 + $0x628] sm:$0xff] }
  0xce   : > { %5126 = vmatprep.subr.bf16.mxu0 %v5125_v52  ;;  %v1772_v52 = vld [vmem:[#allocation2] sm:$0xe0] }
  0xcf   : > { %5164 = vmatpush3.bf16.msra.mxu1 %v5163_v26  ;;  %v1775_v26 = vld [vmem:[#allocation2 + $0x48] sm:$0x1f]  ;;  %v1813_v37 = vrot.slane %v1772_v52, 5  ;;  %v3731_v14 = vld [vmem:[%s8234_s2 + $0x620] sm:$0xff]  ;;  %v2083_v16 = vsel %vm2077_vm8, %v2081_v48, %v2082_v2 }
  0xd0   : > { %5166 = vmatprep.subr.bf16.mxu1 %v5165_v27  ;;  %v1951_v27 = vrot.slane %v1906_v12, 5  ;;  %v1821_v42 = vrot.slane %v1775_v26, 5  ;;  %v3784_v12 = vld [vmem:[%s8235_s3 + $0x6c8] sm:$0xff]  ;;  %v3786_v26 = vld [vmem:[%s8235_s3 + $0x6d8] sm:$0xff] }
  0xd1   : > { %5128 = vmatpush3.bf16.msra.mxu0 %v5127_v24  ;;  %v3761_v24 = vld [vmem:[%s8235_s3 + $0x610] sm:$0xff]  ;;  %v1815_v51 = vsel %vm443_vm2, %v1813_v37, %v1814_v39  ;;  %v5225_v52 = vpack.c.bf16 %v3784_v12, %v3783_v10  ;;  %v2211_v10 = vrot.slane %v7169_v7, 6  ;;  %v2039_v7 = vld [vmem:[#allocation2 + $0x48] sm:$0x3f] }
  0xd2   : > { %5130 = vmatprep.subr.bf16.mxu0 %v5129_v34  ;;  %v2214_v34 = vrot.slane %v6988_v47, 6  ;;  %v1952_v38 = vsel %vm443_vm2, %v1946_v8, %v1951_v27  ;;  %v5215_v4 = vpack.c.bf16 %v3762_v20, %v3761_v24  ;;  %v1822_v61 = vsel %vm443_vm2, %v1817_v60, %v1821_v42  ;;  %v3748_v60 = vld [vmem:[%s8234_s2 + $0x6a8] sm:$0xff]  ;;  %v3765_v8 = vld [vmem:[%s8235_s3 + $0x630] sm:$0xff]  ;;  %v3751_v24 = vld [vmem:[%s8234_s2 + $0x6c0] sm:$0xff] }
  0xd3   : > { %5168 = vmatpush3.bf16.msra.mxu1 %v5167_v22  ;;  %v5177_v22 = vpack.c.bf16 %v3744_v21, %v3743_v19  ;;  %v3768_v19 = vld [vmem:[%s8235_s3 + $0x648] sm:$0xff]  ;;  %v5187_v21 = vpack.c.bf16 %v3732_v15, %v3731_v14  ;;  %v3769_v37 = vld [vmem:[%s8235_s3 + $0x650] sm:$0xff] }
  0xd4   : > { %5170 = vmatprep.subr.bf16.mxu1 %v5169_v30  ;;  %v3727_v30 = vld [vmem:[%s8234_s2 + $0x600] sm:$0xff]  ;;  %v3752_v20 = vld [vmem:[%s8234_s2 + $0x6c8] sm:$0xff] }
  0xd5   : > { %5132 = vmatpush3.bf16.msra.mxu0 %v5131_v32  ;;  %v1774_v32 = vld [vmem:[#allocation2 + $0x40] sm:$0x1f]  ;;  %v5179_v1 = vpack.c.bf16 %v3728_v41, %v3727_v30  ;;  %v5193_v30 = vpack.c.bf16 %v3752_v20, %v3751_v24  ;;  %v3736_v42 = vld [vmem:[%s8234_s2 + $0x648] sm:$0xff] }
  0xd6   : > { %5134 = vmatprep.subr.bf16.mxu0 %v5133_v23  ;;  %v3746_v23 = vld [vmem:[%s8234_s2 + $0x698] sm:$0xff]  ;;  %v1819_v36 = vrot.slane %v1774_v32, 5  ;;  %v3735_v41 = vld [vmem:[%s8234_s2 + $0x640] sm:$0xff]  ;;  %v3753_v32 = vld [vmem:[%s8234_s2 + $0x6d0] sm:$0xff] }
  0xd7   : > { %5172 = vmatpush3.bf16.msra.mxu1 %v5171_v49  ;;  %v3764_v49 = vld [vmem:[%s8235_s3 + $0x628] sm:$0xff]  ;;  %v5181_v56 = vpack.c.bf16 %v3746_v23, %v3745_v44 }
  0xd8   : > { %5174 = vmatprep.subr.bf16.mxu1 %v5173_v50  ;;  %v2215_v50 = vsel %vm2077_vm8, %v2213_v33, %v2214_v34  ;;  %v1820_v9 = vsel %vm443_vm2, %v1814_v39, %v1819_v36  ;;  %v3770_v39 = vld [vmem:[%s8235_s3 + $0x658] sm:$0xff]  ;;  %v3755_v36 = vld [vmem:[%s8234_s2 + $0x6e0] sm:$0xff] }
  0xd9   : > { %5136 = vmatpush3.bf16.msra.mxu0 %v5135_v57  ;;  %v3781_v57 = vld [vmem:[%s8235_s3 + $0x6b0] sm:$0xff]  ;;  %v5231_v44 = vpack.c.bf16 %v3770_v39, %v3769_v37 }
  0xda   : > { %5138 = vmatprep.subr.bf16.mxu0 %v5137_v62  ;;  %v3729_v62 = vld [vmem:[%s8234_s2 + $0x610] sm:$0xff]  ;;  %v5221_v6 = vpack.c.bf16 %v3782_v59, %v3781_v57  ;;  %v3756_v57 = vld [vmem:[%s8234_s2 + $0x6e8] sm:$0xff] }
  0xdb   : > { %5176 = vmatpush3.bf16.msra.mxu1 %v5175_v5  ;;  %v5219_v5 = vpack.c.bf16 %v3764_v49, %v3763_v43  ;;  %v5183_v0 = vpack.c.bf16 %v3730_v46, %v3729_v62  ;;  %v3789_v43 = vld [vmem:[%s8235_s3 + $0x6f0] sm:$0xff]  ;;  %v3790_v49 = vld [vmem:[%s8235_s3 + $0x6f8] sm:$0xff] }
  0xdc   : > { %5210 = vmatprep.subr.bf16.mxu1 %v5209_v53  ;;  %v3766_v53 = vld [vmem:[%s8235_s3 + $0x638] sm:$0xff]  ;;  %v2169_v46 = vld [vmem:[#allocation2 + $0x10] sm:$0xc0] }
  0xdd   : > { %5140 = vmatpush3.bf16.msra.mxu0 %v5139_v13  ;;  %v5185_v13 = vpack.c.bf16 %v3748_v60, %v3747_v3  ;;  %v5223_v18 = vpack.c.bf16 %v3766_v53, %v3765_v8  ;;  %v3774_v62 = vld [vmem:[%s8235_s3 + $0x678] sm:$0xff]  ;;  %v5201_v60 = vpack.c.bf16 %v3756_v57, %v3755_v36  ;;  %v3757_v8 = vld [vmem:[%s8234_s2 + $0x6f0] sm:$0xff] }
  0xde   : > { %5142 = vmatprep.subr.bf16.mxu0 %v5141_v17  ;;  %2024 = vmatmul.mubr.f32.vlgmr.msra.gmra.mrb[20].mxu1 %v1947_v11  ;;  %v3749_v17 = vld [vmem:[%s8234_s2 + $0x6b0] sm:$0xff]  ;;  %v3767_v11 = vld [vmem:[%s8235_s3 + $0x640] sm:$0xff]  ;;  %v2172_v3 = vld [vmem:[#allocation2 + $0x58] sm:$0x3f] }
  0xdf   : > { %5212 = vmatpush3.bf16.msra.mxu1 %v5211_v25  ;;  %2028 = vmatprep.mubr.f32.mxu1 %v1954_v29  ;;  %v3785_v25 = vld [vmem:[%s8235_s3 + $0x6d0] sm:$0xff]  ;;  %v5189_v27 = vpack.c.bf16 %v3750_v58, %v3749_v17  ;;  %v5227_v33 = vpack.c.bf16 %v3768_v19, %v3767_v11  ;;  %v3758_v53 = vld [vmem:[%s8234_s2 + $0x6f8] sm:$0xff]  ;;  %v2218_v12 = vrot.slane %v2172_v3, 6  ;;  %v2036_v58 = vld [vmem:[#allocation2] sm:$0xc0] }
  0xe0   : > { %5214 = vmatprep.subr.bf16.mxu1 %v5213_v54  ;;  %v3733_v29 = vld [vmem:[%s8234_s2 + $0x630] sm:$0xff]  ;;  %v3734_v54 = vld [vmem:[%s8234_s2 + $0x638] sm:$0xff]  ;;  %v5205_v15 = vpack.c.bf16 %v3758_v53, %v3757_v8 }
  0xe1   : > { %5144 = vmatpush3.bf16.msra.mxu0 %v5143_v35  ;;  %v5229_v35 = vpack.c.bf16 %v3786_v26, %v3785_v25  ;;  %v5191_v28 = vpack.c.bf16 %v3734_v54, %v3733_v29  ;;  %v3742_v17 = vld [vmem:[%s8234_s2 + $0x678] sm:$0xff]  ;;  %v2219_v11 = vsel %vm2077_vm8, %v2214_v34, %v2218_v12  ;;  %v2079_v25 = vrot.slane %v6991_v63, 6 }
  0xe2   : > { %5178 = vmatprep.subr.bf16.mxu0 %v5177_v22  ;;  %2029 = vmatmul.mubr.f32.gmra.mrb[22].mxu1 %v1952_v38  ;;  %v3788_v22 = vld [vmem:[%s8235_s3 + $0x6e8] sm:$0xff]  ;;  %v3754_v38 = vld [vmem:[%s8234_s2 + $0x6d8] sm:$0xff]  ;;  %v2086_v26 = vrot.slane %v2039_v7, 6 }
  0xe3   : > { %5216 = vmatpush3.bf16.msra.mxu1 %v5215_v4  ;;  %2288 = vmatprep.mubr.f32.mxu1 %v2215_v50  ;;  %v5233_v23 = vpack.c.bf16 %v3788_v22, %v3787_v40  ;;  %v3771_v4 = vld [vmem:[%s8235_s3 + $0x660] sm:$0xff]  ;;  %v5197_v50 = vpack.c.bf16 %v3754_v38, %v3753_v32  ;;  %v3811_v7 = vld [vmem:[%s8236_s4 + $0x188] sm:$0xff] }
  0xe4   : > { %1892 = vmatmul.mubr.f32.vlgmr.msra.gmra.mrb[20].mxu0 %v1815_v51  ;;  %5218 = vmatprep.subr.bf16.mxu1 %v5217_v45  ;;  %v5195_v45 = vpack.c.bf16 %v3736_v42, %v3735_v41  ;;  %v3737_v51 = vld [vmem:[%s8234_s2 + $0x650] sm:$0xff]  ;;  %v5235_v59 = vpack.c.bf16 %v3772_v31, %v3771_v4  ;;  %v2087_v47 = vsel %vm2077_vm8, %v2082_v2, %v2086_v26 }
  0xe5   : > { %5180 = vmatpush3.bf16.msra.mxu0 %v5179_v1  ;;  %1896 = vmatprep.mubr.f32.mxu0 %v1822_v61  ;;  %v3738_v1 = vld [vmem:[%s8234_s2 + $0x658] sm:$0xff]  ;;  %v5237_v61 = vpack.c.bf16 %v3790_v49, %v3789_v43  ;;  %v2378_v26 = vld [vmem:[%s8236_s4 + $0x10] sm:$0xff] }
  0xe6   : > { %5182 = vmatprep.subr.bf16.mxu0 %v5181_v56  ;;  %v3773_v56 = vld [vmem:[%s8235_s3 + $0x670] sm:$0xff]  ;;  %v5199_v48 = vpack.c.bf16 %v3738_v1, %v3737_v51 }
  0xe7   : > { %5220 = vmatpush3.bf16.msra.mxu1 %v5219_v5  ;;  %v3739_v5 = vld [vmem:[%s8234_s2 + $0x660] sm:$0xff] }
  0xe8   : > { %1897 = vmatmul.mubr.f32.gmra.mrb[22].mxu0 %v1820_v9  ;;  %5222 = vmatprep.subr.bf16.mxu1 %v5221_v6  ;;  %v3740_v6 = vld [vmem:[%s8234_s2 + $0x668] sm:$0xff]  ;;  %v5239_v9 = vpack.c.bf16 %v3774_v62, %v3773_v56 }
  0xe9   : > { %5184 = vmatpush3.bf16.msra.mxu0 %v5183_v0  ;;  %2156 = vmatprep.mubr.f32.mxu0 %v2083_v16  ;;  %v2210_v0 = vrot.slane %v2169_v46, 6  ;;  %v5203_v14 = vpack.c.bf16 %v3740_v6, %v3739_v5  ;;  %v3741_v16 = vld [vmem:[%s8234_s2 + $0x670] sm:$0xff] }
  0xea   : > { %5186 = vmatprep.subr.bf16.mxu0 %v5185_v13  ;;  %v2171_v13 = vld [vmem:[#allocation2 + $0x50] sm:$0x3f]  ;;  %v5207_v19 = vpack.c.bf16 %v3742_v17, %v3741_v16  ;;  %v2376_v16 = vld [vmem:[%s8236_s4] sm:$0xff]  ;;  %v2377_v17 = vld [vmem:[%s8236_s4 + $0x8] sm:$0xff] }
  0xeb   : > { %5224 = vmatpush3.bf16.msra.mxu1 %v5223_v18  ;;  %v2212_v18 = vsel %vm2077_vm8, %v2210_v0, %v2211_v10 }
  0xec   : > { %5226 = vmatprep.subr.bf16.mxu1 %v5225_v52  ;;  %v2216_v52 = vrot.slane %v2171_v13, 6  ;;  %v2392_v13 = vld [vmem:[%s8236_s4 + $0x80] sm:$0xff] }
  0xed   : > { %5188 = vmatpush3.bf16.msra.mxu0 %v5187_v21  ;;  %v2078_v21 = vrot.slane %v2036_v58, 6  ;;  %v5275_v58 = vpack.c.bf16 %v2377_v17, %v2376_v16  ;;  %v2402_v17 = vld [vmem:[%s8236_s4 + $0xd0] sm:$0xff] }
  0xee   : > { %5190 = vmatprep.subr.bf16.mxu0 %v5189_v27  ;;  %v2038_v27 = vld [vmem:[#allocation2 + $0x40] sm:$0x3f]  ;;  %v2217_v29 = vsel %vm2077_vm8, %v2211_v10, %v2216_v52  ;;  %v2394_v52 = vld [vmem:[%s8236_s4 + $0x90] sm:$0xff] }
  0xef   : > { %5228 = vmatpush3.bf16.msra.mxu1 %v5227_v33  ;;  %v2080_v54 = vsel %vm2077_vm8, %v2078_v21, %v2079_v25  ;;  %v2084_v24 = vrot.slane %v2038_v27, 6  ;;  %v3794_v21 = vld [vmem:[%s8236_s4 + $0x100] sm:$0xff]  ;;  %v2379_v27 = vld [vmem:[%s8236_s4 + $0x18] sm:$0xff] }
  0xf0   : > { %5230 = vmatprep.subr.bf16.mxu1 %v5229_v35 }
  0xf1   : > { %5192 = vmatpush3.bf16.msra.mxu0 %v5191_v28  ;;  %v2085_v63 = vsel %vm2077_vm8, %v2079_v25, %v2084_v24 }
  0xf2   : > { %5194 = vmatprep.subr.bf16.mxu0 %v5193_v30 }
  0xf3   : > { %5232 = vmatpush3.bf16.msra.mxu1 %v5231_v44 }
  0xf4   : > { %5234 = vmatprep.subr.bf16.mxu1 %v5233_v23 }
  0xf5   : > { %5196 = vmatpush3.bf16.msra.mxu0 %v5195_v45 }
  0xf6   : > { %5198 = vmatprep.subr.bf16.mxu0 %v5197_v50 }
  0xf7   : > { %5236 = vmatpush3.bf16.msra.mxu1 %v5235_v59 }
  0xf8   : > { %5238 = vmatprep.subr.bf16.mxu1 %v5237_v61 }
  0xf9   : > { %5200 = vmatpush3.bf16.msra.mxu0 %v5199_v48 }
  0xfa   : > { %5202 = vmatprep.subr.bf16.mxu0 %v5201_v60 }
  0xfb   : > { %5240 = vmatpush3.bf16.msra.mxu1 %v5239_v9 }
  0xfd   : > { %5204 = vmatpush3.bf16.msra.mxu0 %v5203_v14  ;;  %v2393_v14 = vld [vmem:[%s8236_s4 + $0x88] sm:$0xff] }
  0xfe   : > { %5206 = vmatprep.subr.bf16.mxu0 %v5205_v15  ;;  %2289 = vmatmul.mubr.f32.vlgmr.msra.gmra.mrb[24].mxu1 %v2212_v18  ;;  %v5273_v15 = vpack.c.bf16 %v2393_v14, %v2392_v13  ;;  %v3810_v18 = vld [vmem:[%s8236_s4 + $0x180] sm:$0xff] }
  0xff   : > { %2293 = vmatprep.mubr.f32.mxu1 %v2219_v11  ;;  %v2395_v11 = vld [vmem:[%s8236_s4 + $0x98] sm:$0xff]  ;;  %v3818_v14 = vld [vmem:[%s8236_s4 + $0x1c0] sm:$0xff] }
 0x100   : > { %5274 = vmatprep.subr.bf16.mxu1 %v5273_v15  ;;  %v5277_v25 = vpack.c.bf16 %v2395_v11, %v2394_v52  ;;  %v3819_v15 = vld [vmem:[%s8236_s4 + $0x1c8] sm:$0xff] }
 0x101   : > { %5208 = vmatpush3.bf16.msra.mxu0 %v5207_v19  ;;  %5276 = vmatpush3.bf16.msra.mxu1 %v5275_v58  ;;  %v5241_v19 = vpack.c.bf16 %v3811_v7, %v3810_v18  ;;  %v2403_v58 = vld [vmem:[%s8236_s4 + $0xd8] sm:$0xff]  ;;  %v5257_v18 = vpack.c.bf16 %v3819_v15, %v3818_v14  ;;  %v3802_v7 = vld [vmem:[%s8236_s4 + $0x140] sm:$0xff] }
 0x102   : > { %2294 = vmatmul.mubr.f32.gmra.mrb[26].mxu1 %v2217_v29  ;;  %v3795_v29 = vld [vmem:[%s8236_s4 + $0x108] sm:$0xff]  ;;  %5278 = vmatprep.subr.bf16.mxu1 %v5277_v25  ;;  %v2387_v25 = vld [vmem:[%s8236_s4 + $0x58] sm:$0xff] }
 0x103   : > { %5242 = vmatprep.subr.bf16.mxu0 %v5241_v19  ;;  %v5243_v24 = vpack.c.bf16 %v3795_v29, %v3794_v21  ;;  %v5293_v19 = vpack.c.bf16 %v2403_v58, %v2402_v17  ;;  %v2386_v21 = vld [vmem:[%s8236_s4 + $0x50] sm:$0xff] }
 0x104   : > { %2157 = vmatmul.mubr.f32.vlgmr.msra.gmra.mrb[24].mxu0 %v2080_v54  ;;  %v5279_v54 = vpack.c.bf16 %v2379_v27, %v2378_v26  ;;  %v3803_v26 = vld [vmem:[%s8236_s4 + $0x148] sm:$0xff]  ;;  %v5295_v27 = vpack.c.bf16 %v2387_v25, %v2386_v21 }
 0x105   : > { %2161 = vmatprep.mubr.f32.mxu0 %v2087_v47  ;;  %v3812_v47 = vld [vmem:[%s8236_s4 + $0x190] sm:$0xff]  ;;  %5244 = vmatpush3.bf16.msra.mxu0 %v5243_v24  ;;  %v5259_v29 = vpack.c.bf16 %v3803_v26, %v3802_v7 }
 0x106   : > { %5280 = vmatpush3.bf16.msra.mxu1 %v5279_v54  ;;  %v3820_v24 = vld [vmem:[%s8236_s4 + $0x1d0] sm:$0xff] }
 0x108   : > { %2162 = vmatmul.mubr.f32.gmra.mrb[26].mxu0 %v2085_v63  ;;  %v3813_v63 = vld [vmem:[%s8236_s4 + $0x198] sm:$0xff] }
 0x111   : > { %v4065_v34 = vpop.f32.mrb[0].mxu1 }
 0x112   : > { %v4066_v20 = vpop.f32.mrb[1].mxu1 }
 0x113   : > { %v4067_v33 = vadd.f32 %v4066_v20, %v4065_v34  ;;  %v2396_v34 = vld [vmem:[%s8236_s4 + $0xa0] sm:$0xff]  ;;  %v2397_v20 = vld [vmem:[%s8236_s4 + $0xa8] sm:$0xff] }
 0x115   : > { %v4068_v35 = vpop.f32.mrb[2].mxu1  ;;  %v4027_v39 = vpop.f32.mrb[0].mxu0 }
 0x116   : > { %v4069_v37 = vpop.f32.mrb[3].mxu1  ;;  %v4028_v40 = vpop.f32.mrb[1].mxu0 }
 0x117   : > { %v4070_v28 = vadd.f32 %v4069_v37, %v4068_v35  ;;  %v4029_v22 = vadd.f32 %v4028_v40, %v4027_v39  ;;  %v3796_v35 = vld [vmem:[%s8236_s4 + $0x110] sm:$0xff]  ;;  %v5281_v37 = vpack.c.bf16 %v2397_v20, %v2396_v34  ;;  %v2380_v39 = vld [vmem:[%s8236_s4 + $0x20] sm:$0xff]  ;;  %v3797_v40 = vld [vmem:[%s8236_s4 + $0x118] sm:$0xff] }
 0x118   : > { %v2404_v34 = vld [vmem:[%s8236_s4 + $0xe0] sm:$0xff] }
 0x119   : > { %v760_v30 = vadd.f32 %v4067_v33, %v4029_v22  ;;  %v4030_v41 = vpop.f32.mrb[2].mxu0  ;;  %v5245_v33 = vpack.c.bf16 %v3813_v63, %v3812_v47  ;;  %5282 = vmatprep.subr.bf16.mxu1 %v5281_v37  ;;  %v3821_v47 = vld [vmem:[%s8236_s4 + $0x1d8] sm:$0xff] }
 0x11a   : > { %v4031_v55 = vpop.f32.mrb[3].mxu0  ;;  %v5261_v20 = vpack.c.bf16 %v3821_v47, %v3820_v24 }
 0x11b   : > { %v4032_v42 = vadd.f32 %v4031_v55, %v4030_v41  ;;  %5246 = vmatprep.subr.bf16.mxu0 %v5245_v33  ;;  %v3814_v41 = vld [vmem:[%s8236_s4 + $0x1a0] sm:$0xff]  ;;  %v3815_v55 = vld [vmem:[%s8236_s4 + $0x1a8] sm:$0xff]  ;;  %v3804_v33 = vld [vmem:[%s8236_s4 + $0x150] sm:$0xff] }
 0x11d   : > { %v765_v2 = vadd.f32 %v4070_v28, %v4032_v42  ;;  %v2381_v28 = vld [vmem:[%s8236_s4 + $0x28] sm:$0xff]  ;;  %v2398_v42 = vld [vmem:[%s8236_s4 + $0xb0] sm:$0xff] }
 0x11e   : > { %v5283_v22 = vpack.c.bf16 %v2381_v28, %v2380_v39  ;;  %v2388_v39 = vld [vmem:[%s8236_s4 + $0x60] sm:$0xff]  ;;  %v2389_v28 = vld [vmem:[%s8236_s4 + $0x68] sm:$0xff] }
 0x120   : > { %5284 = vmatpush3.bf16.msra.mxu1 %v5283_v22  ;;  %v5299_v22 = vpack.c.bf16 %v2389_v28, %v2388_v39  ;;  %v3793_v28 = vld [vmem:[%s8238_s6] ss:$0 sm:$0xff] }
 0x131   : > { %v4141_v32 = vpop.f32.mrb[4].mxu1 }
 0x132   : > { %v4142_v38 = vpop.f32.mrb[5].mxu1 }
 0x133   : > { %v4143_v44 = vadd.f32 %v4142_v38, %v4141_v32  ;;  %v5249_v32 = vpack.c.bf16 %v3815_v55, %v3814_v41  ;;  %v3798_v38 = vld [vmem:[%s8236_s4 + $0x120] sm:$0xff] }
 0x134   : > { %v3822_v55 = vld [vmem:[%s8236_s4 + $0x1e0] sm:$0xff] }
 0x135   : > { %v4144_v23 = vpop.f32.mrb[6].mxu1 }
 0x136   : > { %v4145_v4 = vpop.f32.mrb[7].mxu1 }
 0x137   : > { %v4103_v31 = vpop.f32.mrb[4].mxu0  ;;  %v4146_v45 = vadd.f32 %v4145_v4, %v4144_v23  ;;  %v2382_v4 = vld [vmem:[%s8236_s4 + $0x30] sm:$0xff] }
 0x138   : > { %v4104_v43 = vpop.f32.mrb[5].mxu0 }
 0x139   : > { %v4105_v49 = vadd.f32 %v4104_v43, %v4103_v31  ;;  %v2383_v31 = vld [vmem:[%s8236_s4 + $0x38] sm:$0xff] }
 0x13b   : > { %v969_v50 = vadd.f32 %v4143_v44, %v4105_v49  ;;  %v4106_v51 = vpop.f32.mrb[6].mxu0  ;;  %v5287_v49 = vpack.c.bf16 %v2383_v31, %v2382_v4  ;;  %v2391_v4 = vld [vmem:[%s8236_s4 + $0x78] sm:$0xff]  ;;  %v3807_v31 = vld [vmem:[%s8236_s4 + $0x168] sm:$0xff] }
 0x13c   : > { %v4107_v1 = vpop.f32.mrb[7].mxu0 }
 0x13d   : > { %v4108_v36 = vadd.f32 %v4107_v1, %v4106_v51  ;;  %v3816_v1 = vld [vmem:[%s8236_s4 + $0x1b0] sm:$0xff] }
 0x13f   : > { %v974_v57 = vadd.f32 %v4146_v45, %v4108_v36  ;;  %v3799_v45 = vld [vmem:[%s8236_s4 + $0x128] sm:$0xff]  ;;  %v3817_v36 = vld [vmem:[%s8236_s4 + $0x1b8] sm:$0xff] }
 0x151   : > { %v4217_v59 = vpop.f32.mrb[8].mxu1 }
 0x152   : > { %v4218_v61 = vpop.f32.mrb[9].mxu1 }
 0x153   : > { %v4219_v56 = vadd.f32 %v4218_v61, %v4217_v59  ;;  %v2401_v59 = vld [vmem:[%s8236_s4 + $0xc8] sm:$0xff]  ;;  %v5253_v61 = vpack.c.bf16 %v3817_v36, %v3816_v1 }
 0x154   : > { %v3875_v1 = vld [vmem:[%s8236_s4 + $0x388] sm:$0xff] }
 0x155   : > { %v7395_v62 = vadd.f32 %v4219_v56, %v969_v50  ;;  %v4220_v46 = vpop.f32.mrb[10].mxu1  ;;  %v5251_v50 = vpack.c.bf16 %v3799_v45, %v3798_v38  ;;  %v3800_v56 = vld [vmem:[%s8236_s4 + $0x130] sm:$0xff]  ;;  %v3806_v38 = vld [vmem:[%s8236_s4 + $0x160] sm:$0xff] }
 0x156   : > { %v4221_v48 = vpop.f32.mrb[11].mxu1 }
 0x157   : > { %v4179_v3 = vpop.f32.mrb[8].mxu0  ;;  %v4222_v60 = vadd.f32 %v4221_v48, %v4220_v46 }
 0x158   : > { %v4180_v5 = vpop.f32.mrb[9].mxu0 }
 0x159   : > { %v4181_v6 = vadd.f32 %v4180_v5, %v4179_v3  ;;  %v7397_v8 = vadd.f32 %v4222_v60, %v974_v57  ;;  %v2400_v57 = vld [vmem:[%s8236_s4 + $0xc0] sm:$0xff]  ;;  %v2385_v5 = vld [vmem:[%s8236_s4 + $0x48] sm:$0xff] }
 0x15a   : > { %v5289_v3 = vpack.c.bf16 %v2401_v59, %v2400_v57  ;;  %v2384_v60 = vld [vmem:[%s8236_s4 + $0x40] sm:$0xff]  ;;  %v3808_v57 = vld [vmem:[%s8236_s4 + $0x170] sm:$0xff] }
 0x15b   : > { %v7399_v53 = vadd.f32 %v4181_v6, %v760_v30  ;;  %v4182_v9 = vpop.f32.mrb[10].mxu0  ;;  %v5247_v30 = vpack.c.bf16 %v3797_v40, %v3796_v35  ;;  %v3801_v6 = vld [vmem:[%s8236_s4 + $0x138] sm:$0xff] }
 0x15c   : > { %v4183_v0 = vpop.f32.mrb[11].mxu0  ;;  %v3805_v40 = vld [vmem:[%s8236_s4 + $0x158] sm:$0xff] }
 0x15d   : > { %v4184_v10 = vadd.f32 %v4183_v0, %v4182_v9  ;;  %5248 = vmatpush3.bf16.msra.mxu0 %v5247_v30  ;;  %v5291_v0 = vpack.c.bf16 %v2385_v5, %v2384_v60  ;;  %v5263_v30 = vpack.c.bf16 %v3805_v40, %v3804_v33 }
 0x15e   : > { %5250 = vmatprep.subr.bf16.mxu0 %v5249_v32  ;;  %v2407_v32 = vld [vmem:[%s8236_s4 + $0xf8] sm:$0xff] }
 0x15f   : > { %v7401_v12 = vadd.f32 %v4184_v10, %v765_v2  ;;  %v2399_v2 = vld [vmem:[%s8236_s4 + $0xb8] sm:$0xff]  ;;  %v5255_v10 = vpack.c.bf16 %v3801_v6, %v3800_v56 }
 0x160   : > { %v5285_v23 = vpack.c.bf16 %v2399_v2, %v2398_v42  ;;  %v3823_v42 = vld [vmem:[%s8236_s4 + $0x1e8] sm:$0xff]  ;;  %v2406_v2 = vld [vmem:[%s8236_s4 + $0xf0] sm:$0xff] }
 0x161   : > { %5252 = vmatpush3.bf16.msra.mxu0 %v5251_v50  ;;  %v3825_v50 = vld [vmem:[%s8236_s4 + $0x1f8] sm:$0xff] }
 0x162   : > { %5286 = vmatprep.subr.bf16.mxu1 %v5285_v23  ;;  %5254 = vmatprep.subr.bf16.mxu0 %v5253_v61  ;;  %v2390_v23 = vld [vmem:[%s8236_s4 + $0x70] sm:$0xff]  ;;  %v3809_v61 = vld [vmem:[%s8236_s4 + $0x178] sm:$0xff] }
 0x163   : > { %5288 = vmatpush3.bf16.msra.mxu1 %v5287_v49  ;;  %v5303_v45 = vpack.c.bf16 %v2391_v4, %v2390_v23  ;;  %v3824_v49 = vld [vmem:[%s8236_s4 + $0x1f0] sm:$0xff]  ;;  %v5271_v56 = vpack.c.bf16 %v3809_v61, %v3808_v57 }
 0x164   : > { %5290 = vmatprep.subr.bf16.mxu1 %v5289_v3  ;;  %v5269_v36 = vpack.c.bf16 %v3825_v50, %v3824_v49  ;;  %v3843_v3 = vld [vmem:[%s8236_s4 + $0x288] sm:$0xff] }
 0x165   : > { %5256 = vmatpush3.bf16.msra.mxu0 %v5255_v10 }
 0x166   : > { %5258 = vmatprep.subr.bf16.mxu0 %v5257_v18 }
 0x167   : > { %5292 = vmatpush3.bf16.msra.mxu1 %v5291_v0 }
 0x168   : > { %5294 = vmatprep.subr.bf16.mxu1 %v5293_v19 }
 0x169   : > { %5260 = vmatpush3.bf16.msra.mxu0 %v5259_v29 }
 0x16a   : > { %5262 = vmatprep.subr.bf16.mxu0 %v5261_v20 }
 0x16b   : > { %5296 = vmatpush3.bf16.msra.mxu1 %v5295_v27 }
 0x16d   : > { %5264 = vmatpush3.bf16.msra.mxu0 %v5263_v30 }
 0x171   : > { %v4293_v44 = vpop.f32.mrb[12].mxu1 }
 0x172   : > { %v4294_v43 = vpop.f32.mrb[13].mxu1 }
 0x173   : > { %v4295_v51 = vadd.f32 %v4294_v43, %v4293_v44  ;;  %v5301_v44 = vpack.c.bf16 %v2407_v32, %v2406_v2  ;;  %v5267_v43 = vpack.c.bf16 %v3807_v31, %v3806_v38 }
 0x175   : > { %v7503_v46 = vadd.f32 %v4295_v51, %v7395_v62  ;;  %v4296_v48 = vpop.f32.mrb[14].mxu1  ;;  %v3874_v51 = vld [vmem:[%s8236_s4 + $0x380] sm:$0xff] }
 0x176   : > { %v4297_v9 = vpop.f32.mrb[15].mxu1  ;;  %v5337_v59 = vpack.c.bf16 %v3875_v1, %v3874_v51 }
 0x177   : > { %v4255_v62 = vpop.f32.mrb[12].mxu0  ;;  %v4298_v13 = vadd.f32 %v4297_v9, %v4296_v48  ;;  %v3842_v48 = vld [vmem:[%s8236_s4 + $0x280] sm:$0xff] }
 0x178   : > { %v4256_v16 = vpop.f32.mrb[13].mxu0  ;;  %v5305_v60 = vpack.c.bf16 %v3843_v3, %v3842_v48 }
 0x179   : > { %v4257_v52 = vadd.f32 %v4256_v16, %v4255_v62  ;;  %v7530_v11 = vadd.f32 %v4298_v13, %v7397_v8 }
 0x17b   : > { %v7542_v54 = vadd.f32 %v4257_v52, %v7399_v53  ;;  %v4258_v8 = vpop.f32.mrb[14].mxu0  ;;  %v2405_v53 = vld [vmem:[%s8236_s4 + $0xe8] sm:$0xff] }
 0x17c   : > { %v4259_v63 = vpop.f32.mrb[15].mxu0  ;;  %v5297_v37 = vpack.c.bf16 %v2405_v53, %v2404_v34 }
 0x17d   : > { %v4260_v35 = vadd.f32 %v4259_v63, %v4258_v8 }
 0x17e   : > { %5298 = vmatprep.subr.bf16.mxu1 %v5297_v37 }
 0x17f   : > { %v1374_v41 = vadd.f32 %v4260_v35, %v7401_v12  ;;  %5300 = vmatpush3.bf16.msra.mxu1 %v5299_v22  ;;  %v5265_v12 = vpack.c.bf16 %v3823_v42, %v3822_v55 }
 0x180   : > { %5302 = vmatprep.subr.bf16.mxu1 %v5301_v44  ;;  %v3791_v44 = vld [vmem:[%s8237_s5] ss:$0 sm:$0xff] }
 0x181   : > { %5266 = vmatprep.subr.bf16.mxu0 %v5265_v12 }
 0x182   : > { %5268 = vmatpush3.bf16.msra.mxu0 %v5267_v43 }
 0x183   : > { %5304 = vmatpush3.bf16.msra.mxu1 %v5303_v45  ;;  %5270 = vmatprep.subr.bf16.mxu0 %v5269_v36 }
 0x184   : > { %5338 = vmatprep.subr.bf16.mxu1 %v5337_v59 }
 0x186   : > { %5272 = vmatpush3.bf16.msra.mxu0 %v5271_v56 }
 0x187   : > { %5306 = vmatprep.subr.bf16.mxu0 %v5305_v60 }
 0x191   : > { %v4369_v5 = vpop.f32.mrb[16].mxu1 }
 0x192   : > { %v4370_v6 = vpop.f32.mrb[17].mxu1 }
 0x193   : > { %v4371_v9 = vadd.f32 %v4370_v6, %v4369_v5 }
 0x195   : > { %v1770_v0 = vadd.f32 %v4371_v9, %v7503_v46  ;;  %v4372_v10 = vpop.f32.mrb[18].mxu1 }
 0x196   : > { %v4373_v62 = vpop.f32.mrb[19].mxu1 }
 0x197   : > { %v4331_v13 = vpop.f32.mrb[16].mxu0  ;;  %v4374_v14 = vadd.f32 %v4373_v62, %v4372_v10  ;;  %v3792_v62 = vld [vmem:[%s8240_s8] ss:$0 sm:$0xff] }
 0x198   : > { %v4332_v15 = vpop.f32.mrb[17].mxu0 }
 0x199   : > { %v4333_v16 = vadd.f32 %v4332_v15, %v4331_v13  ;;  %v1771_v17 = vadd.f32 %v4374_v14, %v7530_v11 }
 0x19b   : > { %v1638_v58 = vadd.f32 %v4333_v16, %v7542_v54  ;;  %v4334_v18 = vpop.f32.mrb[18].mxu0 }
 0x19c   : > { %v4335_v7 = vpop.f32.mrb[19].mxu0 }
 0x19d   : > { %v4336_v52 = vadd.f32 %v4335_v7, %v4334_v18 }
 0x19f   : > { %v1639_v19 = vadd.f32 %v4336_v52, %v1374_v41 }
 0x1b1   : > { %v4445_v21 = vpop.f32.mrb[20].mxu1 }
 0x1b2   : > { %v4446_v25 = vpop.f32.mrb[21].mxu1 }
 0x1b3   : > { %v4447_v26 = vadd.f32 %v4446_v25, %v4445_v21 }
 0x1b5   : > { %v2034_v27 = vadd.f32 %v4447_v26, %v1770_v0  ;;  %v4448_v29 = vpop.f32.mrb[22].mxu1 }
 0x1b6   : > { %v4449_v46 = vpop.f32.mrb[23].mxu1 }
 0x1b7   : > { %v4407_v8 = vpop.f32.mrb[20].mxu0  ;;  %v4450_v24 = vadd.f32 %v4449_v46, %v4448_v29 }
 0x1b8   : > { %v4408_v47 = vpop.f32.mrb[21].mxu0 }
 0x1b9   : > { %v4409_v63 = vadd.f32 %v4408_v47, %v4407_v8  ;;  %v2035_v34 = vadd.f32 %v4450_v24, %v1771_v17  ;;  %v3858_v8 = vld [vmem:[%s8236_s4 + $0x300] sm:$0xff]  ;;  %v3859_v24 = vld [vmem:[%s8236_s4 + $0x308] sm:$0xff] }
 0x1bb   : > { %v1902_v53 = vadd.f32 %v4409_v63, %v1638_v58  ;;  %v4410_v20 = vpop.f32.mrb[22].mxu0 }
 0x1bc   : > { %v4411_v11 = vpop.f32.mrb[23].mxu0 }
 0x1bd   : > { %v4412_v33 = vadd.f32 %v4411_v11, %v4410_v20  ;;  %v3860_v11 = vld [vmem:[%s8236_s4 + $0x310] sm:$0xff] }
 0x1bf   : > { %v1903_v54 = vadd.f32 %v4412_v33, %v1639_v19 }
 0x1d1   : > { %v4521_v35 = vpop.f32.mrb[24].mxu1 }
 0x1d2   : > { %v4522_v37 = vpop.f32.mrb[25].mxu1 }
 0x1d3   : > { %v4523_v39 = vadd.f32 %v4522_v37, %v4521_v35  ;;  %v5339_v35 = vpack.c.bf16 %v3859_v24, %v3858_v8  ;;  %v3866_v8 = vld [vmem:[%s8236_s4 + $0x340] sm:$0xff] }
 0x1d5   : > { %v2299_v40 = vadd.f32 %v4523_v39, %v2034_v27  ;;  %v4524_v22 = vpop.f32.mrb[26].mxu1  ;;  %v3827_v39 = vld [vmem:[%s8236_s4 + $0x208] sm:$0xff] }
 0x1d6   : > { %v4525_v30 = vpop.f32.mrb[27].mxu1 }
 0x1d7   : > { %v4483_v41 = vpop.f32.mrb[24].mxu0  ;;  %v2336_v55 = vadd.f32 %v3793_v28, %v2299_v40  ;;  %v4526_v42 = vadd.f32 %v4525_v30, %v4524_v22  ;;  %v3861_v22 = vld [vmem:[%s8236_s4 + $0x318] sm:$0xff]  ;;  %v3878_v30 = vld [vmem:[%s8236_s4 + $0x3a0] sm:$0xff] }
 0x1d8   : > { %v4484_v2 = vpop.f32.mrb[25].mxu0 }
 0x1d9   : > { %v4485_v32 = vadd.f32 %v4484_v2, %v4483_v41  ;;  %v2338_v12 = vsub.f32 0.0, %v2336_v55  ;;  %v2300_v38 = vadd.f32 %v4526_v42, %v2035_v34  ;;  %v3876_v34 = vld [vmem:[%s8236_s4 + $0x390] sm:$0xff]  ;;  %v3879_v42 = vld [vmem:[%s8236_s4 + $0x3a8] sm:$0xff] }
 0x1da   : > { %v3844_v41 = vld [vmem:[%s8236_s4 + $0x290] sm:$0xff] }
 0x1db   : > { %v2167_v23 = vadd.f32 %v4485_v32, %v1902_v53  ;;  %v2340_v4 = vmul.f32 1.442695, %v2338_v12  ;;  %v4486_v31 = vpop.f32.mrb[26].mxu0  ;;  %v2337_v45 = vadd.f32 %v3793_v28, %v2300_v38  ;;  %v3877_v53 = vld [vmem:[%s8236_s4 + $0x398] sm:$0xff] }
 0x1dc   : > { %v4487_v43 = vpop.f32.mrb[27].mxu0  ;;  %v5341_v40 = vpack.c.bf16 %v3877_v53, %v3876_v34  ;;  %v3867_v53 = vld [vmem:[%s8236_s4 + $0x348] sm:$0xff] }
 0x1dd   : > { %v2309_v49 = vadd.f32 %v3791_v44, %v2167_v23  ;;  %5523 = vpow2.f32 %v2340_v4  ;;  %v4488_v50 = vadd.f32 %v4487_v43, %v4486_v31  ;;  %v2339_v51 = vsub.f32 0.0, %v2337_v45  ;;  %v3845_v4 = vld [vmem:[%s8236_s4 + $0x298] sm:$0xff]  ;;  %v3862_v43 = vld [vmem:[%s8236_s4 + $0x320] sm:$0xff] }
 0x1de   : > { %v5343_v45 = vpack.c.bf16 %v3861_v22, %v3860_v11  ;;  %v3850_v11 = vld [vmem:[%s8236_s4 + $0x2c0] sm:$0xff] }
 0x1df   : > { %v2311_v1 = vsub.f32 0.0, %v2309_v49  ;;  %v2168_v36 = vadd.f32 %v4488_v50, %v1903_v54  ;;  %v2342_v57 = vmul.f32 1.442695, %v2339_v51  ;;  %v3826_v54 = vld [vmem:[%s8236_s4 + $0x200] sm:$0xff]  ;;  %v3828_v49 = vld [vmem:[%s8236_s4 + $0x210] sm:$0xff]  ;;  %v3829_v50 = vld [vmem:[%s8236_s4 + $0x218] sm:$0xff]  ;;  %v5345_v51 = vpack.c.bf16 %v3879_v42, %v3878_v30 }
 0x1e0   : > { %v5307_v23 = vpack.c.bf16 %v3827_v39, %v3826_v54  ;;  %v3884_v54 = vld [vmem:[%s8236_s4 + $0x3d0] sm:$0xff]  ;;  %v5355_v39 = vpack.c.bf16 %v3867_v53, %v3866_v8  ;;  %v3834_v22 = vld [vmem:[%s8236_s4 + $0x240] sm:$0xff]  ;;  %v3835_v30 = vld [vmem:[%s8236_s4 + $0x248] sm:$0xff] }
 0x1e1   : > { %v2313_v59 = vmul.f32 1.442695, %v2311_v1  ;;  %v2310_v61 = vadd.f32 %v3791_v44, %v2168_v36  ;;  %5525 = vpow2.f32 %v2342_v57  ;;  %v3863_v57 = vld [vmem:[%s8236_s4 + $0x328] sm:$0xff]  ;;  %v3852_v42 = vld [vmem:[%s8236_s4 + $0x2d0] sm:$0xff]  ;;  %v3906_v8 = vld [vmem:[%s8236_s4 + $0x480] sm:$0xff] }
 0x1e3   : > { %5527 = vpow2.f32 %v2313_v59  ;;  %v2312_v56 = vsub.f32 0.0, %v2310_v61  ;;  %v3846_v59 = vld [vmem:[%s8236_s4 + $0x2a0] sm:$0xff]  ;;  %v3847_v61 = vld [vmem:[%s8236_s4 + $0x2a8] sm:$0xff] }
 0x1e5   : > { %v2315_v48 = vmul.f32 1.442695, %v2312_v56 }
 0x1e7   : > { %v5524_v3 = vpop.eup %5523  ;;  %5529 = vpow2.f32 %v2315_v48  ;;  %v5309_v48 = vpack.c.bf16 %v3845_v4, %v3844_v41 }
 0x1e8   : > { %v2344_v60 = vadd.f32 1.0, %v5524_v3  ;;  %v3880_v3 = vld [vmem:[%s8236_s4 + $0x3b0] sm:$0xff] }
 0x1ea   : > { %5531 = vrcp.f32 %v2344_v60  ;;  %v3881_v60 = vld [vmem:[%s8236_s4 + $0x3b8] sm:$0xff] }
 0x1eb   : > { %v5526_v5 = vpop.eup %5525 }
 0x1ec   : > { %v2345_v6 = vadd.f32 1.0, %v5526_v5 }
 0x1ed   : > { %v5528_v9 = vpop.eup %5527 }
 0x1ee   : > { %v2317_v0 = vadd.f32 1.0, %v5528_v9  ;;  %5533 = vrcp.f32 %v2345_v6 }
 0x1f0   : > { %5535 = vrcp.f32 %v2317_v0 }
 0x1f1   : > { %v5530_v10 = vpop.eup %5529 }
 0x1f2   : > { %v2318_v13 = vadd.f32 1.0, %v5530_v10  ;;  %v5311_v10 = vpack.c.bf16 %v3829_v50, %v3828_v49  ;;  %v3871_v49 = vld [vmem:[%s8236_s4 + $0x368] sm:$0xff]  ;;  %v3854_v50 = vld [vmem:[%s8236_s4 + $0x2e0] sm:$0xff] }
 0x1f4   : > { %v5532_v14 = vpop.eup %5531  ;;  %5537 = vrcp.f32 %v2318_v13  ;;  %v3864_v13 = vld [vmem:[%s8236_s4 + $0x330] sm:$0xff] }
 0x1f5   : > { %v2348_v15 = vmul.f32 %v5532_v14, %v3792_v62 }
 0x1f7   : > { %v2363_v16 = vrot.slane %v2348_v15, 5  ;;  %v5313_v15 = vpack.c.bf16 %v3847_v61, %v3846_v59 }
 0x1f8   : > { %v5534_v17 = vpop.eup %5533 }
 0x1f9   : > { %2369 = vst [vmem:[#allocation2 + $0x8] sm:$0xf8] %v2363_v16  ;;  %v2349_v58 = vmul.f32 %v5534_v17, %v3792_v62  ;;  %v3831_v17 = vld [vmem:[%s8236_s4 + $0x228] sm:$0xff] }
 0x1fa   : > { %v5536_v18 = vpop.eup %5535 }
 0x1fb   : > { %v2327_v7 = vmul.f32 %v5536_v18, %v3792_v62  ;;  %v2364_v52 = vrot.slane %v2349_v58, 5  ;;  %v5349_v58 = vpack.c.bf16 %v3881_v60, %v3880_v3  ;;  %v3838_v3 = vld [vmem:[%s8236_s4 + $0x260] sm:$0xff]  ;;  %v3839_v60 = vld [vmem:[%s8236_s4 + $0x268] sm:$0xff] }
 0x1fd   : > { %v2352_v19 = vrot.slane %v2327_v7, 5  ;;  %v7630_v21 = vsel %vm443_vm2, %v2363_v16, %v2364_v52  ;;  %2371 = vst [vmem:[#allocation2 + $0x48] sm:$0x7] %v2364_v52  ;;  %v3830_v16 = vld [vmem:[%s8236_s4 + $0x220] sm:$0xff]  ;;  %v3865_v7 = vld [vmem:[%s8236_s4 + $0x338] sm:$0xff]  ;;  %v3848_v52 = vld [vmem:[%s8236_s4 + $0x2b0] sm:$0xff] }
 0x1fe   : > { %v5538_v25 = vpop.eup %5537  ;;  %2370 = vst [vmem:[#allocation2 + $0x28] sm:$0xff] %v7630_v21  ;;  %v2455_v63 = vrot.slane %v7630_v21, 1  ;;  %v2792_v1 = vrot.slane %v7630_v21, 3  ;;  %v2660_v14 = vrot.slane %v7630_v21, 2 }
 0x1ff   : > { %2358 = vst [vmem:[#allocation2] sm:$0xf8] %v2352_v19  ;;  %v2328_v26 = vmul.f32 %v5538_v25, %v3792_v62  ;;  %v5347_v62 = vpack.c.bf16 %v3863_v57, %v3862_v43  ;;  %v3889_v57 = vld [vmem:[%s8236_s4 + $0x3f8] sm:$0xff] }
 0x200   : > { %v2373_v27 = vld [vmem:[#allocation2 + $0x8] sm:$0xff] }
 0x201   : > { %v2409_v29 = vld [vmem:[#allocation2 + $0x8] sm:$0xfe]  ;;  %v2353_v46 = vrot.slane %v2328_v26, 5  ;;  %2604 = vmatprep.mubr.f32.mxu1 %v2373_v27  ;;  %v3882_v26 = vld [vmem:[%s8236_s4 + $0x3c0] sm:$0xff] }
 0x202   : > { %v2454_v47 = vrot.slane %v2409_v29, 1  ;;  %v2748_v37 = vld [vmem:[#allocation2 + $0x8] sm:$0xf8]  ;;  %v5315_v29 = vpack.c.bf16 %v3831_v17, %v3830_v16  ;;  %v3840_v16 = vld [vmem:[%s8236_s4 + $0x270] sm:$0xff] }
 0x203   : > { %v7647_v20 = vsel %vm443_vm2, %v2352_v19, %v2353_v46  ;;  %2360 = vst [vmem:[#allocation2 + $0x40] sm:$0x7] %v2353_v46  ;;  %v2791_v12 = vrot.slane %v2748_v37, 3  ;;  %v2616_v31 = vld [vmem:[#allocation2 + $0x8] sm:$0xfc]  ;;  %v3849_v19 = vld [vmem:[%s8236_s4 + $0x2b8] sm:$0xff]  ;;  %v5351_v46 = vpack.c.bf16 %v3865_v7, %v3864_v13 }
 0x204   : > { %v2456_v33 = vsel %vm603_vm4, %v2454_v47, %v2455_v63  ;;  %2359 = vst [vmem:[#allocation2 + $0x20] sm:$0xff] %v7647_v20  ;;  %v2411_v28 = vld [vmem:[#allocation2 + $0x48] sm:$0x1]  ;;  %v2452_v44 = vrot.slane %v7647_v20, 1  ;;  %v2659_v6 = vrot.slane %v2616_v31, 2  ;;  %v5317_v24 = vpack.c.bf16 %v3849_v19, %v3848_v52  ;;  %v3832_v47 = vld [vmem:[%s8236_s4 + $0x230] sm:$0xff] }
 0x205   : > { %2529 = vmatprep.mubr.f32.mxu0 %v2456_v33  ;;  %v2459_v32 = vrot.slane %v2411_v28, 1  ;;  %v2793_v9 = vsel %vm1283_vm6, %v2791_v12, %v2792_v1  ;;  %v3883_v27 = vld [vmem:[%s8236_s4 + $0x3c8] sm:$0xff]  ;;  %v3868_v28 = vld [vmem:[%s8236_s4 + $0x350] sm:$0xff]  ;;  %v3841_v52 = vld [vmem:[%s8236_s4 + $0x278] sm:$0xff] }
 0x206   : > { %v2372_v55 = vld [vmem:[#allocation2] sm:$0xff]  ;;  %v2661_v25 = vsel %vm1018_vm5, %v2659_v6, %v2660_v14  ;;  %v5353_v34 = vpack.c.bf16 %v3883_v27, %v3882_v26  ;;  %v3851_v33 = vld [vmem:[%s8236_s4 + $0x2c8] sm:$0xff]  ;;  %v3836_v31 = vld [vmem:[%s8236_s4 + $0x250] sm:$0xff] }
 0x207   : > { %v2408_v2 = vld [vmem:[#allocation2] sm:$0xfe]  ;;  %2605 = vmatmul.mubr.f32.vlgmr.msra.gmra.mrb[28].mxu1 %v2372_v55  ;;  %v2460_v56 = vsel %vm603_vm4, %v2455_v63, %v2459_v32  ;;  %v3833_v63 = vld [vmem:[%s8236_s4 + $0x238] sm:$0xff]  ;;  %v3887_v12 = vld [vmem:[%s8236_s4 + $0x3e8] sm:$0xff] }
 0x208   : > { %v2451_v38 = vrot.slane %v2408_v2, 1  ;;  %5340 = vmatpush3.bf16.msra.mxu1 %v5339_v35  ;;  %2609 = vmatprep.mubr.f32.mxu1 %v7630_v21  ;;  %v3885_v35 = vld [vmem:[%s8236_s4 + $0x3d8] sm:$0xff]  ;;  %v5319_v37 = vpack.c.bf16 %v3833_v63, %v3832_v47  ;;  %v3886_v32 = vld [vmem:[%s8236_s4 + $0x3e0] sm:$0xff]  ;;  %v3940_v26 = vld [vmem:[%s8236_s4 + $0x590] sm:$0xff] }
 0x209   : > { %5342 = vmatprep.subr.bf16.mxu1 %v5341_v40  ;;  %v5321_v40 = vpack.c.bf16 %v3851_v33, %v3850_v11  ;;  %v5357_v41 = vpack.c.bf16 %v3885_v35, %v3884_v54  ;;  %v3869_v55 = vld [vmem:[%s8236_s4 + $0x358] sm:$0xff]  ;;  %v5361_v43 = vpack.c.bf16 %v3887_v12, %v3886_v32  ;;  %v2747_v13 = vld [vmem:[#allocation2] sm:$0xf8]  ;;  %v2618_v53 = vld [vmem:[#allocation2 + $0x48] sm:$0x3]  ;;  %v2789_v11 = vrot.slane %v7647_v20, 3 }
 0x20a   : > { %v2453_v36 = vsel %vm603_vm4, %v2451_v38, %v2452_v44  ;;  %v2410_v5 = vld [vmem:[#allocation2 + $0x40] sm:$0x1]  ;;  %v3853_v2 = vld [vmem:[%s8236_s4 + $0x2d8] sm:$0xff]  ;;  %v5323_v38 = vpack.c.bf16 %v3835_v30, %v3834_v22  ;;  %v3924_v54 = vld [vmem:[%s8236_s4 + $0x510] sm:$0xff]  ;;  %v2664_v32 = vrot.slane %v2618_v53, 2 }
 0x20b   : > { %2530 = vmatmul.mubr.f32.vlgmr.msra.gmra.mrb[28].mxu0 %v2453_v36  ;;  %2610 = vmatmul.mubr.f32.gmra.mrb[30].mxu1 %v7647_v20  ;;  %v2457_v0 = vrot.slane %v2410_v5, 1  ;;  %v5325_v4 = vpack.c.bf16 %v3853_v2, %v3852_v42  ;;  %v3888_v36 = vld [vmem:[%s8236_s4 + $0x3f0] sm:$0xff]  ;;  %v3873_v6 = vld [vmem:[%s8236_s4 + $0x378] sm:$0xff]  ;;  %v2749_v63 = vld [vmem:[#allocation2 + $0x40] sm:$0x7] }
 0x20c   : > { %5308 = vmatpush3.bf16.msra.mxu0 %v5307_v23  ;;  %5344 = vmatpush3.bf16.msra.mxu1 %v5343_v45  ;;  %v3870_v23 = vld [vmem:[%s8236_s4 + $0x360] sm:$0xff]  ;;  %v3837_v45 = vld [vmem:[%s8236_s4 + $0x258] sm:$0xff]  ;;  %v5365_v5 = vpack.c.bf16 %v3889_v57, %v3888_v36  ;;  %v3012_v35 = vld [vmem:[#allocation2 + $0x8] sm:$0xe0] }
 0x20d   : > { %2866 = vmatprep.mubr.f32.mxu1 %v2793_v9  ;;  %5346 = vmatprep.subr.bf16.mxu1 %v5345_v51  ;;  %v2458_v18 = vsel %vm603_vm4, %v2452_v44, %v2457_v0  ;;  %v5359_v44 = vpack.c.bf16 %v3869_v55, %v3868_v28  ;;  %v3855_v51 = vld [vmem:[%s8236_s4 + $0x2e8] sm:$0xff]  ;;  %v5327_v59 = vpack.c.bf16 %v3837_v45, %v3836_v31  ;;  %v3856_v9 = vld [vmem:[%s8236_s4 + $0x2f0] sm:$0xff]  ;;  %v3857_v0 = vld [vmem:[%s8236_s4 + $0x2f8] sm:$0xff]  ;;  %v2794_v55 = vrot.slane %v2749_v63, 3 }
 0x20e   : > { %2534 = vmatprep.mubr.f32.mxu0 %v2460_v56  ;;  %5310 = vmatprep.subr.bf16.mxu0 %v5309_v48  ;;  %v5363_v61 = vpack.c.bf16 %v3871_v49, %v3870_v23  ;;  %v3872_v56 = vld [vmem:[%s8236_s4 + $0x370] sm:$0xff]  ;;  %v5329_v48 = vpack.c.bf16 %v3855_v51, %v3854_v50  ;;  %v5333_v7 = vpack.c.bf16 %v3857_v0, %v3856_v9  ;;  %v3941_v27 = vld [vmem:[%s8236_s4 + $0x598] sm:$0xff]  ;;  %v3890_v22 = vld [vmem:[%s8236_s4 + $0x400] sm:$0xff]  ;;  %v2657_v23 = vrot.slane %v7647_v20, 2 }
 0x20f   : > { %2535 = vmatmul.mubr.f32.gmra.mrb[30].mxu0 %v2458_v18  ;;  %v5367_v17 = vpack.c.bf16 %v3873_v6, %v3872_v56  ;;  %v3922_v18 = vld [vmem:[%s8236_s4 + $0x500] sm:$0xff]  ;;  %v3891_v30 = vld [vmem:[%s8236_s4 + $0x408] sm:$0xff]  ;;  %v3909_v31 = vld [vmem:[%s8236_s4 + $0x498] sm:$0xff]  ;;  %v2795_v56 = vsel %vm1283_vm6, %v2789_v11, %v2794_v55 }
 0x210   : > { %5312 = vmatpush3.bf16.msra.mxu0 %v5311_v10  ;;  %2734 = vmatprep.mubr.f32.mxu0 %v2661_v25  ;;  %v3938_v10 = vld [vmem:[%s8236_s4 + $0x580] sm:$0xff]  ;;  %v3923_v25 = vld [vmem:[%s8236_s4 + $0x508] sm:$0xff]  ;;  %v5371_v49 = vpack.c.bf16 %v3891_v30, %v3890_v22  ;;  %v3893_v6 = vld [vmem:[%s8236_s4 + $0x418] sm:$0xff] }
 0x211   : > { %5348 = vmatpush3.bf16.msra.mxu1 %v5347_v62  ;;  %5314 = vmatprep.subr.bf16.mxu0 %v5313_v15  ;;  %v3939_v62 = vld [vmem:[%s8236_s4 + $0x588] sm:$0xff]  ;;  %v5331_v15 = vpack.c.bf16 %v3839_v60, %v3838_v3  ;;  %v5403_v33 = vpack.c.bf16 %v3923_v25, %v3922_v18  ;;  %v3942_v42 = vld [vmem:[%s8236_s4 + $0x5a0] sm:$0xff]  ;;  %v3944_v60 = vld [vmem:[%s8236_s4 + $0x5b0] sm:$0xff] }
 0x212   : > { %5350 = vmatprep.subr.bf16.mxu1 %v5349_v58  ;;  %v2750_v58 = vld [vmem:[#allocation2 + $0x48] sm:$0x7]  ;;  %v5401_v19 = vpack.c.bf16 %v3939_v62, %v3938_v10  ;;  %v2617_v12 = vld [vmem:[#allocation2 + $0x40] sm:$0x3]  ;;  %v2880_v45 = vld [vmem:[#allocation2 + $0x8] sm:$0xf0] }
 0x213   : > { %v2796_v47 = vrot.slane %v2750_v58, 3  ;;  %v3943_v2 = vld [vmem:[%s8236_s4 + $0x5a8] sm:$0xff]  ;;  %v3926_v36 = vld [vmem:[%s8236_s4 + $0x520] sm:$0xff]  ;;  %v2923_v9 = vrot.slane %v2880_v45, 4  ;;  %v3928_v58 = vld [vmem:[%s8236_s4 + $0x530] sm:$0xff] }
 0x214   : > { %5316 = vmatpush3.bf16.msra.mxu0 %v5315_v29  ;;  %v2788_v29 = vrot.slane %v2747_v13, 3  ;;  %v5409_v51 = vpack.c.bf16 %v3943_v2, %v3942_v42  ;;  %v3927_v57 = vld [vmem:[%s8236_s4 + $0x528] sm:$0xff]  ;;  %v2924_v13 = vrot.slane %v7630_v21, 4  ;;  %v3929_v18 = vld [vmem:[%s8236_s4 + $0x538] sm:$0xff]  ;;  %v3946_v25 = vld [vmem:[%s8236_s4 + $0x5c0] sm:$0xff] }
 0x215   : > { %5352 = vmatpush3.bf16.msra.mxu1 %v5351_v46  ;;  %5318 = vmatprep.subr.bf16.mxu0 %v5317_v24  ;;  %v2615_v46 = vld [vmem:[#allocation2] sm:$0xfc]  ;;  %v3907_v24 = vld [vmem:[%s8236_s4 + $0x488] sm:$0xff]  ;;  %v5411_v62 = vpack.c.bf16 %v3927_v57, %v3926_v36  ;;  %v3896_v53 = vld [vmem:[%s8236_s4 + $0x430] sm:$0xff] }
 0x216   : > { %5354 = vmatprep.subr.bf16.mxu1 %v5353_v34  ;;  %v5335_v34 = vpack.c.bf16 %v3841_v52, %v3840_v16  ;;  %v2656_v28 = vrot.slane %v2615_v46, 2  ;;  %v3911_v10 = vld [vmem:[%s8236_s4 + $0x4a8] sm:$0xff]  ;;  %v2925_v52 = vsel %vm1548_vm7, %v2923_v9, %v2924_v13  ;;  %v3913_v46 = vld [vmem:[%s8236_s4 + $0x4b8] sm:$0xff]  ;;  %v3930_v63 = vld [vmem:[%s8236_s4 + $0x540] sm:$0xff] }
 0x217   : > { %v3932_v30 = vld [vmem:[%s8236_s4 + $0x550] sm:$0xff]  ;;  %v3898_v55 = vld [vmem:[%s8236_s4 + $0x440] sm:$0xff]  ;;  %v3953_v36 = vld [vmem:[%s8236_s4 + $0x5f8] sm:$0xff] }
 0x218   : > { %5320 = vmatpush3.bf16.msra.mxu0 %v5319_v37  ;;  %v5405_v37 = vpack.c.bf16 %v3941_v27, %v3940_v26  ;;  %v2658_v50 = vsel %vm1018_vm5, %v2656_v28, %v2657_v23  ;;  %v3947_v26 = vld [vmem:[%s8236_s4 + $0x5c8] sm:$0xff]  ;;  %v3950_v2 = vld [vmem:[%s8236_s4 + $0x5e0] sm:$0xff]  ;;  %v3901_v57 = vld [vmem:[%s8236_s4 + $0x458] sm:$0xff] }
 0x219   : > { %5356 = vmatpush3.bf16.msra.mxu1 %v5355_v39  ;;  %5322 = vmatprep.subr.bf16.mxu0 %v5321_v40  ;;  %v3925_v39 = vld [vmem:[%s8236_s4 + $0x518] sm:$0xff]  ;;  %v5369_v40 = vpack.c.bf16 %v3907_v24, %v3906_v8  ;;  %v3895_v27 = vld [vmem:[%s8236_s4 + $0x428] sm:$0xff]  ;;  %v5415_v8 = vpack.c.bf16 %v3929_v18, %v3928_v58  ;;  %v5417_v24 = vpack.c.bf16 %v3947_v26, %v3946_v25  ;;  %v3934_v45 = vld [vmem:[%s8236_s4 + $0x560] sm:$0xff] }
 0x21a   : > { %5358 = vmatprep.subr.bf16.mxu1 %v5357_v41  ;;  %v2790_v41 = vsel %vm1283_vm6, %v2788_v29, %v2789_v11  ;;  %v3912_v29 = vld [vmem:[%s8236_s4 + $0x4b0] sm:$0xff]  ;;  %v3014_v58 = vld [vmem:[#allocation2 + $0x48] sm:$0x1f] }
 0x21b   : > { %v5381_v11 = vpack.c.bf16 %v3913_v46, %v3912_v29  ;;  %v3904_v25 = vld [vmem:[%s8236_s4 + $0x470] sm:$0xff]  ;;  %v3973_v46 = vld [vmem:[%s8236_s4 + $0x698] sm:$0xff] }
 0x21c   : > { %5324 = vmatpush3.bf16.msra.mxu0 %v5323_v38  ;;  %v2797_v38 = vsel %vm1283_vm6, %v2792_v1, %v2796_v47  ;;  %v3056_v1 = vrot.slane %v7630_v21, 5  ;;  %v3972_v29 = vld [vmem:[%s8236_s4 + $0x690] sm:$0xff] }
 0x21d   : > { %5360 = vmatpush3.bf16.msra.mxu1 %v5359_v44  ;;  %5326 = vmatprep.subr.bf16.mxu0 %v5325_v4  ;;  %v3055_v44 = vrot.slane %v3012_v35, 5  ;;  %v3908_v4 = vld [vmem:[%s8236_s4 + $0x490] sm:$0xff]  ;;  %v3897_v35 = vld [vmem:[%s8236_s4 + $0x438] sm:$0xff] }
 0x21e   : > { %5362 = vmatprep.subr.bf16.mxu1 %v5361_v43  ;;  %v5407_v43 = vpack.c.bf16 %v3925_v39, %v3924_v54  ;;  %v5373_v3 = vpack.c.bf16 %v3909_v31, %v3908_v4  ;;  %v3949_v54 = vld [vmem:[%s8236_s4 + $0x5d8] sm:$0xff]  ;;  %v3915_v39 = vld [vmem:[%s8236_s4 + $0x4c8] sm:$0xff]  ;;  %v5383_v22 = vpack.c.bf16 %v3897_v35, %v3896_v53 }
 0x21f   : > { %v3057_v0 = vsel %vm443_vm2, %v3055_v44, %v3056_v1  ;;  %v3917_v44 = vld [vmem:[%s8236_s4 + $0x4d8] sm:$0xff]  ;;  %v3146_v53 = vld [vmem:[#allocation2 + $0x48] sm:$0x3f] }
 0x220   : > { %5328 = vmatpush3.bf16.msra.mxu0 %v5327_v59  ;;  %v2662_v59 = vrot.slane %v2617_v12, 2  ;;  %v3899_v12 = vld [vmem:[%s8236_s4 + $0x448] sm:$0xff]  ;;  %v3957_v35 = vld [vmem:[%s8236_s4 + $0x618] sm:$0xff] }
 0x221   : > { %5364 = vmatpush3.bf16.msra.mxu1 %v5363_v61  ;;  %5330 = vmatprep.subr.bf16.mxu0 %v5329_v48  ;;  %v3892_v61 = vld [vmem:[%s8236_s4 + $0x410] sm:$0xff]  ;;  %v2665_v48 = vsel %vm1018_vm5, %v2660_v14, %v2664_v32  ;;  %v3910_v14 = vld [vmem:[%s8236_s4 + $0x4a0] sm:$0xff]  ;;  %v3951_v32 = vld [vmem:[%s8236_s4 + $0x5e8] sm:$0xff]  ;;  %v5387_v31 = vpack.c.bf16 %v3899_v12, %v3898_v55  ;;  %v3192_v55 = vrot.slane %v3146_v53, 6 }
 0x222   : > { %5366 = vmatprep.subr.bf16.mxu1 %v5365_v5  ;;  %v3945_v5 = vld [vmem:[%s8236_s4 + $0x5b8] sm:$0xff]  ;;  %v5425_v4 = vpack.c.bf16 %v3951_v32, %v3950_v2  ;;  %v3188_v32 = vrot.slane %v7630_v21, 6  ;;  %v3979_v21 = vld [vmem:[%s8236_s4 + $0x6c8] sm:$0xff] }
 0x223   : > { %v5413_v16 = vpack.c.bf16 %v3945_v5, %v3944_v60  ;;  %v3936_v60 = vld [vmem:[%s8236_s4 + $0x570] sm:$0xff]  ;;  %v3937_v5 = vld [vmem:[%s8236_s4 + $0x578] sm:$0xff] }
 0x224   : > { %5332 = vmatpush3.bf16.msra.mxu0 %v5331_v15  ;;  %v2663_v15 = vsel %vm1018_vm5, %v2657_v23, %v2662_v59  ;;  %v3918_v59 = vld [vmem:[%s8236_s4 + $0x4e0] sm:$0xff] }
 0x225   : > { %5368 = vmatpush3.bf16.msra.mxu1 %v5367_v17  ;;  %5334 = vmatprep.subr.bf16.mxu0 %v5333_v7  ;;  %v5375_v17 = vpack.c.bf16 %v3893_v6, %v3892_v61  ;;  %v3894_v7 = vld [vmem:[%s8236_s4 + $0x420] sm:$0xff]  ;;  %v3919_v61 = vld [vmem:[%s8236_s4 + $0x4e8] sm:$0xff] }
 0x226   : > { %5402 = vmatprep.subr.bf16.mxu1 %v5401_v19  ;;  %v5377_v19 = vpack.c.bf16 %v3911_v10, %v3910_v14  ;;  %v5379_v47 = vpack.c.bf16 %v3895_v27, %v3894_v7  ;;  %v3902_v6 = vld [vmem:[%s8236_s4 + $0x460] sm:$0xff]  ;;  %v5393_v9 = vpack.c.bf16 %v3919_v61, %v3918_v59  ;;  %v3971_v14 = vld [vmem:[%s8236_s4 + $0x688] sm:$0xff] }
 0x227   : > { %v3903_v10 = vld [vmem:[%s8236_s4 + $0x468] sm:$0xff] }
 0x228   : > { %2867 = vmatmul.mubr.f32.vlgmr.msra.gmra.mrb[32].mxu1 %v2790_v41  ;;  %5336 = vmatpush3.bf16.msra.mxu0 %v5335_v34  ;;  %v3931_v34 = vld [vmem:[%s8236_s4 + $0x548] sm:$0xff]  ;;  %v3933_v41 = vld [vmem:[%s8236_s4 + $0x558] sm:$0xff]  ;;  %v5395_v7 = vpack.c.bf16 %v3903_v10, %v3902_v6  ;;  %v3980_v10 = vld [vmem:[%s8236_s4 + $0x6d0] sm:$0xff] }
 0x229   : > { %2871 = vmatprep.mubr.f32.mxu1 %v2797_v38  ;;  %5404 = vmatpush3.bf16.msra.mxu1 %v5403_v33  ;;  %v3948_v33 = vld [vmem:[%s8236_s4 + $0x5d0] sm:$0xff]  ;;  %v5419_v28 = vpack.c.bf16 %v3931_v34, %v3930_v63  ;;  %v5423_v23 = vpack.c.bf16 %v3933_v41, %v3932_v30  ;;  %v3053_v63 = vrot.slane %v7647_v20, 5  ;;  %v2882_v30 = vld [vmem:[#allocation2 + $0x48] sm:$0xf] }
 0x22a   : > { %5406 = vmatprep.subr.bf16.mxu1 %v5405_v37  ;;  %5370 = vmatprep.subr.bf16.mxu0 %v5369_v40  ;;  %v3914_v37 = vld [vmem:[%s8236_s4 + $0x4c0] sm:$0xff]  ;;  %v5421_v40 = vpack.c.bf16 %v3949_v54, %v3948_v33  ;;  %v3916_v38 = vld [vmem:[%s8236_s4 + $0x4d0] sm:$0xff] }
 0x22b   : > { %2735 = vmatmul.mubr.f32.vlgmr.msra.gmra.mrb[32].mxu0 %v2658_v50  ;;  %v5385_v42 = vpack.c.bf16 %v3915_v39, %v3914_v37  ;;  %v5389_v50 = vpack.c.bf16 %v3917_v44, %v3916_v38  ;;  %v3956_v54 = vld [vmem:[%s8236_s4 + $0x610] sm:$0xff]  ;;  %v2879_v37 = vld [vmem:[#allocation2] sm:$0xf0]  ;;  %v2928_v38 = vrot.slane %v2882_v30, 4 }
 0x22c   : > { %2872 = vmatmul.mubr.f32.gmra.mrb[34].mxu1 %v2795_v56  ;;  %2739 = vmatprep.mubr.f32.mxu0 %v2665_v48  ;;  %v2920_v2 = vrot.slane %v2879_v37, 4  ;;  %v3958_v44 = vld [vmem:[%s8236_s4 + $0x620] sm:$0xff] }
 0x22d   : > { %5408 = vmatpush3.bf16.msra.mxu1 %v5407_v43  ;;  %3130 = vmatprep.mubr.f32.mxu1 %v3057_v0  ;;  %v3935_v43 = vld [vmem:[%s8236_s4 + $0x568] sm:$0xff]  ;;  %v3970_v0 = vld [vmem:[%s8236_s4 + $0x680] sm:$0xff]  ;;  %v2929_v59 = vsel %vm1548_vm7, %v2924_v13, %v2928_v38 }
 0x22e   : > { %5410 = vmatprep.subr.bf16.mxu1 %v5409_v51  ;;  %5372 = vmatpush3.bf16.msra.mxu0 %v5371_v49  ;;  %v3900_v49 = vld [vmem:[%s8236_s4 + $0x450] sm:$0xff]  ;;  %v5427_v56 = vpack.c.bf16 %v3935_v43, %v3934_v45  ;;  %v5433_v18 = vpack.c.bf16 %v3971_v14, %v3970_v0  ;;  %v3977_v43 = vld [vmem:[%s8236_s4 + $0x6b8] sm:$0xff]  ;;  %v3962_v0 = vld [vmem:[%s8236_s4 + $0x640] sm:$0xff] }
 0x22f   : > { %2740 = vmatmul.mubr.f32.gmra.mrb[34].mxu0 %v2663_v15  ;;  %5374 = vmatprep.subr.bf16.mxu0 %v5373_v3  ;;  %v3952_v51 = vld [vmem:[%s8236_s4 + $0x5f0] sm:$0xff]  ;;  %v5391_v3 = vpack.c.bf16 %v3901_v57, %v3900_v49  ;;  %v3144_v49 = vld [vmem:[#allocation2 + $0x8] sm:$0xc0] }
 0x230   : > { %2998 = vmatprep.mubr.f32.mxu0 %v2925_v52  ;;  %v5429_v48 = vpack.c.bf16 %v3953_v36, %v3952_v51  ;;  %v3920_v15 = vld [vmem:[%s8236_s4 + $0x4f0] sm:$0xff]  ;;  %v3954_v52 = vld [vmem:[%s8236_s4 + $0x600] sm:$0xff]  ;;  %v3963_v14 = vld [vmem:[%s8236_s4 + $0x648] sm:$0xff] }
 0x231   : > { %5412 = vmatpush3.bf16.msra.mxu1 %v5411_v62  ;;  %v3011_v62 = vld [vmem:[#allocation2] sm:$0xe0]  ;;  %v3976_v45 = vld [vmem:[%s8236_s4 + $0x6b0] sm:$0xff] }
 0x232   : > { %5414 = vmatprep.subr.bf16.mxu1 %v5413_v16  ;;  %5376 = vmatpush3.bf16.msra.mxu0 %v5375_v17  ;;  %v3921_v16 = vld [vmem:[%s8236_s4 + $0x4f8] sm:$0xff]  ;;  %v5431_v17 = vpack.c.bf16 %v3937_v5, %v3936_v60  ;;  %v3052_v26 = vrot.slane %v3011_v62, 5  ;;  %v5445_v61 = vpack.c.bf16 %v3977_v43, %v3976_v45  ;;  %v3978_v60 = vld [vmem:[%s8236_s4 + $0x6c0] sm:$0xff] }
 0x233   : > { %5378 = vmatprep.subr.bf16.mxu0 %v5377_v19  ;;  %v3955_v19 = vld [vmem:[%s8236_s4 + $0x608] sm:$0xff]  ;;  %v5397_v27 = vpack.c.bf16 %v3921_v16, %v3920_v15  ;;  %v3981_v62 = vld [vmem:[%s8236_s4 + $0x6d8] sm:$0xff]  ;;  %v5451_v15 = vpack.c.bf16 %v3963_v14, %v3962_v0 }
 0x234   : > { %v5435_v34 = vpack.c.bf16 %v3955_v19, %v3954_v52  ;;  %v3054_v39 = vsel %vm443_vm2, %v3052_v26, %v3053_v63  ;;  %v5453_v16 = vpack.c.bf16 %v3981_v62, %v3980_v10  ;;  %v3967_v26 = vld [vmem:[%s8236_s4 + $0x668] sm:$0xff] }
 0x235   : > { %5416 = vmatpush3.bf16.msra.mxu1 %v5415_v8  ;;  %v3905_v8 = vld [vmem:[%s8236_s4 + $0x478] sm:$0xff] }
 0x236   : > { %5418 = vmatprep.subr.bf16.mxu1 %v5417_v24  ;;  %5380 = vmatpush3.bf16.msra.mxu0 %v5379_v47  ;;  %v3060_v24 = vrot.slane %v3014_v58, 5  ;;  %v3013_v47 = vld [vmem:[#allocation2 + $0x40] sm:$0x1f]  ;;  %v5399_v33 = vpack.c.bf16 %v3905_v8, %v3904_v25  ;;  %v3965_v58 = vld [vmem:[%s8236_s4 + $0x658] sm:$0xff] }
 0x237   : > { %5382 = vmatprep.subr.bf16.mxu0 %v5381_v11  ;;  %v5437_v11 = vpack.c.bf16 %v3973_v46, %v3972_v29  ;;  %v3966_v25 = vld [vmem:[%s8236_s4 + $0x660] sm:$0xff]  ;;  %v3985_v29 = vld [vmem:[%s8236_s4 + $0x6f8] sm:$0xff] }
 0x238   : > { %v3061_v41 = vsel %vm443_vm2, %v3056_v1, %v3060_v24  ;;  %v2881_v1 = vld [vmem:[#allocation2 + $0x40] sm:$0xf]  ;;  %v5459_v46 = vpack.c.bf16 %v3967_v26, %v3966_v25  ;;  %v3968_v24 = vld [vmem:[%s8236_s4 + $0x670] sm:$0xff] }
 0x239   : > { %5420 = vmatpush3.bf16.msra.mxu1 %v5419_v28  ;;  %v3058_v28 = vrot.slane %v3013_v47, 5  ;;  %v2926_v57 = vrot.slane %v2881_v1, 4  ;;  %v3969_v47 = vld [vmem:[%s8236_s4 + $0x678] sm:$0xff]  ;;  %v3986_v26 = vld [vmem:[%s8239_s7] ss:$0 sm:$0xff] }
 0x23a   : > { %5422 = vmatprep.subr.bf16.mxu1 %v5421_v40  ;;  %5384 = vmatpush3.bf16.msra.mxu0 %v5383_v22  ;;  %v3974_v40 = vld [vmem:[%s8236_s4 + $0x6a0] sm:$0xff]  ;;  %v3975_v22 = vld [vmem:[%s8236_s4 + $0x6a8] sm:$0xff] }
 0x23b   : > { %5386 = vmatprep.subr.bf16.mxu0 %v5385_v42  ;;  %v5439_v42 = vpack.c.bf16 %v3957_v35, %v3956_v54  ;;  %v5441_v12 = vpack.c.bf16 %v3975_v22, %v3974_v40 }
 0x23d   : > { %5424 = vmatpush3.bf16.msra.mxu1 %v5423_v23  ;;  %v3959_v23 = vld [vmem:[%s8236_s4 + $0x628] sm:$0xff] }
 0x23e   : > { %5426 = vmatprep.subr.bf16.mxu1 %v5425_v4  ;;  %5388 = vmatpush3.bf16.msra.mxu0 %v5387_v31  ;;  %v3059_v4 = vsel %vm443_vm2, %v3053_v63, %v3058_v28  ;;  %v2921_v31 = vrot.slane %v7647_v20, 4  ;;  %v5443_v36 = vpack.c.bf16 %v3959_v23, %v3958_v44  ;;  %v3145_v63 = vld [vmem:[#allocation2 + $0x40] sm:$0x3f] }
 0x23f   : > { %5390 = vmatprep.subr.bf16.mxu0 %v5389_v50  ;;  %v3193_v50 = vsel %vm2077_vm8, %v3188_v32, %v3192_v55  ;;  %v3190_v53 = vrot.slane %v3145_v63, 6 }
 0x240   : > { %v2922_v51 = vsel %vm1548_vm7, %v2920_v2, %v2921_v31  ;;  %v2927_v13 = vsel %vm1548_vm7, %v2921_v31, %v2926_v57 }
 0x241   : > { %5428 = vmatpush3.bf16.msra.mxu1 %v5427_v56  ;;  %v3960_v56 = vld [vmem:[%s8236_s4 + $0x630] sm:$0xff] }
 0x242   : > { %5430 = vmatprep.subr.bf16.mxu1 %v5429_v48  ;;  %5392 = vmatpush3.bf16.msra.mxu0 %v5391_v3  ;;  %v3961_v48 = vld [vmem:[%s8236_s4 + $0x638] sm:$0xff]  ;;  %v3187_v3 = vrot.slane %v3144_v49, 6 }
 0x243   : > { %5394 = vmatprep.subr.bf16.mxu0 %v5393_v9  ;;  %v5447_v5 = vpack.c.bf16 %v3961_v48, %v3960_v56  ;;  %v5449_v9 = vpack.c.bf16 %v3979_v21, %v3978_v60 }
 0x244   : > { %v3189_v6 = vsel %vm2077_vm8, %v3187_v3, %v3188_v32 }
 0x245   : > { %5432 = vmatpush3.bf16.msra.mxu1 %v5431_v17  ;;  %v3964_v17 = vld [vmem:[%s8236_s4 + $0x650] sm:$0xff] }
 0x246   : > { %5465 = vmatprep.subr.bf16.mxu1 %v5433_v18  ;;  %5396 = vmatpush3.bf16.msra.mxu0 %v5395_v7  ;;  %v3983_v7 = vld [vmem:[%s8236_s4 + $0x6e8] sm:$0xff]  ;;  %v5455_v52 = vpack.c.bf16 %v3965_v58, %v3964_v17 }
 0x247   : > { %5398 = vmatprep.subr.bf16.mxu0 %v5397_v27  ;;  %v3984_v27 = vld [vmem:[%s8236_s4 + $0x6f0] sm:$0xff] }
 0x248   : > { %3131 = vmatmul.mubr.f32.vlgmr.msra.gmra.mrb[36].mxu1 %v3054_v39  ;;  %v5461_v8 = vpack.c.bf16 %v3985_v29, %v3984_v27 }
 0x249   : > { %3135 = vmatprep.mubr.f32.mxu1 %v3061_v41  ;;  %5473 = vmatpush3.bf16.msra.mxu1 %v5435_v34 }
 0x24a   : > { %5466 = vmatprep.subr.bf16.mxu1 %v5437_v11  ;;  %5400 = vmatpush3.bf16.msra.mxu0 %v5399_v33  ;;  %v3143_v33 = vld [vmem:[#allocation2] sm:$0xc0] }
 0x24b   : > { %5434 = vmatprep.subr.bf16.mxu0 %v5433_v18  ;;  %v3982_v18 = vld [vmem:[%s8236_s4 + $0x6e0] sm:$0xff]  ;;  %v3184_v35 = vrot.slane %v3143_v33, 6 }
 0x24c   : > { %3136 = vmatmul.mubr.f32.gmra.mrb[38].mxu1 %v3059_v4  ;;  %v5457_v19 = vpack.c.bf16 %v3983_v7, %v3982_v18 }
 0x24d   : > { %5474 = vmatpush3.bf16.msra.mxu1 %v5439_v42  ;;  %3267 = vmatprep.mubr.f32.mxu1 %v3193_v50 }
 0x24e   : > { %2999 = vmatmul.mubr.f32.vlgmr.msra.gmra.mrb[36].mxu0 %v2922_v51  ;;  %5467 = vmatprep.subr.bf16.mxu1 %v5441_v12 }
 0x24f   : > { %3003 = vmatprep.mubr.f32.mxu0 %v2929_v59  ;;  %5436 = vmatpush3.bf16.msra.mxu0 %v5435_v34  ;;  %v5463_v34 = vpack.c.bf16 %v3969_v47, %v3968_v24 }
 0x250   : > { %5438 = vmatprep.subr.bf16.mxu0 %v5437_v11  ;;  %v3185_v11 = vrot.slane %v7647_v20, 6 }
 0x251   : > { %5475 = vmatpush3.bf16.msra.mxu1 %v5443_v36 }
 0x252   : > { %3004 = vmatmul.mubr.f32.gmra.mrb[38].mxu0 %v2927_v13  ;;  %5468 = vmatprep.subr.bf16.mxu1 %v5445_v61  ;;  %v3191_v54 = vsel %vm2077_vm8, %v3185_v11, %v3190_v53  ;;  %v3186_v37 = vsel %vm2077_vm8, %v3184_v35, %v3185_v11 }
 0x253   : > { %5440 = vmatpush3.bf16.msra.mxu0 %v5439_v42  ;;  %3262 = vmatprep.mubr.f32.mxu0 %v3189_v6 }
 0x254   : > { %5442 = vmatprep.subr.bf16.mxu0 %v5441_v12 }
 0x255   : > { %5476 = vmatpush3.bf16.msra.mxu1 %v5447_v5 }
 0x256   : > { %5469 = vmatprep.subr.bf16.mxu1 %v5449_v9 }
 0x257   : > { %5444 = vmatpush3.bf16.msra.mxu0 %v5443_v36 }
 0x258   : > { %5446 = vmatprep.subr.bf16.mxu0 %v5445_v61 }
 0x259   : > { %5477 = vmatpush3.bf16.msra.mxu1 %v5451_v15 }
 0x25a   : > { %5470 = vmatprep.subr.bf16.mxu1 %v5453_v16 }
 0x25b   : > { %5448 = vmatpush3.bf16.msra.mxu0 %v5447_v5 }
 0x25c   : > { %5450 = vmatprep.subr.bf16.mxu0 %v5449_v9 }
 0x25d   : > { %5478 = vmatpush3.bf16.msra.mxu1 %v5455_v52 }
 0x25e   : > { %5471 = vmatprep.subr.bf16.mxu1 %v5457_v19 }
 0x25f   : > { %5452 = vmatpush3.bf16.msra.mxu0 %v5451_v15 }
 0x260   : > { %5454 = vmatprep.subr.bf16.mxu0 %v5453_v16 }
 0x261   : > { %5479 = vmatpush3.bf16.msra.mxu1 %v5459_v46 }
 0x262   : > { %5472 = vmatprep.subr.bf16.mxu1 %v5461_v8 }
 0x263   : > { %5456 = vmatpush3.bf16.msra.mxu0 %v5455_v52 }
 0x264   : > { %5458 = vmatprep.subr.bf16.mxu0 %v5457_v19 }
 0x265   : > { %5480 = vmatpush3.bf16.msra.mxu1 %v5463_v34 }
 0x267   : > { %5460 = vmatpush3.bf16.msra.mxu0 %v5459_v46 }
 0x268   : > { %3268 = vmatmul.mubr.f32.vlgmr.msra.gmra.mrb[40].mxu1 %v3191_v54  ;;  %5462 = vmatprep.subr.bf16.mxu0 %v5461_v8 }
 0x26b   : > { %5464 = vmatpush3.bf16.msra.mxu0 %v5463_v34 }
 0x26e   : > { %3263 = vmatmul.mubr.f32.vlgmr.msra.gmra.mrb[40].mxu0 %v3186_v37 }
 0x2da   : > { %v4597_v39 = vpop.f32.mrb[28].mxu1 }
 0x2db   : > { %v4598_v28 = vpop.f32.mrb[29].mxu1 }
 0x2dc   : > { %v4599_v40 = vadd.f32 %v4598_v28, %v4597_v39 }
 0x2de   : > { %v4559_v22 = vpop.f32.mrb[28].mxu0  ;;  %v4600_v30 = vpop.f32.mrb[30].mxu1 }
 0x2df   : > { %v4560_v41 = vpop.f32.mrb[29].mxu0  ;;  %v4601_v55 = vpop.f32.mrb[31].mxu1 }
 0x2e0   : > { %v4561_v42 = vadd.f32 %v4560_v41, %v4559_v22  ;;  %v4602_v20 = vadd.f32 %v4601_v55, %v4600_v30  ;;  %v5552_v30 = vld [vmem:[%s5940_s23 + $0x18] sm:$0xff]  ;;  %v5553_v55 = vld [vmem:[%s5940_s23 + $0x28] sm:$0xff] }
 0x2e2   : > { %v2607_v2 = vadd.f32 %v4599_v40, %v4561_v42  ;;  %v4562_v32 = vpop.f32.mrb[30].mxu0  ;;  %v5551_v40 = vld [vmem:[%s5940_s23 + $0x8] sm:$0xff] }
 0x2e3   : > { %v4563_v12 = vpop.f32.mrb[31].mxu0 }
 0x2e4   : > { %v4564_v38 = vadd.f32 %v4563_v12, %v4562_v32  ;;  %v5555_v12 = vld [vmem:[%s5940_s23] sm:$0xff] }
 0x2e6   : > { %v2612_v44 = vadd.f32 %v4602_v20, %v4564_v38  ;;  %v5554_v20 = vld [vmem:[%s5940_s23 + $0x38] sm:$0xff] }
 0x2fb   : > { %v4673_v23 = vpop.f32.mrb[32].mxu1 }
 0x2fc   : > { %v4674_v1 = vpop.f32.mrb[33].mxu1 }
 0x2fd   : > { %v4675_v4 = vadd.f32 %v4674_v1, %v4673_v23  ;;  %v5557_v1 = vld [vmem:[%s5940_s23 + $0x20] sm:$0xff] }
 0x2fe   : > { %v4635_v31 = vpop.f32.mrb[32].mxu0 }
 0x2ff   : > { %v4676_v45 = vpop.f32.mrb[34].mxu1  ;;  %v4636_v43 = vpop.f32.mrb[33].mxu0 }
 0x300   : > { %v4677_v49 = vpop.f32.mrb[35].mxu1  ;;  %v4637_v50 = vadd.f32 %v4636_v43, %v4635_v31  ;;  %v5558_v31 = vld [vmem:[%s5940_s23 + $0x30] sm:$0xff] }
 0x301   : > { %v4678_v51 = vadd.f32 %v4677_v49, %v4676_v45 }
 0x302   : > { %v2745_v36 = vadd.f32 %v4637_v50, %v2607_v2  ;;  %v4638_v57 = vpop.f32.mrb[34].mxu0 }
 0x303   : > { %v4639_v59 = vpop.f32.mrb[35].mxu0 }
 0x304   : > { %v4640_v61 = vadd.f32 %v4639_v59, %v4638_v57  ;;  %v2877_v56 = vadd.f32 %v4675_v4, %v2745_v36 }
 0x306   : > { %v2746_v48 = vadd.f32 %v4640_v61, %v2612_v44  ;;  %v5556_v44 = vld [vmem:[%s5940_s23 + $0x10] sm:$0xff]  ;;  %s5565_s23 = scalar_lea.vmem %s5564_s29, 2048 }
 0x307   : > { %p5567_p1 = scmp.lt.s32.totalorder %s5565_s23, %s5559_s25 }
 0x308   : > { %v2878_v3 = vadd.f32 %v4678_v51, %v2746_v48 }
 0x309   : > { %p5568_p2 = por %p5567_p1, %p5566_p0 }
 0x30b   : > { %p5569_p3 = pnand %p5568_p2, %p5562_p13 }
 0x31b   : > { %v4749_v60 = vpop.f32.mrb[36].mxu1 }
 0x31c   : > { %v4750_v21 = vpop.f32.mrb[37].mxu1 }
 0x31d   : > { %v4751_v13 = vadd.f32 %v4750_v21, %v4749_v60 }
 0x31f   : > { %v4752_v5 = vpop.f32.mrb[38].mxu1 }
 0x320   : > { %v4753_v6 = vpop.f32.mrb[39].mxu1 }
 0x321   : > { %v4754_v9 = vadd.f32 %v4753_v6, %v4752_v5  ;;  %v4711_v0 = vpop.f32.mrb[36].mxu0 }
 0x322   : > { %v4712_v14 = vpop.f32.mrb[37].mxu0 }
 0x323   : > { %v4713_v10 = vadd.f32 %v4712_v14, %v4711_v0 }
 0x325   : > { %v3009_v62 = vadd.f32 %v4713_v10, %v2877_v56  ;;  %v4714_v15 = vpop.f32.mrb[38].mxu0 }
 0x326   : > { %v4715_v16 = vpop.f32.mrb[39].mxu0 }
 0x327   : > { %v4716_v17 = vadd.f32 %v4715_v16, %v4714_v15  ;;  %v3141_v58 = vadd.f32 %v4751_v13, %v3009_v62 }
 0x329   : > { %v3010_v18 = vadd.f32 %v4716_v17, %v2878_v3 }
 0x32b   : > { %v3142_v7 = vadd.f32 %v4754_v9, %v3010_v18 }
 0x33b   : > { %v4790_v52 = vpop.f32.mrb[40].mxu1 }
 0x33c   : > { %v4791_v19 = vpop.f32.mrb[41].mxu1 }
 0x33d   : > { %v4792_v25 = vadd.f32 %v4791_v19, %v4790_v52 }
 0x33f   : > { %v3274_v27 = vadd.f32 %v4792_v25, %v3142_v7 }
 0x341   : > { %v3283_v29 = vadd.f32 %v3986_v26, %v3274_v27  ;;  %v4787_v46 = vpop.f32.mrb[40].mxu0 }
 0x342   : > { %v4788_v8 = vpop.f32.mrb[41].mxu0 }
 0x343   : > { %v3285_v24 = vsub.f32 0.0, %v3283_v29  ;;  %v4789_v47 = vadd.f32 %v4788_v8, %v4787_v46 }
 0x345   : > { %v3288_v63 = vmul.f32 1.442695, %v3285_v24  ;;  %v3273_v34 = vadd.f32 %v4789_v47, %v3141_v58 }
 0x347   : > { %5539 = vpow2.f32 %v3288_v63  ;;  %v3282_v53 = vadd.f32 %v3986_v26, %v3273_v34 }
 0x349   : > { %v3284_v11 = vsub.f32 0.0, %v3282_v53 }
 0x34b   : > { %v3286_v33 = vmul.f32 1.442695, %v3284_v11 }
 0x34d   : > { %5541 = vpow2.f32 %v3286_v33 }
 0x351   : > { %v5540_v54 = vpop.eup %5539 }
 0x352   : > { %v3291_v35 = vadd.f32 1.0, %v5540_v54 }
 0x354   : > { %5543 = vrcp.f32 %v3291_v35 }
 0x357   : > { %v5542_v37 = vpop.eup %5541 }
 0x358   : > { %v3290_v39 = vadd.f32 1.0, %v5542_v37 }
 0x35a   : > { %5545 = vrcp.f32 %v3290_v39 }
 0x35e   : > { %v5544_v28 = vpop.eup %5543 }
 0x35f   : > { %v3295_v22 = vmul.f32 %v5551_v40, %v5544_v28  ;;  %v3297_v41 = vmul.f32 %v5552_v30, %v5544_v28  ;;  %v3299_v42 = vmul.f32 %v5553_v55, %v5544_v28  ;;  %v3301_v2 = vmul.f32 %v5554_v20, %v5544_v28 }
 0x361   : > { %3303 = vst.msk [vmem:[%s340_s17 + $0x8] sm:$0xff] %vm367_vm0, %v3295_v22  ;;  %3305 = vst.msk [vmem:[%s340_s17 + $0x18] sm:$0xff] %vm367_vm0, %v3297_v41 }
 0x362   : > { %3307 = vst.msk [vmem:[%s340_s17 + $0x28] sm:$0xff] %vm367_vm0, %v3299_v42  ;;  %3309 = vst.msk [vmem:[%s340_s17 + $0x38] sm:$0xff] %vm367_vm0, %v3301_v2 }
 0x364   : > { %v5546_v32 = vpop.eup %5545 }
 0x365   : > { %v3294_v38 = vmul.f32 %v5555_v12, %v5546_v32  ;;  %v3296_v23 = vmul.f32 %v5556_v44, %v5546_v32  ;;  %v3298_v4 = vmul.f32 %v5557_v1, %v5546_v32  ;;  %v3300_v45 = vmul.f32 %v5558_v31, %v5546_v32 }
 0x367   : > { %3302 = vst.msk [vmem:[%s340_s17] sm:$0xff] %vm367_vm0, %v3294_v38  ;;  %3304 = vst.msk [vmem:[%s340_s17 + $0x10] sm:$0xff] %vm367_vm0, %v3296_v23 }
 0x368   : > { %3306 = vst.msk [vmem:[%s340_s17 + $0x20] sm:$0xff] %vm367_vm0, %v3298_v4  ;;  %3308 = vst.msk [vmem:[%s340_s17 + $0x30] sm:$0xff] %vm367_vm0, %v3300_v45 }
 0x369   : > { %5572 = shalt.err (!%p5569_p3)
}
 0x36a   : > { %s5573_s14 = scalar_lea.hbm %s8177_s27, 1024  ;;  %s5577_s17 = scalar_lea.hbm %s8241_s9, 2048 }
 0x36b   : > { %p5574_p4 = scmp.ne.s32.totalorder %s8177_s27, %s5573_s14  ;;  %p5578_p9 = scmp.lt.u32.totalorder %s8177_s27, %s8241_s9 }
 0x36c   : > { %p5579_p10 = scmp.lt.u32.totalorder %s5577_s17, %s5573_s14  ;;  %p5581_p12 = scmp.lt.u32.totalorder %s5573_s14, %s8177_s27 }
 0x36d   : > { %p5575_p7 = pnand %p5574_p4, %p5715_p5 }
 0x36e   : > { %p5580_p11 = por %p5579_p10, %p5578_p9 }
 0x36f   : > { %p5576_p8 = pneg %p5575_p7 }
 0x370   : > { %p5582_p13 = por %p5581_p12, %p5580_p11 }
 0x372   : > { %p5583_p0 = pnand %p5582_p13, %p5576_p8 }
 0x374   : > { %5586 = shalt.err (!%p5583_p0)
}
 0x375   : > { %s5625_s21 = smov 128   ;;  %s5626_s25 = smov 8  }
 0x376   : > { %5481 = dma.vmem_to_hbm [thread:$0]  (%p5715_p5), %s8179_s24, 1024, %s8177_s27, %s8191_s13, %s5625_s21, %s5625_s21, %s5626_s25  }
 0x377 PF: > { %p5487_p1 = scmp.ge.s32.totalorder %s5621_s12, 2  ;;  %s3339_s26 = sand.u32 1, %s5609_s30  }
 0x378   : > { %s3340_s29 = scalar_lea.sflag [#allocation4], %s3339_s26 }
 0x379   : > { %p5484_p2 = pnand %p5487_p1, %p5719_p6 }
 0x37b   : > { %5604 = dma.done.wait (!%p5484_p2), %s3340_s29, 1024  }
 0x37c   : > { %5606 = vsyncadd (!%p5484_p2), %s3340_s29, 4294966272  ;;  %s8245_s23 = sld [smem:[#allocation6_spill]]  ;;  %p19_p3 = scmp.ge.s32.totalorder %s5702_s15, 4  }
 0x37d   : > { %s8246_s30 = smov %s5613_s10  ;;  %s8247_s10 = smov %s5617_s11 }
 0x37e   : > { %s8249_s12 = smov %s5702_s15  ;;  %21 = sbr.rel (!%p19_p3) target bundleno = 3 (0x3), region = 112 }
 0x382   : > { %s8248_s11 = smov %s8245_s23 }
 0x385   :  { %3345 = vsyncpa [#allocation4], 1 }
 0x386   :  { %3347 = vsyncpa [#allocation4 + $0x1], 1 }

</bundles_post_ra>
